<compile_context>
chip_gen: v7x
topology: tpu7x:2x2x1
jax: 0.10.0
libtpu: 0.0.40
codegen_flags: <defaults>
</compile_context>

<pallas_src>
import functools
import math

import jax
import jax.numpy as jnp
from jax import lax
from jax.experimental import pallas as pl
from jax.experimental.pallas import tpu as pltpu

EPS = 1e-3  # BNPReLU uses nn.BatchNorm2d(eps=0.001)


# ----------------------------- fused kernel ----------------------------------

def dase_kernel(x_ref, mk_ref, pool_ref, bcast_ref, vc_ref, v2_ref, w_in_ref,
                w3x1_ref, w1x3_ref, wdw_ref, w_out_ref,
                se1_w1_ref, se1_w2_ref, se2_w1_ref, se2_w2_ref,
                seo_w1_ref, seo_w2_ref, o_ref, *, W, d):
    x = x_ref[...]                      # (C, L) ; L = B*HW, channels on sublanes
    L = x.shape[1]
    mk = mk_ref[...]                    # (8, L)  {0,1} tap-validity masks (hoisted)
    pool = pool_ref[...]                # (L, B)  block-diag 1/HW  (per-image GAP)
    bc = bcast_ref[...]                 # (B, L)  block-diag 1     (gate broadcast)
    vc = vc_ref[...]                    # (C, 3)  bn1 scale, bn1 bias, alpha1
    v2 = v2_ref[...]                    # (C2, 15) per-channel biases / alphas / bn2
    wdw = wdw_ref[...]                  # (C2, 12) 4 depthwise convs x 3 taps (BN folded)

    col = lambda a, j: a[:, j:j + 1]    # (Ck, 1) column, broadcasts over lanes

    # Shifted-tap helpers: lane rolls (XLU) + precomputed boundary masks.
    # mask rows: 0 up1  1 dn1  2 lf1  3 rt1  4 up_d  5 dn_d  6 lf_d  7 rt_d
    def roll_up(t, rows, mrow):         # value from row h - rows (zero padded)
        return mk[mrow:mrow + 1, :] * pltpu.roll(t, rows * W, axis=1)

    def roll_dn(t, rows, mrow):         # value from row h + rows
        return mk[mrow:mrow + 1, :] * pltpu.roll(t, (L - rows * W) % L, axis=1)

    def roll_lf(t, cols, mrow):         # value from col w - cols
        return mk[mrow:mrow + 1, :] * pltpu.roll(t, cols, axis=1)

    def roll_rt(t, cols, mrow):         # value from col w + cols
        return mk[mrow:mrow + 1, :] * pltpu.roll(t, (L - cols) % L, axis=1)

    def prelu(y, a):
        return jnp.where(y >= 0, y, a * y)

    def se(t, w1, w2):
        # t: (Ck, L).  Per-image GAP, 2 tiny FCs, sigmoid gate, broadcast back.
        g = jnp.dot(t, pool, preferred_element_type=jnp.float32)          # (Ck, B)
        h = jnp.maximum(jnp.dot(w1, g, preferred_element_type=jnp.float32), 0.0)  # (Cr, B)
        z = jnp.dot(w2, h, preferred_element_type=jnp.float32)            # (Ck, B)
        gate = 1.0 / (1.0 + jnp.exp(-z))                                   # exact sigmoid
        return t * jnp.dot(gate, bc, preferred_element_type=jnp.float32)  # (Ck, L)

    # ---- bn_relu_1 (folded scale/bias) + conv1x1_in --------------------------
    o = prelu(x * col(vc, 0) + col(vc, 1), col(vc, 2))
    o = jnp.dot(w_in_ref[...], o, preferred_element_type=jnp.float32)     # (C2, L)

    up1 = roll_up(o, 1, 0)              # shared by conv3x1 and dconv3x1
    dn1 = roll_dn(o, 1, 1)

    # ---- main branch: conv3x1 -> conv1x3 (BN folded, fused 3-tap K=3*C2 dot) -
    m = jnp.dot(w3x1_ref[...], jnp.concatenate([up1, o, dn1], axis=0),
                preferred_element_type=jnp.float32)
    m = prelu(m + col(v2, 0), col(v2, 1))
    m2 = jnp.dot(w1x3_ref[...],
                 jnp.concatenate([roll_lf(m, 1, 2), m, roll_rt(m, 1, 3)], axis=0),
                 preferred_element_type=jnp.float32)
    main = prelu(m2 + col(v2, 2), col(v2, 3))

    # ---- branch 1: depthwise 3x1 -> 1x3 -> SE (ratio 8) ----------------------
    b1 = prelu(col(wdw, 0) * up1 + col(wdw, 1) * o + col(wdw, 2) * dn1
               + col(v2, 4), col(v2, 5))
    b1 = prelu(col(wdw, 3) * roll_lf(b1, 1, 2) + col(wdw, 4) * b1
               + col(wdw, 5) * roll_rt(b1, 1, 3) + col(v2, 6), col(v2, 7))
    b1 = se(b1, se1_w1_ref[...], se1_w2_ref[...])

    # ---- branch 2: dilated depthwise 3x1 -> 1x3 -> SE (ratio 8) --------------
    b2 = prelu(col(wdw, 6) * roll_up(o, d, 4) + col(wdw, 7) * o
               + col(wdw, 8) * roll_dn(o, d, 5) + col(v2, 8), col(v2, 9))
    b2 = prelu(col(wdw, 9) * roll_lf(b2, d, 6) + col(wdw, 10) * b2
               + col(wdw, 11) * roll_rt(b2, d, 7) + col(v2, 10), col(v2, 11))
    b2 = se(b2, se2_w1_ref[...], se2_w2_ref[...])

    # ---- combine, bn_relu_2, conv1x1 expand, se_out + residual ---------------
    t = b1 + b2 + main
    t = prelu(t * col(v2, 12) + col(v2, 13), col(v2, 14))
    y = jnp.dot(w_out_ref[...], t, preferred_element_type=jnp.float32)    # (C, L)
    y = se(y, seo_w1_ref[...], seo_w2_ref[...]) + x
    o_ref[...] = y


# ----------------------------- forward wrapper -------------------------------

def _pick_block_batch(N, max_b):
    """Largest per-step image count that divides N; prefer >=2 grid steps (v7x)."""
    candidates = [b for b in range(1, min(N, max_b) + 1) if N % b == 0]
    return max(candidates, key=lambda b: (N // b >= 2, b))


def dase_forward(x_nchw, p, d=1, max_images_per_block=16):
    # max_images_per_block=16: ~20 live (C or C2, B*HW) f32 intermediates
    # ≈ 0.35 MiB/image -> ~6 MiB at B=16, well inside v7x's 32 MiB scoped VMEM.
    x = x_nchw.astype(jnp.float32)
    N, C, H, W = x.shape
    C2 = C // 2
    HW = H * W
    B = _pick_block_batch(N, max_images_per_block)
    L = B * HW

    # channels -> sublanes, (image, spatial) -> lanes  (pure XLA layout plumbing)
    x_cl = x.transpose(1, 0, 2, 3).reshape(C, N * HW)

    # ---- precomputed tap-boundary masks + SE pooling/broadcast matrices ------
    lane = jnp.arange(L, dtype=jnp.int32)
    sp = lane % HW
    h_idx = sp // W
    w_idx = sp % W
    masks = jnp.stack([
        h_idx >= 1, h_idx < H - 1, w_idx >= 1, w_idx < W - 1,
        h_idx >= d, h_idx < H - d, w_idx >= d, w_idx < W - d,
    ], axis=0).astype(jnp.float32)                                   # (8, L)
    img = lane // HW
    onehot = (img[:, None] == jnp.arange(B)[None, :]).astype(jnp.float32)
    pool = onehot / HW                                               # (L, B)
    gate_bcast = onehot.T                                            # (B, L)

    # ---- fold inference-mode BN into conv weights / biases -------------------
    def fold(bn):
        gamma, beta, mean, var = bn
        sc = gamma * lax.rsqrt(var + EPS)
        return sc, beta - mean * sc

    s1, bb1 = fold(p['bn1'])
    vc = jnp.stack([s1, bb1, p['alpha1']], axis=1)                   # (C, 3)

    cols2, w_sep = [], []
    for name in ('3x1', '1x3'):
        sc, b = fold(p['bn_' + name])
        cols2 += [b, p['alpha_' + name]]
        w = p['w_' + name] * sc[None, :, None]                       # (tap, out, in) scaled
        w_sep.append(jnp.concatenate([w[0], w[1], w[2]], axis=1))    # (C2, 3*C2) fused taps
    w3x1f, w1x3f = w_sep

    dw_cols = []
    for name in ('d3x1', 'd1x3', 'dd3x1', 'dd1x3'):
        sc, b = fold(p['bn_' + name])
        cols2 += [b, p['alpha_' + name]]
        dw_cols.append(p['w_' + name] * sc[:, None])                 # (C2, 3) scaled
    s2, bb2 = fold(p['bn2'])
    cols2 += [s2, bb2, p['alpha2']]

    v2 = jnp.stack(cols2, axis=1)                                    # (C2, 15)
    wdw = jnp.concatenate(dw_cols, axis=1)                           # (C2, 12)

    const_spec = lambda shape: pl.BlockSpec(shape, lambda b: (0,) * len(shape))

    out = pl.pallas_call(
        functools.partial(dase_kernel, W=W, d=d),
        out_shape=jax.ShapeDtypeStruct((C, N * HW), jnp.float32),
        grid=(N // B,),
        in_specs=[
            pl.BlockSpec((C, L), lambda b: (0, b)),                  # x (B images/step)
            const_spec((8, L)),                                      # tap masks
            const_spec((L, B)),                                      # SE pool matrix
            const_spec((B, L)),                                      # SE gate broadcast
            const_spec((C, 3)),                                      # vc
            const_spec((C2, 15)),                                    # v2
            const_spec((C2, C)),                                     # w_in
            const_spec((C2, 3 * C2)),                                # w3x1 fused (BN folded)
            const_spec((C2, 3 * C2)),                                # w1x3 fused (BN folded)
            const_spec((C2, 12)),                                    # depthwise weights
            const_spec((C, C2)),                                     # w_out
            const_spec((C2 // 8, C2)), const_spec((C2, C2 // 8)),    # se1 fc1, fc2
            const_spec((C2 // 8, C2)), const_spec((C2, C2 // 8)),    # se2 fc1, fc2
            const_spec((C // 16, C)), const_spec((C, C // 16)),      # se_out fc1, fc2
        ],
        out_specs=pl.BlockSpec((C, L), lambda b: (0, b)),
        compiler_params=pltpu.CompilerParams(dimension_semantics=("parallel",)),
    )(x_cl, masks, pool, gate_bcast, vc, v2, p['w_in'], w3x1f, w1x3f, wdw,
      p['w_out'], p['se1_w1'], p['se1_w2'], p['se2_w1'], p['se2_w2'],
      p['seo_w1'], p['seo_w2'])

    # channel shuffle (groups = C//2) + back to NCHW (single XLA permutation)
    g = C2
    out = out.reshape(g, C // g, N, H, W).transpose(2, 1, 0, 3, 4).reshape(N, C, H, W)
    return out


# ----------------------------- parameter init --------------------------------

def init_params(key, C):
    C2 = C // 2
    ks = jax.random.split(key, 14)

    def conv_w(k, shape, fan_out):             # kaiming_normal, fan_out, relu
        return jax.random.normal(k, shape, jnp.float32) * math.sqrt(2.0 / fan_out)

    def bn(c):                                  # gamma, beta, running_mean, running_var
        return (jnp.ones((c,), jnp.float32), jnp.zeros((c,), jnp.float32),
                jnp.zeros((c,), jnp.float32), jnp.ones((c,), jnp.float32))

    def prelu(c):
        return jnp.full((c,), 0.25, jnp.float32)

    p = {}
    p['bn1'], p['alpha1'] = bn(C), prelu(C)
    p['w_in'] = conv_w(ks[0], (C2, C), fan_out=C2)                  # 1x1 (out, in)
    p['w_3x1'] = conv_w(ks[1], (3, C2, C2), fan_out=3 * C2)         # (tap, out, in)
    p['bn_3x1'], p['alpha_3x1'] = bn(C2), prelu(C2)
    p['w_1x3'] = conv_w(ks[2], (3, C2, C2), fan_out=3 * C2)
    p['bn_1x3'], p['alpha_1x3'] = bn(C2), prelu(C2)
    p['w_d3x1'] = conv_w(ks[3], (C2, 3), fan_out=3)                 # depthwise (ch, tap)
    p['bn_d3x1'], p['alpha_d3x1'] = bn(C2), prelu(C2)
    p['w_d1x3'] = conv_w(ks[4], (C2, 3), fan_out=3)
    p['bn_d1x3'], p['alpha_d1x3'] = bn(C2), prelu(C2)
    p['w_dd3x1'] = conv_w(ks[5], (C2, 3), fan_out=3)
    p['bn_dd3x1'], p['alpha_dd3x1'] = bn(C2), prelu(C2)
    p['w_dd1x3'] = conv_w(ks[6], (C2, 3), fan_out=3)
    p['bn_dd1x3'], p['alpha_dd1x3'] = bn(C2), prelu(C2)
    p['bn2'], p['alpha2'] = bn(C2), prelu(C2)
    p['w_out'] = conv_w(ks[7], (C, C2), fan_out=C)                  # 1x1 expand (out, in)

    # SE Linear weights ~ N(0, 0.01), bias=False (matches nn.Linear(..., bias=False))
    r1, r2 = 8, 16
    p['se1_w1'] = jax.random.normal(ks[8], (C2 // r1, C2), jnp.float32) * 0.01
    p['se1_w2'] = jax.random.normal(ks[9], (C2, C2 // r1), jnp.float32) * 0.01
    p['se2_w1'] = jax.random.normal(ks[10], (C2 // r1, C2), jnp.float32) * 0.01
    p['se2_w2'] = jax.random.normal(ks[11], (C2, C2 // r1), jnp.float32) * 0.01
    p['seo_w1'] = jax.random.normal(ks[12], (C // r2, C), jnp.float32) * 0.01
    p['seo_w2'] = jax.random.normal(ks[13], (C, C // r2), jnp.float32) * 0.01
    return p


# ----------------------------- main -------------------------------------------

if __name__ == "__main__":
    key = jax.random.PRNGKey(0)
    kx, kp = jax.random.split(key)
    N, C, H, W = 4, 32, 16, 16                 # nIn = 32, NCHW like PyTorch
    x = jax.random.normal(kx, (N, C, H, W), jnp.float32)
    params = init_params(kp, C)

    fwd = jax.jit(functools.partial(dase_forward, d=1))
    out = fwd(x, params)
    jax.block_until_ready(out)
    assert out.shape == (N, C, H, W) and out.dtype == jnp.float32
    assert bool(jnp.all(jnp.isfinite(out)))
    print("KERNEL_OK")
</pallas_src>

<mosaic_0001>
module attributes {stable_mosaic.version = 11 : i64} {
  func.func @dase_kernel(%arg0: i32, %arg1: memref<32x512xf32, #tpu.memory_space<vmem>>, %arg2: memref<8x512xf32, #tpu.memory_space<vmem>>, %arg3: memref<512x2xf32, #tpu.memory_space<vmem>>, %arg4: memref<2x512xf32, #tpu.memory_space<vmem>>, %arg5: memref<32x3xf32, #tpu.memory_space<vmem>>, %arg6: memref<16x15xf32, #tpu.memory_space<vmem>>, %arg7: memref<16x32xf32, #tpu.memory_space<vmem>>, %arg8: memref<16x48xf32, #tpu.memory_space<vmem>>, %arg9: memref<16x48xf32, #tpu.memory_space<vmem>>, %arg10: memref<16x12xf32, #tpu.memory_space<vmem>>, %arg11: memref<32x16xf32, #tpu.memory_space<vmem>>, %arg12: memref<2x16xf32, #tpu.memory_space<vmem>>, %arg13: memref<16x2xf32, #tpu.memory_space<vmem>>, %arg14: memref<2x16xf32, #tpu.memory_space<vmem>>, %arg15: memref<16x2xf32, #tpu.memory_space<vmem>>, %arg16: memref<2x32xf32, #tpu.memory_space<vmem>>, %arg17: memref<32x2xf32, #tpu.memory_space<vmem>>, %arg18: memref<32x512xf32, #tpu.memory_space<vmem>>) attributes {dimension_semantics = [#tpu.dimension_semantics<parallel>], iteration_bounds = array<i64: 2>, scalar_prefetch = 0 : i64, scratch_operands = 0 : i64, tpu.core_type = #tpu.core_type<tc>, window_params = [{transform_indices = @transform_0, window_bounds = array<i64: 32, 512>}, {pipeline_mode = #tpu.pipeline_mode<synchronous>, transform_indices = @transform_1, window_bounds = array<i64: 8, 512>}, {pipeline_mode = #tpu.pipeline_mode<synchronous>, transform_indices = @transform_2, window_bounds = array<i64: 512, 2>}, {pipeline_mode = #tpu.pipeline_mode<synchronous>, transform_indices = @transform_3, window_bounds = array<i64: 2, 512>}, {pipeline_mode = #tpu.pipeline_mode<synchronous>, transform_indices = @transform_4, window_bounds = array<i64: 32, 3>}, {pipeline_mode = #tpu.pipeline_mode<synchronous>, transform_indices = @transform_5, window_bounds = array<i64: 16, 15>}, {pipeline_mode = #tpu.pipeline_mode<synchronous>, transform_indices = @transform_6, window_bounds = array<i64: 16, 32>}, {pipeline_mode = #tpu.pipeline_mode<synchronous>, transform_indices = @transform_7, window_bounds = array<i64: 16, 48>}, {pipeline_mode = #tpu.pipeline_mode<synchronous>, transform_indices = @transform_8, window_bounds = array<i64: 16, 48>}, {pipeline_mode = #tpu.pipeline_mode<synchronous>, transform_indices = @transform_9, window_bounds = array<i64: 16, 12>}, {pipeline_mode = #tpu.pipeline_mode<synchronous>, transform_indices = @transform_10, window_bounds = array<i64: 32, 16>}, {pipeline_mode = #tpu.pipeline_mode<synchronous>, transform_indices = @transform_11, window_bounds = array<i64: 2, 16>}, {pipeline_mode = #tpu.pipeline_mode<synchronous>, transform_indices = @transform_12, window_bounds = array<i64: 16, 2>}, {pipeline_mode = #tpu.pipeline_mode<synchronous>, transform_indices = @transform_13, window_bounds = array<i64: 2, 16>}, {pipeline_mode = #tpu.pipeline_mode<synchronous>, transform_indices = @transform_14, window_bounds = array<i64: 16, 2>}, {pipeline_mode = #tpu.pipeline_mode<synchronous>, transform_indices = @transform_15, window_bounds = array<i64: 2, 32>}, {pipeline_mode = #tpu.pipeline_mode<synchronous>, transform_indices = @transform_16, window_bounds = array<i64: 32, 2>}, {transform_indices = @transform_17, window_bounds = array<i64: 32, 512>}]} {
    %c0 = arith.constant 0 : index
    %c0_0 = arith.constant 0 : index
    %0 = vector.load %arg1[%c0, %c0_0] : memref<32x512xf32, #tpu.memory_space<vmem>>, vector<32x512xf32>
    %c0_1 = arith.constant 0 : index
    %c0_2 = arith.constant 0 : index
    %1 = vector.load %arg2[%c0_1, %c0_2] : memref<8x512xf32, #tpu.memory_space<vmem>>, vector<8x512xf32>
    %c0_3 = arith.constant 0 : index
    %c0_4 = arith.constant 0 : index
    %2 = vector.load %arg3[%c0_3, %c0_4] : memref<512x2xf32, #tpu.memory_space<vmem>>, vector<512x2xf32>
    %c0_5 = arith.constant 0 : index
    %c0_6 = arith.constant 0 : index
    %3 = vector.load %arg4[%c0_5, %c0_6] : memref<2x512xf32, #tpu.memory_space<vmem>>, vector<2x512xf32>
    %c0_7 = arith.constant 0 : index
    %c0_8 = arith.constant 0 : index
    %4 = vector.load %arg5[%c0_7, %c0_8] : memref<32x3xf32, #tpu.memory_space<vmem>>, vector<32x3xf32>
    %c0_9 = arith.constant 0 : index
    %c0_10 = arith.constant 0 : index
    %5 = vector.load %arg6[%c0_9, %c0_10] : memref<16x15xf32, #tpu.memory_space<vmem>>, vector<16x15xf32>
    %c0_11 = arith.constant 0 : index
    %c0_12 = arith.constant 0 : index
    %6 = vector.load %arg10[%c0_11, %c0_12] : memref<16x12xf32, #tpu.memory_space<vmem>>, vector<16x12xf32>
    %7 = vector.extract_strided_slice %4 {offsets = [0, 0], sizes = [32, 1], strides = [1, 1]} : vector<32x3xf32> to vector<32x1xf32>
    %8 = vector.broadcast %7 : vector<32x1xf32> to vector<32x512xf32>
    %9 = arith.mulf %0, %8 : vector<32x512xf32>
    %10 = vector.extract_strided_slice %4 {offsets = [0, 1], sizes = [32, 1], strides = [1, 1]} : vector<32x3xf32> to vector<32x1xf32>
    %11 = vector.broadcast %10 : vector<32x1xf32> to vector<32x512xf32>
    %12 = arith.addf %9, %11 : vector<32x512xf32>
    %13 = vector.extract_strided_slice %4 {offsets = [0, 2], sizes = [32, 1], strides = [1, 1]} : vector<32x3xf32> to vector<32x1xf32>
    %cst = arith.constant 0.000000e+00 : f32
    %14 = vector.broadcast %cst : f32 to vector<32x512xf32>
    %15 = arith.cmpf oge, %12, %14 : vector<32x512xf32>
    %16 = vector.broadcast %13 : vector<32x1xf32> to vector<32x512xf32>
    %17 = arith.mulf %16, %12 : vector<32x512xf32>
    %18 = arith.select %15, %12, %17 : vector<32x512xi1>, vector<32x512xf32>
    %c0_13 = arith.constant 0 : index
    %c0_14 = arith.constant 0 : index
    %19 = vector.load %arg7[%c0_13, %c0_14] : memref<16x32xf32, #tpu.memory_space<vmem>>, vector<16x32xf32>
    %cst_15 = arith.constant dense<0.000000e+00> : vector<16x512xf32>
    %20 = tpu.matmul %19, %18, %cst_15 {dimension_numbers = #tpu.dot_dimension_numbers<[1], [0], [0], [1], [0, 0, 1, 1], [], []>} : vector<16x32xf32>, vector<32x512xf32>, vector<16x512xf32> -> vector<16x512xf32>
    %21 = vector.extract_strided_slice %1 {offsets = [0, 0], sizes = [1, 512], strides = [1, 1]} : vector<8x512xf32> to vector<1x512xf32>
    %c16_i32 = arith.constant 16 : i32
    %22 = tpu.dynamic_rotate %20 by %c16_i32 dim 1 : vector<16x512xf32>, i32 -> vector<16x512xf32>
    %23 = vector.broadcast %21 : vector<1x512xf32> to vector<16x512xf32>
    %24 = arith.mulf %23, %22 : vector<16x512xf32>
    %25 = vector.extract_strided_slice %1 {offsets = [1, 0], sizes = [1, 512], strides = [1, 1]} : vector<8x512xf32> to vector<1x512xf32>
    %c496_i32 = arith.constant 496 : i32
    %26 = tpu.dynamic_rotate %20 by %c496_i32 dim 1 : vector<16x512xf32>, i32 -> vector<16x512xf32>
    %27 = vector.broadcast %25 : vector<1x512xf32> to vector<16x512xf32>
    %28 = arith.mulf %27, %26 : vector<16x512xf32>
    %c0_16 = arith.constant 0 : index
    %c0_17 = arith.constant 0 : index
    %29 = vector.load %arg8[%c0_16, %c0_17] : memref<16x48xf32, #tpu.memory_space<vmem>>, vector<16x48xf32>
    %30 = tpu.concatenate %24, %20, %28 in 0 : vector<16x512xf32>, vector<16x512xf32>, vector<16x512xf32> -> vector<48x512xf32>
    %cst_18 = arith.constant dense<0.000000e+00> : vector<16x512xf32>
    %31 = tpu.matmul %29, %30, %cst_18 {dimension_numbers = #tpu.dot_dimension_numbers<[1], [0], [0], [1], [0, 0, 1, 1], [], []>} : vector<16x48xf32>, vector<48x512xf32>, vector<16x512xf32> -> vector<16x512xf32>
    %32 = vector.extract_strided_slice %5 {offsets = [0, 0], sizes = [16, 1], strides = [1, 1]} : vector<16x15xf32> to vector<16x1xf32>
    %33 = vector.broadcast %32 : vector<16x1xf32> to vector<16x512xf32>
    %34 = arith.addf %31, %33 : vector<16x512xf32>
    %35 = vector.extract_strided_slice %5 {offsets = [0, 1], sizes = [16, 1], strides = [1, 1]} : vector<16x15xf32> to vector<16x1xf32>
    %cst_19 = arith.constant 0.000000e+00 : f32
    %36 = vector.broadcast %cst_19 : f32 to vector<16x512xf32>
    %37 = arith.cmpf oge, %34, %36 : vector<16x512xf32>
    %38 = vector.broadcast %35 : vector<16x1xf32> to vector<16x512xf32>
    %39 = arith.mulf %38, %34 : vector<16x512xf32>
    %40 = arith.select %37, %34, %39 : vector<16x512xi1>, vector<16x512xf32>
    %c0_20 = arith.constant 0 : index
    %c0_21 = arith.constant 0 : index
    %41 = vector.load %arg9[%c0_20, %c0_21] : memref<16x48xf32, #tpu.memory_space<vmem>>, vector<16x48xf32>
    %42 = vector.extract_strided_slice %1 {offsets = [2, 0], sizes = [1, 512], strides = [1, 1]} : vector<8x512xf32> to vector<1x512xf32>
    %c1_i32 = arith.constant 1 : i32
    %43 = tpu.dynamic_rotate %40 by %c1_i32 dim 1 : vector<16x512xf32>, i32 -> vector<16x512xf32>
    %44 = vector.broadcast %42 : vector<1x512xf32> to vector<16x512xf32>
    %45 = arith.mulf %44, %43 : vector<16x512xf32>
    %46 = vector.extract_strided_slice %1 {offsets = [3, 0], sizes = [1, 512], strides = [1, 1]} : vector<8x512xf32> to vector<1x512xf32>
    %c511_i32 = arith.constant 511 : i32
    %47 = tpu.dynamic_rotate %40 by %c511_i32 dim 1 : vector<16x512xf32>, i32 -> vector<16x512xf32>
    %48 = vector.broadcast %46 : vector<1x512xf32> to vector<16x512xf32>
    %49 = arith.mulf %48, %47 : vector<16x512xf32>
    %50 = tpu.concatenate %45, %40, %49 in 0 : vector<16x512xf32>, vector<16x512xf32>, vector<16x512xf32> -> vector<48x512xf32>
    %cst_22 = arith.constant dense<0.000000e+00> : vector<16x512xf32>
    %51 = tpu.matmul %41, %50, %cst_22 {dimension_numbers = #tpu.dot_dimension_numbers<[1], [0], [0], [1], [0, 0, 1, 1], [], []>} : vector<16x48xf32>, vector<48x512xf32>, vector<16x512xf32> -> vector<16x512xf32>
    %52 = vector.extract_strided_slice %5 {offsets = [0, 2], sizes = [16, 1], strides = [1, 1]} : vector<16x15xf32> to vector<16x1xf32>
    %53 = vector.broadcast %52 : vector<16x1xf32> to vector<16x512xf32>
    %54 = arith.addf %51, %53 : vector<16x512xf32>
    %55 = vector.extract_strided_slice %5 {offsets = [0, 3], sizes = [16, 1], strides = [1, 1]} : vector<16x15xf32> to vector<16x1xf32>
    %cst_23 = arith.constant 0.000000e+00 : f32
    %56 = vector.broadcast %cst_23 : f32 to vector<16x512xf32>
    %57 = arith.cmpf oge, %54, %56 : vector<16x512xf32>
    %58 = vector.broadcast %55 : vector<16x1xf32> to vector<16x512xf32>
    %59 = arith.mulf %58, %54 : vector<16x512xf32>
    %60 = arith.select %57, %54, %59 : vector<16x512xi1>, vector<16x512xf32>
    %61 = vector.extract_strided_slice %6 {offsets = [0, 0], sizes = [16, 1], strides = [1, 1]} : vector<16x12xf32> to vector<16x1xf32>
    %62 = vector.broadcast %61 : vector<16x1xf32> to vector<16x512xf32>
    %63 = arith.mulf %62, %24 : vector<16x512xf32>
    %64 = vector.extract_strided_slice %6 {offsets = [0, 1], sizes = [16, 1], strides = [1, 1]} : vector<16x12xf32> to vector<16x1xf32>
    %65 = vector.broadcast %64 : vector<16x1xf32> to vector<16x512xf32>
    %66 = arith.mulf %65, %20 : vector<16x512xf32>
    %67 = arith.addf %63, %66 : vector<16x512xf32>
    %68 = vector.extract_strided_slice %6 {offsets = [0, 2], sizes = [16, 1], strides = [1, 1]} : vector<16x12xf32> to vector<16x1xf32>
    %69 = vector.broadcast %68 : vector<16x1xf32> to vector<16x512xf32>
    %70 = arith.mulf %69, %28 : vector<16x512xf32>
    %71 = arith.addf %67, %70 : vector<16x512xf32>
    %72 = vector.extract_strided_slice %5 {offsets = [0, 4], sizes = [16, 1], strides = [1, 1]} : vector<16x15xf32> to vector<16x1xf32>
    %73 = vector.broadcast %72 : vector<16x1xf32> to vector<16x512xf32>
    %74 = arith.addf %71, %73 : vector<16x512xf32>
    %75 = vector.extract_strided_slice %5 {offsets = [0, 5], sizes = [16, 1], strides = [1, 1]} : vector<16x15xf32> to vector<16x1xf32>
    %cst_24 = arith.constant 0.000000e+00 : f32
    %76 = vector.broadcast %cst_24 : f32 to vector<16x512xf32>
    %77 = arith.cmpf oge, %74, %76 : vector<16x512xf32>
    %78 = vector.broadcast %75 : vector<16x1xf32> to vector<16x512xf32>
    %79 = arith.mulf %78, %74 : vector<16x512xf32>
    %80 = arith.select %77, %74, %79 : vector<16x512xi1>, vector<16x512xf32>
    %81 = vector.extract_strided_slice %6 {offsets = [0, 3], sizes = [16, 1], strides = [1, 1]} : vector<16x12xf32> to vector<16x1xf32>
    %82 = vector.extract_strided_slice %1 {offsets = [2, 0], sizes = [1, 512], strides = [1, 1]} : vector<8x512xf32> to vector<1x512xf32>
    %c1_i32_25 = arith.constant 1 : i32
    %83 = tpu.dynamic_rotate %80 by %c1_i32_25 dim 1 : vector<16x512xf32>, i32 -> vector<16x512xf32>
    %84 = vector.broadcast %82 : vector<1x512xf32> to vector<16x512xf32>
    %85 = arith.mulf %84, %83 : vector<16x512xf32>
    %86 = vector.broadcast %81 : vector<16x1xf32> to vector<16x512xf32>
    %87 = arith.mulf %86, %85 : vector<16x512xf32>
    %88 = vector.extract_strided_slice %6 {offsets = [0, 4], sizes = [16, 1], strides = [1, 1]} : vector<16x12xf32> to vector<16x1xf32>
    %89 = vector.broadcast %88 : vector<16x1xf32> to vector<16x512xf32>
    %90 = arith.mulf %89, %80 : vector<16x512xf32>
    %91 = arith.addf %87, %90 : vector<16x512xf32>
    %92 = vector.extract_strided_slice %6 {offsets = [0, 5], sizes = [16, 1], strides = [1, 1]} : vector<16x12xf32> to vector<16x1xf32>
    %93 = vector.extract_strided_slice %1 {offsets = [3, 0], sizes = [1, 512], strides = [1, 1]} : vector<8x512xf32> to vector<1x512xf32>
    %c511_i32_26 = arith.constant 511 : i32
    %94 = tpu.dynamic_rotate %80 by %c511_i32_26 dim 1 : vector<16x512xf32>, i32 -> vector<16x512xf32>
    %95 = vector.broadcast %93 : vector<1x512xf32> to vector<16x512xf32>
    %96 = arith.mulf %95, %94 : vector<16x512xf32>
    %97 = vector.broadcast %92 : vector<16x1xf32> to vector<16x512xf32>
    %98 = arith.mulf %97, %96 : vector<16x512xf32>
    %99 = arith.addf %91, %98 : vector<16x512xf32>
    %100 = vector.extract_strided_slice %5 {offsets = [0, 6], sizes = [16, 1], strides = [1, 1]} : vector<16x15xf32> to vector<16x1xf32>
    %101 = vector.broadcast %100 : vector<16x1xf32> to vector<16x512xf32>
    %102 = arith.addf %99, %101 : vector<16x512xf32>
    %103 = vector.extract_strided_slice %5 {offsets = [0, 7], sizes = [16, 1], strides = [1, 1]} : vector<16x15xf32> to vector<16x1xf32>
    %cst_27 = arith.constant 0.000000e+00 : f32
    %104 = vector.broadcast %cst_27 : f32 to vector<16x512xf32>
    %105 = arith.cmpf oge, %102, %104 : vector<16x512xf32>
    %106 = vector.broadcast %103 : vector<16x1xf32> to vector<16x512xf32>
    %107 = arith.mulf %106, %102 : vector<16x512xf32>
    %108 = arith.select %105, %102, %107 : vector<16x512xi1>, vector<16x512xf32>
    %c0_28 = arith.constant 0 : index
    %c0_29 = arith.constant 0 : index
    %109 = vector.load %arg12[%c0_28, %c0_29] : memref<2x16xf32, #tpu.memory_space<vmem>>, vector<2x16xf32>
    %c0_30 = arith.constant 0 : index
    %c0_31 = arith.constant 0 : index
    %110 = vector.load %arg13[%c0_30, %c0_31] : memref<16x2xf32, #tpu.memory_space<vmem>>, vector<16x2xf32>
    %cst_32 = arith.constant dense<0.000000e+00> : vector<16x2xf32>
    %111 = tpu.matmul %108, %2, %cst_32 {dimension_numbers = #tpu.dot_dimension_numbers<[1], [0], [0], [1], [0, 0, 1, 1], [], []>} : vector<16x512xf32>, vector<512x2xf32>, vector<16x2xf32> -> vector<16x2xf32>
    %cst_33 = arith.constant dense<0.000000e+00> : vector<2x2xf32>
    %112 = tpu.matmul %109, %111, %cst_33 {dimension_numbers = #tpu.dot_dimension_numbers<[1], [0], [0], [1], [0, 0, 1, 1], [], []>} : vector<2x16xf32>, vector<16x2xf32>, vector<2x2xf32> -> vector<2x2xf32>
    %cst_34 = arith.constant 0.000000e+00 : f32
    %113 = vector.broadcast %cst_34 : f32 to vector<2x2xf32>
    %114 = arith.maximumf %112, %113 : vector<2x2xf32>
    %cst_35 = arith.constant dense<0.000000e+00> : vector<16x2xf32>
    %115 = tpu.matmul %110, %114, %cst_35 {dimension_numbers = #tpu.dot_dimension_numbers<[1], [0], [0], [1], [0, 0, 1, 1], [], []>} : vector<16x2xf32>, vector<2x2xf32>, vector<16x2xf32> -> vector<16x2xf32>
    %cst_36 = arith.constant 0.000000e+00 : f32
    %116 = vector.broadcast %cst_36 : f32 to vector<16x2xf32>
    %117 = arith.subf %116, %115 : vector<16x2xf32>
    %118 = math.exp %117 : vector<16x2xf32>
    %cst_37 = arith.constant 1.000000e+00 : f32
    %119 = vector.broadcast %cst_37 : f32 to vector<16x2xf32>
    %120 = arith.addf %119, %118 : vector<16x2xf32>
    %cst_38 = arith.constant 1.000000e+00 : f32
    %121 = vector.broadcast %cst_38 : f32 to vector<16x2xf32>
    %122 = arith.divf %121, %120 : vector<16x2xf32>
    %cst_39 = arith.constant dense<0.000000e+00> : vector<16x512xf32>
    %123 = tpu.matmul %122, %3, %cst_39 {dimension_numbers = #tpu.dot_dimension_numbers<[1], [0], [0], [1], [0, 0, 1, 1], [], []>} : vector<16x2xf32>, vector<2x512xf32>, vector<16x512xf32> -> vector<16x512xf32>
    %124 = arith.mulf %108, %123 : vector<16x512xf32>
    %125 = vector.extract_strided_slice %6 {offsets = [0, 6], sizes = [16, 1], strides = [1, 1]} : vector<16x12xf32> to vector<16x1xf32>
    %126 = vector.extract_strided_slice %1 {offsets = [4, 0], sizes = [1, 512], strides = [1, 1]} : vector<8x512xf32> to vector<1x512xf32>
    %c16_i32_40 = arith.constant 16 : i32
    %127 = tpu.dynamic_rotate %20 by %c16_i32_40 dim 1 : vector<16x512xf32>, i32 -> vector<16x512xf32>
    %128 = vector.broadcast %126 : vector<1x512xf32> to vector<16x512xf32>
    %129 = arith.mulf %128, %127 : vector<16x512xf32>
    %130 = vector.broadcast %125 : vector<16x1xf32> to vector<16x512xf32>
    %131 = arith.mulf %130, %129 : vector<16x512xf32>
    %132 = vector.extract_strided_slice %6 {offsets = [0, 7], sizes = [16, 1], strides = [1, 1]} : vector<16x12xf32> to vector<16x1xf32>
    %133 = vector.broadcast %132 : vector<16x1xf32> to vector<16x512xf32>
    %134 = arith.mulf %133, %20 : vector<16x512xf32>
    %135 = arith.addf %131, %134 : vector<16x512xf32>
    %136 = vector.extract_strided_slice %6 {offsets = [0, 8], sizes = [16, 1], strides = [1, 1]} : vector<16x12xf32> to vector<16x1xf32>
    %137 = vector.extract_strided_slice %1 {offsets = [5, 0], sizes = [1, 512], strides = [1, 1]} : vector<8x512xf32> to vector<1x512xf32>
    %c496_i32_41 = arith.constant 496 : i32
    %138 = tpu.dynamic_rotate %20 by %c496_i32_41 dim 1 : vector<16x512xf32>, i32 -> vector<16x512xf32>
    %139 = vector.broadcast %137 : vector<1x512xf32> to vector<16x512xf32>
    %140 = arith.mulf %139, %138 : vector<16x512xf32>
    %141 = vector.broadcast %136 : vector<16x1xf32> to vector<16x512xf32>
    %142 = arith.mulf %141, %140 : vector<16x512xf32>
    %143 = arith.addf %135, %142 : vector<16x512xf32>
    %144 = vector.extract_strided_slice %5 {offsets = [0, 8], sizes = [16, 1], strides = [1, 1]} : vector<16x15xf32> to vector<16x1xf32>
    %145 = vector.broadcast %144 : vector<16x1xf32> to vector<16x512xf32>
    %146 = arith.addf %143, %145 : vector<16x512xf32>
    %147 = vector.extract_strided_slice %5 {offsets = [0, 9], sizes = [16, 1], strides = [1, 1]} : vector<16x15xf32> to vector<16x1xf32>
    %cst_42 = arith.constant 0.000000e+00 : f32
    %148 = vector.broadcast %cst_42 : f32 to vector<16x512xf32>
    %149 = arith.cmpf oge, %146, %148 : vector<16x512xf32>
    %150 = vector.broadcast %147 : vector<16x1xf32> to vector<16x512xf32>
    %151 = arith.mulf %150, %146 : vector<16x512xf32>
    %152 = arith.select %149, %146, %151 : vector<16x512xi1>, vector<16x512xf32>
    %153 = vector.extract_strided_slice %6 {offsets = [0, 9], sizes = [16, 1], strides = [1, 1]} : vector<16x12xf32> to vector<16x1xf32>
    %154 = vector.extract_strided_slice %1 {offsets = [6, 0], sizes = [1, 512], strides = [1, 1]} : vector<8x512xf32> to vector<1x512xf32>
    %c1_i32_43 = arith.constant 1 : i32
    %155 = tpu.dynamic_rotate %152 by %c1_i32_43 dim 1 : vector<16x512xf32>, i32 -> vector<16x512xf32>
    %156 = vector.broadcast %154 : vector<1x512xf32> to vector<16x512xf32>
    %157 = arith.mulf %156, %155 : vector<16x512xf32>
    %158 = vector.broadcast %153 : vector<16x1xf32> to vector<16x512xf32>
    %159 = arith.mulf %158, %157 : vector<16x512xf32>
    %160 = vector.extract_strided_slice %6 {offsets = [0, 10], sizes = [16, 1], strides = [1, 1]} : vector<16x12xf32> to vector<16x1xf32>
    %161 = vector.broadcast %160 : vector<16x1xf32> to vector<16x512xf32>
    %162 = arith.mulf %161, %152 : vector<16x512xf32>
    %163 = arith.addf %159, %162 : vector<16x512xf32>
    %164 = vector.extract_strided_slice %6 {offsets = [0, 11], sizes = [16, 1], strides = [1, 1]} : vector<16x12xf32> to vector<16x1xf32>
    %165 = vector.extract_strided_slice %1 {offsets = [7, 0], sizes = [1, 512], strides = [1, 1]} : vector<8x512xf32> to vector<1x512xf32>
    %c511_i32_44 = arith.constant 511 : i32
    %166 = tpu.dynamic_rotate %152 by %c511_i32_44 dim 1 : vector<16x512xf32>, i32 -> vector<16x512xf32>
    %167 = vector.broadcast %165 : vector<1x512xf32> to vector<16x512xf32>
    %168 = arith.mulf %167, %166 : vector<16x512xf32>
    %169 = vector.broadcast %164 : vector<16x1xf32> to vector<16x512xf32>
    %170 = arith.mulf %169, %168 : vector<16x512xf32>
    %171 = arith.addf %163, %170 : vector<16x512xf32>
    %172 = vector.extract_strided_slice %5 {offsets = [0, 10], sizes = [16, 1], strides = [1, 1]} : vector<16x15xf32> to vector<16x1xf32>
    %173 = vector.broadcast %172 : vector<16x1xf32> to vector<16x512xf32>
    %174 = arith.addf %171, %173 : vector<16x512xf32>
    %175 = vector.extract_strided_slice %5 {offsets = [0, 11], sizes = [16, 1], strides = [1, 1]} : vector<16x15xf32> to vector<16x1xf32>
    %cst_45 = arith.constant 0.000000e+00 : f32
    %176 = vector.broadcast %cst_45 : f32 to vector<16x512xf32>
    %177 = arith.cmpf oge, %174, %176 : vector<16x512xf32>
    %178 = vector.broadcast %175 : vector<16x1xf32> to vector<16x512xf32>
    %179 = arith.mulf %178, %174 : vector<16x512xf32>
    %180 = arith.select %177, %174, %179 : vector<16x512xi1>, vector<16x512xf32>
    %c0_46 = arith.constant 0 : index
    %c0_47 = arith.constant 0 : index
    %181 = vector.load %arg14[%c0_46, %c0_47] : memref<2x16xf32, #tpu.memory_space<vmem>>, vector<2x16xf32>
    %c0_48 = arith.constant 0 : index
    %c0_49 = arith.constant 0 : index
    %182 = vector.load %arg15[%c0_48, %c0_49] : memref<16x2xf32, #tpu.memory_space<vmem>>, vector<16x2xf32>
    %cst_50 = arith.constant dense<0.000000e+00> : vector<16x2xf32>
    %183 = tpu.matmul %180, %2, %cst_50 {dimension_numbers = #tpu.dot_dimension_numbers<[1], [0], [0], [1], [0, 0, 1, 1], [], []>} : vector<16x512xf32>, vector<512x2xf32>, vector<16x2xf32> -> vector<16x2xf32>
    %cst_51 = arith.constant dense<0.000000e+00> : vector<2x2xf32>
    %184 = tpu.matmul %181, %183, %cst_51 {dimension_numbers = #tpu.dot_dimension_numbers<[1], [0], [0], [1], [0, 0, 1, 1], [], []>} : vector<2x16xf32>, vector<16x2xf32>, vector<2x2xf32> -> vector<2x2xf32>
    %cst_52 = arith.constant 0.000000e+00 : f32
    %185 = vector.broadcast %cst_52 : f32 to vector<2x2xf32>
    %186 = arith.maximumf %184, %185 : vector<2x2xf32>
    %cst_53 = arith.constant dense<0.000000e+00> : vector<16x2xf32>
    %187 = tpu.matmul %182, %186, %cst_53 {dimension_numbers = #tpu.dot_dimension_numbers<[1], [0], [0], [1], [0, 0, 1, 1], [], []>} : vector<16x2xf32>, vector<2x2xf32>, vector<16x2xf32> -> vector<16x2xf32>
    %cst_54 = arith.constant 0.000000e+00 : f32
    %188 = vector.broadcast %cst_54 : f32 to vector<16x2xf32>
    %189 = arith.subf %188, %187 : vector<16x2xf32>
    %190 = math.exp %189 : vector<16x2xf32>
    %cst_55 = arith.constant 1.000000e+00 : f32
    %191 = vector.broadcast %cst_55 : f32 to vector<16x2xf32>
    %192 = arith.addf %191, %190 : vector<16x2xf32>
    %cst_56 = arith.constant 1.000000e+00 : f32
    %193 = vector.broadcast %cst_56 : f32 to vector<16x2xf32>
    %194 = arith.divf %193, %192 : vector<16x2xf32>
    %cst_57 = arith.constant dense<0.000000e+00> : vector<16x512xf32>
    %195 = tpu.matmul %194, %3, %cst_57 {dimension_numbers = #tpu.dot_dimension_numbers<[1], [0], [0], [1], [0, 0, 1, 1], [], []>} : vector<16x2xf32>, vector<2x512xf32>, vector<16x512xf32> -> vector<16x512xf32>
    %196 = arith.mulf %180, %195 : vector<16x512xf32>
    %197 = arith.addf %124, %196 : vector<16x512xf32>
    %198 = arith.addf %197, %60 : vector<16x512xf32>
    %199 = vector.extract_strided_slice %5 {offsets = [0, 12], sizes = [16, 1], strides = [1, 1]} : vector<16x15xf32> to vector<16x1xf32>
    %200 = vector.broadcast %199 : vector<16x1xf32> to vector<16x512xf32>
    %201 = arith.mulf %198, %200 : vector<16x512xf32>
    %202 = vector.extract_strided_slice %5 {offsets = [0, 13], sizes = [16, 1], strides = [1, 1]} : vector<16x15xf32> to vector<16x1xf32>
    %203 = vector.broadcast %202 : vector<16x1xf32> to vector<16x512xf32>
    %204 = arith.addf %201, %203 : vector<16x512xf32>
    %205 = vector.extract_strided_slice %5 {offsets = [0, 14], sizes = [16, 1], strides = [1, 1]} : vector<16x15xf32> to vector<16x1xf32>
    %cst_58 = arith.constant 0.000000e+00 : f32
    %206 = vector.broadcast %cst_58 : f32 to vector<16x512xf32>
    %207 = arith.cmpf oge, %204, %206 : vector<16x512xf32>
    %208 = vector.broadcast %205 : vector<16x1xf32> to vector<16x512xf32>
    %209 = arith.mulf %208, %204 : vector<16x512xf32>
    %210 = arith.select %207, %204, %209 : vector<16x512xi1>, vector<16x512xf32>
    %c0_59 = arith.constant 0 : index
    %c0_60 = arith.constant 0 : index
    %211 = vector.load %arg11[%c0_59, %c0_60] : memref<32x16xf32, #tpu.memory_space<vmem>>, vector<32x16xf32>
    %cst_61 = arith.constant dense<0.000000e+00> : vector<32x512xf32>
    %212 = tpu.matmul %211, %210, %cst_61 {dimension_numbers = #tpu.dot_dimension_numbers<[1], [0], [0], [1], [0, 0, 1, 1], [], []>} : vector<32x16xf32>, vector<16x512xf32>, vector<32x512xf32> -> vector<32x512xf32>
    %c0_62 = arith.constant 0 : index
    %c0_63 = arith.constant 0 : index
    %213 = vector.load %arg16[%c0_62, %c0_63] : memref<2x32xf32, #tpu.memory_space<vmem>>, vector<2x32xf32>
    %c0_64 = arith.constant 0 : index
    %c0_65 = arith.constant 0 : index
    %214 = vector.load %arg17[%c0_64, %c0_65] : memref<32x2xf32, #tpu.memory_space<vmem>>, vector<32x2xf32>
    %cst_66 = arith.constant dense<0.000000e+00> : vector<32x2xf32>
    %215 = tpu.matmul %212, %2, %cst_66 {dimension_numbers = #tpu.dot_dimension_numbers<[1], [0], [0], [1], [0, 0, 1, 1], [], []>} : vector<32x512xf32>, vector<512x2xf32>, vector<32x2xf32> -> vector<32x2xf32>
    %cst_67 = arith.constant dense<0.000000e+00> : vector<2x2xf32>
    %216 = tpu.matmul %213, %215, %cst_67 {dimension_numbers = #tpu.dot_dimension_numbers<[1], [0], [0], [1], [0, 0, 1, 1], [], []>} : vector<2x32xf32>, vector<32x2xf32>, vector<2x2xf32> -> vector<2x2xf32>
    %cst_68 = arith.constant 0.000000e+00 : f32
    %217 = vector.broadcast %cst_68 : f32 to vector<2x2xf32>
    %218 = arith.maximumf %216, %217 : vector<2x2xf32>
    %cst_69 = arith.constant dense<0.000000e+00> : vector<32x2xf32>
    %219 = tpu.matmul %214, %218, %cst_69 {dimension_numbers = #tpu.dot_dimension_numbers<[1], [0], [0], [1], [0, 0, 1, 1], [], []>} : vector<32x2xf32>, vector<2x2xf32>, vector<32x2xf32> -> vector<32x2xf32>
    %cst_70 = arith.constant 0.000000e+00 : f32
    %220 = vector.broadcast %cst_70 : f32 to vector<32x2xf32>
    %221 = arith.subf %220, %219 : vector<32x2xf32>
    %222 = math.exp %221 : vector<32x2xf32>
    %cst_71 = arith.constant 1.000000e+00 : f32
    %223 = vector.broadcast %cst_71 : f32 to vector<32x2xf32>
    %224 = arith.addf %223, %222 : vector<32x2xf32>
    %cst_72 = arith.constant 1.000000e+00 : f32
    %225 = vector.broadcast %cst_72 : f32 to vector<32x2xf32>
    %226 = arith.divf %225, %224 : vector<32x2xf32>
    %cst_73 = arith.constant dense<0.000000e+00> : vector<32x512xf32>
    %227 = tpu.matmul %226, %3, %cst_73 {dimension_numbers = #tpu.dot_dimension_numbers<[1], [0], [0], [1], [0, 0, 1, 1], [], []>} : vector<32x2xf32>, vector<2x512xf32>, vector<32x512xf32> -> vector<32x512xf32>
    %228 = arith.mulf %212, %227 : vector<32x512xf32>
    %229 = arith.addf %228, %0 : vector<32x512xf32>
    %c0_74 = arith.constant 0 : index
    %c0_75 = arith.constant 0 : index
    %230 = vector.load %arg18[%c0_74, %c0_75] : memref<32x512xf32, #tpu.memory_space<vmem>>, vector<32x512xf32>
    tpu.vector_store %arg18[%c0_74, %c0_75], %229 {strides = array<i32>} : memref<32x512xf32, #tpu.memory_space<vmem>>, vector<32x512xf32>,
    return
  }
  func.func @transform_0(%arg0: i32) -> (i32, i32) {
    %c0_i32 = arith.constant 0 : i32
    %c0_i32_0 = arith.constant 0 : i32
    return %c0_i32, %arg0 : i32, i32
  }
  func.func @transform_1(%arg0: i32) -> (i32, i32) {
    %c0_i32 = arith.constant 0 : i32
    %c0_i32_0 = arith.constant 0 : i32
    %c0_i32_1 = arith.constant 0 : i32
    return %c0_i32, %c0_i32_0 : i32, i32
  }
  func.func @transform_2(%arg0: i32) -> (i32, i32) {
    %c0_i32 = arith.constant 0 : i32
    %c0_i32_0 = arith.constant 0 : i32
    %c0_i32_1 = arith.constant 0 : i32
    return %c0_i32, %c0_i32_0 : i32, i32
  }
  func.func @transform_3(%arg0: i32) -> (i32, i32) {
    %c0_i32 = arith.constant 0 : i32
    %c0_i32_0 = arith.constant 0 : i32
    %c0_i32_1 = arith.constant 0 : i32
    return %c0_i32, %c0_i32_0 : i32, i32
  }
  func.func @transform_4(%arg0: i32) -> (i32, i32) {
    %c0_i32 = arith.constant 0 : i32
    %c0_i32_0 = arith.constant 0 : i32
    %c0_i32_1 = arith.constant 0 : i32
    return %c0_i32, %c0_i32_0 : i32, i32
  }
  func.func @transform_5(%arg0: i32) -> (i32, i32) {
    %c0_i32 = arith.constant 0 : i32
    %c0_i32_0 = arith.constant 0 : i32
    %c0_i32_1 = arith.constant 0 : i32
    return %c0_i32, %c0_i32_0 : i32, i32
  }
  func.func @transform_6(%arg0: i32) -> (i32, i32) {
    %c0_i32 = arith.constant 0 : i32
    %c0_i32_0 = arith.constant 0 : i32
    %c0_i32_1 = arith.constant 0 : i32
    return %c0_i32, %c0_i32_0 : i32, i32
  }
  func.func @transform_7(%arg0: i32) -> (i32, i32) {
    %c0_i32 = arith.constant 0 : i32
    %c0_i32_0 = arith.constant 0 : i32
    %c0_i32_1 = arith.constant 0 : i32
    return %c0_i32, %c0_i32_0 : i32, i32
  }
  func.func @transform_8(%arg0: i32) -> (i32, i32) {
    %c0_i32 = arith.constant 0 : i32
    %c0_i32_0 = arith.constant 0 : i32
    %c0_i32_1 = arith.constant 0 : i32
    return %c0_i32, %c0_i32_0 : i32, i32
  }
  func.func @transform_9(%arg0: i32) -> (i32, i32) {
    %c0_i32 = arith.constant 0 : i32
    %c0_i32_0 = arith.constant 0 : i32
    %c0_i32_1 = arith.constant 0 : i32
    return %c0_i32, %c0_i32_0 : i32, i32
  }
  func.func @transform_10(%arg0: i32) -> (i32, i32) {
    %c0_i32 = arith.constant 0 : i32
    %c0_i32_0 = arith.constant 0 : i32
    %c0_i32_1 = arith.constant 0 : i32
    return %c0_i32, %c0_i32_0 : i32, i32
  }
  func.func @transform_11(%arg0: i32) -> (i32, i32) {
    %c0_i32 = arith.constant 0 : i32
    %c0_i32_0 = arith.constant 0 : i32
    %c0_i32_1 = arith.constant 0 : i32
    return %c0_i32, %c0_i32_0 : i32, i32
  }
  func.func @transform_12(%arg0: i32) -> (i32, i32) {
    %c0_i32 = arith.constant 0 : i32
    %c0_i32_0 = arith.constant 0 : i32
    %c0_i32_1 = arith.constant 0 : i32
    return %c0_i32, %c0_i32_0 : i32, i32
  }
  func.func @transform_13(%arg0: i32) -> (i32, i32) {
    %c0_i32 = arith.constant 0 : i32
    %c0_i32_0 = arith.constant 0 : i32
    %c0_i32_1 = arith.constant 0 : i32
    return %c0_i32, %c0_i32_0 : i32, i32
  }
  func.func @transform_14(%arg0: i32) -> (i32, i32) {
    %c0_i32 = arith.constant 0 : i32
    %c0_i32_0 = arith.constant 0 : i32
    %c0_i32_1 = arith.constant 0 : i32
    return %c0_i32, %c0_i32_0 : i32, i32
  }
  func.func @transform_15(%arg0: i32) -> (i32, i32) {
    %c0_i32 = arith.constant 0 : i32
    %c0_i32_0 = arith.constant 0 : i32
    %c0_i32_1 = arith.constant 0 : i32
    return %c0_i32, %c0_i32_0 : i32, i32
  }
  func.func @transform_16(%arg0: i32) -> (i32, i32) {
    %c0_i32 = arith.constant 0 : i32
    %c0_i32_0 = arith.constant 0 : i32
    %c0_i32_1 = arith.constant 0 : i32
    return %c0_i32, %c0_i32_0 : i32, i32
  }
  func.func @transform_17(%arg0: i32) -> (i32, i32) {
    %c0_i32 = arith.constant 0 : i32
    %c0_i32_0 = arith.constant 0 : i32
    return %c0_i32, %arg0 : i32, i32
  }
}

</mosaic_0001>

<bundles_post_ra>
// kernel: dase_forward.1
= control target key start
LH: loop header
LB: loop body
LE: loop exit
PB: predicated region body
PF: predicated region fallthrough
CT: control target
= control target key end

     0   :  { %s7136_s0 = inlined_call_operand.vmem [shape: f32[32,1024], index: 0, kind: input, shape index: {}]   ;;  %s7137_s1 = inlined_call_operand.vmem [shape: f32[8,512], index: 1, kind: input, shape index: {}]   ;;  %s7138_s2 = inlined_call_operand.vmem [shape: f32[512,2], index: 2, kind: input, shape index: {}]   ;;  %s7139_s3 = inlined_call_operand.vmem [shape: f32[2,512], index: 3, kind: input, shape index: {}]   ;;  %s7140_s4 = inlined_call_operand.vmem [shape: f32[32,3], index: 4, kind: input, shape index: {}]   ;;  %s7141_s5 = inlined_call_operand.vmem [shape: f32[16,15], index: 5, kind: input, shape index: {}]   ;;  %s7142_s6 = inlined_call_operand.vmem [shape: f32[16,32], index: 6, kind: input, shape index: {}]   ;;  %s7143_s7 = inlined_call_operand.vmem [shape: f32[16,48], index: 7, kind: input, shape index: {}]   ;;  %s7144_s8 = inlined_call_operand.vmem [shape: f32[16,48], index: 8, kind: input, shape index: {}]   ;;  %s7145_s9 = inlined_call_operand.vmem [shape: f32[16,12], index: 9, kind: input, shape index: {}]   ;;  %s7146_s10 = inlined_call_operand.vmem [shape: f32[32,16], index: 10, kind: input, shape index: {}]   ;;  %s7147_s11 = inlined_call_operand.vmem [shape: f32[2,16], index: 11, kind: input, shape index: {}]   ;;  %s7148_s12 = inlined_call_operand.vmem [shape: f32[16,2], index: 12, kind: input, shape index: {}]   ;;  %s7149_s13 = inlined_call_operand.vmem [shape: f32[2,16], index: 13, kind: input, shape index: {}]   ;;  %s7150_s14 = inlined_call_operand.vmem [shape: f32[16,2], index: 14, kind: input, shape index: {}]   ;;  %s7151_s15 = inlined_call_operand.vmem [shape: f32[2,32], index: 15, kind: input, shape index: {}]   ;;  %s7152_s16 = inlined_call_operand.vmem [shape: f32[32,2], index: 16, kind: input, shape index: {}]   ;;  %s7153_s17 = inlined_call_operand.vmem [shape: f32[32,1024], index: 17, kind: output, shape index: {}]  }
   0x1   :  { %7255 = sst [smem:[#allocation54_spill]] %s7136_s0 }
   0x2   :  { %7256 = sst [smem:[#allocation55_spill]] %s7137_s1 }
   0x3   :  { %7257 = sst [smem:[#allocation56_spill]] %s7140_s4 }
   0x4   :  { %7258 = sst [smem:[#allocation57_spill]] %s7142_s6 }
   0x5   :  { %7259 = sst [smem:[#allocation58_spill]] %s7143_s7 }
   0x6   :  { %s5206_s24 = smov 0   ;;  %s5208_s25 = smov 0  }
   0x7   :  { %s5210_s26 = smov 0  }
   0x8 LB: > { %s7183_s27 = sadd.s32 4294967295, %s5091_s26   ;;  %s5223_s28 = sadd.s32 1, %s5091_s26   ;;  %s5091_s26 = sphi %s5210_s26, %s7436_s26   ;;  %s5087_s25 = sphi %s5208_s25, %s7435_s25   ;;  %s5083_s24 = sphi %s5206_s24, %s7434_s24  }
   0x9   : > { %s31_s29 = ssub.s32 %s5091_s26, %s5223_s28  ;;  %s34_s0 = sadd.s32 1, %s5087_s25 }
   0xa   : > { %p32_p0 = scmp.eq.s32.totalorder %s31_s29, 0  ;;  %p41_p1 = scmp.ne.s32.totalorder %s5087_s25, %s5083_s24 }
   0xb   : > { %p42_p2 = scmp.eq.s32.totalorder %s5091_s26, 0  ;;  %p407_p3 = scmp.eq.s32.totalorder %s7183_s27, 1 }
   0xc   : > { %s5234_s30 = scalar_select %p32_p0, %s5087_s25, %s34_s0  }
   0xd   : > { %p43_p4 = por %p42_p2, %p41_p1  ;;  %p5236_p5 = por %p407_p3, %p41_p1 }
   0xe   : > { %p4258_p6 = scmp.ge.s32.totalorder %s5091_s26, 2 }
  0x10   : > { %477 = sbr.rel (%p4258_p6) target bundleno = 41 (0x29), region = 80 }
  0x17   : > { %480 = sbr.rel (!%p43_p4) target bundleno = 41 (0x29), region = 84  ;;  %s482_s19 = sand.u32 (%p43_p4), 1, %s5087_s25  }
  0x18   : > { %s4332_s1 = sshll.u32 (%p43_p4), %s5091_s26, 5  ;;  %s4259_s20 = sshll.u32 (%p43_p4), %s482_s19, 7 }
  0x19   : > { %s7261_s23 = sld [smem:[#allocation54_spill]] (%p43_p4)  ;;  %s484_s0 = scalar_lea.vmem (%p43_p4), [#allocation2], %s4259_s20 }
  0x1f   : > { %s5246_s29 = scalar_lea.vmem %s7261_s23, %s4332_s1 }
  0x20   : > { %v500_v0 = vld [vmem:[%s5246_s29] sm:$0xff]  ;;  %v502_v1 = vld [vmem:[%s5246_s29 + $0x8] sm:$0xff]  ;;  %v504_v2 = vld [vmem:[%s5246_s29 + $0x10] sm:$0xff] }
  0x21   : > { %501 = vst [vmem:[%s484_s0] sm:$0xff] %v500_v0  ;;  %503 = vst [vmem:[%s484_s0 + $0x8] sm:$0xff] %v502_v1  ;;  %v506_v3 = vld [vmem:[%s5246_s29 + $0x18] sm:$0xff]  ;;  %v508_v4 = vld [vmem:[%s5246_s29 + $0x40] sm:$0xff] }
  0x22   : > { %505 = vst [vmem:[%s484_s0 + $0x10] sm:$0xff] %v504_v2  ;;  %v510_v5 = vld [vmem:[%s5246_s29 + $0x48] sm:$0xff]  ;;  %507 = vst [vmem:[%s484_s0 + $0x18] sm:$0xff] %v506_v3  ;;  %v512_v6 = vld [vmem:[%s5246_s29 + $0x50] sm:$0xff] }
  0x23   : > { %509 = vst [vmem:[%s484_s0 + $0x20] sm:$0xff] %v508_v4  ;;  %511 = vst [vmem:[%s484_s0 + $0x28] sm:$0xff] %v510_v5  ;;  %v514_v7 = vld [vmem:[%s5246_s29 + $0x58] sm:$0xff]  ;;  %v516_v8 = vld [vmem:[%s5246_s29 + $0x80] sm:$0xff] }
  0x24   : > { %513 = vst [vmem:[%s484_s0 + $0x30] sm:$0xff] %v512_v6  ;;  %515 = vst [vmem:[%s484_s0 + $0x38] sm:$0xff] %v514_v7  ;;  %v518_v9 = vld [vmem:[%s5246_s29 + $0x88] sm:$0xff]  ;;  %v520_v10 = vld [vmem:[%s5246_s29 + $0x90] sm:$0xff] }
  0x25   : > { %517 = vst [vmem:[%s484_s0 + $0x40] sm:$0xff] %v516_v8  ;;  %v522_v11 = vld [vmem:[%s5246_s29 + $0x98] sm:$0xff]  ;;  %519 = vst [vmem:[%s484_s0 + $0x48] sm:$0xff] %v518_v9  ;;  %v524_v12 = vld [vmem:[%s5246_s29 + $0xc0] sm:$0xff] }
  0x26   : > { %521 = vst [vmem:[%s484_s0 + $0x50] sm:$0xff] %v520_v10  ;;  %523 = vst [vmem:[%s484_s0 + $0x58] sm:$0xff] %v522_v11  ;;  %v526_v13 = vld [vmem:[%s5246_s29 + $0xc8] sm:$0xff]  ;;  %v528_v14 = vld [vmem:[%s5246_s29 + $0xd0] sm:$0xff] }
  0x27   : > { %525 = vst [vmem:[%s484_s0 + $0x60] sm:$0xff] %v524_v12  ;;  %527 = vst [vmem:[%s484_s0 + $0x68] sm:$0xff] %v526_v13  ;;  %v530_v15 = vld [vmem:[%s5246_s29 + $0xd8] sm:$0xff] }
  0x28   : > { %529 = vst [vmem:[%s484_s0 + $0x70] sm:$0xff] %v528_v14  ;;  %531 = vst [vmem:[%s484_s0 + $0x78] sm:$0xff] %v530_v15 }
  0x29 PF: > { %p4262_p7 = scmp.ge.s32.totalorder %s5091_s26, 1  ;;  %p536_p8 = scmp.lt.s32.totalorder %s5091_s26, 3 }
  0x2b   : > { %p537_p9 = pnand %p4262_p7, %p536_p8 }
  0x2d   : > { %540 = sbr.rel (%p537_p9) target bundleno = 3786 (0xeca), region = 107 }
  0x34   : > { %s7262_s4 = sld [smem:[#allocation56_spill]]  ;;  %v5093_v17 = vmov 1   ;;  %v5094_v18 = vmov 0   ;;  %v7156_v22 = vmov 2   ;;  %v7162_v23 = vmov 0.0   ;;  %s543_s19 = sand.u32 1, %s5083_s24  }
  0x35   : > { %4963 = vset.pattern.permute.xlu1 %v5093_v17  ;;  %4962 = vset.pattern.permute.xlu0 %v5094_v18  ;;  %s5291_s1 = sshll.u32 %s543_s19, 7  ;;  %s7263_s6 = sld [smem:[#allocation57_spill]] }
  0x36   : > { %893 = vmatprep.mubr.f32.mxu0 %v7162_v23  ;;  %970 = vmatprep.mubr.f32.mxu1 %v7162_v23  ;;  %s5294_s20 = scalar_lea.vmem [#allocation2], %s5291_s1  ;;  %s5097_s29 = smov 16  }
  0x37   : > { %v595_v26 = vld [vmem:[%s5294_s20] sm:$0xff]  ;;  %v597_v27 = vld [vmem:[%s5294_s20 + $0x10] sm:$0xff]  ;;  %v596_v28 = vld [vmem:[%s5294_s20 + $0x8] sm:$0xff]  ;;  %s5098_s0 = smov 112   ;;  %s7272_s22 = sld [smem:[#allocation55_spill]] }
  0x38   : > { %v598_v29 = vld [vmem:[%s5294_s20 + $0x18] sm:$0xff]  ;;  %v599_v30 = vld [vmem:[%s5294_s20 + $0x20] sm:$0xff]  ;;  %v601_v31 = vld [vmem:[%s5294_s20 + $0x30] sm:$0xff]  ;;  %s7287_s7 = sld [smem:[#allocation58_spill]]  ;;  %s7186_s24 = smov 1  }
  0x39   : > { %v600_v32 = vld [vmem:[%s5294_s20 + $0x28] sm:$0xff]  ;;  %v602_v33 = vld [vmem:[%s5294_s20 + $0x38] sm:$0xff]  ;;  %v603_v4 = vld [vmem:[%s5294_s20 + $0x40] sm:$0xff]  ;;  %s7184_s21 = smov 127   ;;  %s7348_s19 = smov 127  }
  0x3a   : > { %v680_v16 = vld [vmem:[%s7262_s4] sm:$0xff]  ;;  %v681_v19 = vld [vmem:[%s7262_s4 + $0x8] sm:$0xff]  ;;  %v682_v20 = vld [vmem:[%s7262_s4 + $0x10] sm:$0xff]  ;;  %s7061_s23 = scalar_lea.vmem [#allocation3], %s5291_s1  ;;  %s7433_s1 = sadd.s32 (%p5236_p5), 4294967295, %s5091_s26  }
  0x3b   : > { %725 = vperm.xlu1 %4963, %v680_v16   ;;  %690 = vperm.xlu0 %4962, %v680_v16   ;;  %v683_v21 = vld [vmem:[%s7262_s4 + $0x18] sm:$0xff]  ;;  %v607_v5 = vld [vmem:[%s5294_s20 + $0x60] sm:$0xff]  ;;  %v608_v10 = vld [vmem:[%s5294_s20 + $0x68] sm:$0xff] }
  0x3c   : > { %v609_v11 = vld [vmem:[%s5294_s20 + $0x70] sm:$0xff]  ;;  %v610_v12 = vld [vmem:[%s5294_s20 + $0x78] sm:$0xff] }
  0x3f   : > { %729 = vperm.xlu1 %4963, %v681_v19   ;;  %695 = vperm.xlu0 %4962, %v681_v19  }
  0x43   : > { %4964 = vset.pattern.permute.xlu1 %v5094_v18  ;;  %700 = vperm.xlu0 %4962, %v682_v20  }
  0x44   : > { %705 = vperm.xlu1 %4964, %v683_v21  }
  0x47   : > { %4965 = vset.pattern.permute.xlu0 %v7156_v22 }
  0x48   : > { %4966 = vset.pattern.permute.xlu1 %v7156_v22  ;;  %773 = vperm.xlu0 %4965, %v680_v16  }
  0x49   : > { %777 = vperm.xlu1 %4966, %v681_v19   ;;  %v604_v19 = vld [vmem:[%s5294_s20 + $0x48] sm:$0xff] }
  0x4c   : > { %4968 = vset.pattern.permute.xlu0 %v5093_v17 }
  0x4d   : > { %4967 = vset.pattern.permute.xlu1 %v5093_v17  ;;  %737 = vperm.xlu0 %4968, %v683_v21  }
  0x4e   : > { %733 = vperm.xlu1 %4967, %v682_v20  }
  0x51   : > { %4970 = vset.pattern.permute.xlu0 %v5094_v18 }
  0x52   : > { %4969 = vset.pattern.permute.xlu1 %v7156_v22 }
  0x53   : > { %781 = vperm.xlu1 %4969, %v682_v20   ;;  %v605_v20 = vld [vmem:[%s5294_s20 + $0x50] sm:$0xff] }
  0x57   : > { %785 = vperm.xlu1 %4969, %v683_v21   ;;  %v606_v21 = vld [vmem:[%s5294_s20 + $0x58] sm:$0xff] }
  0x5b   : > { %4971 = vset.pattern.permute.xlu1 %v5094_v18 }
  0xba   : > { %v726_v24 = vpop.permute.xlu1 %725  ;;  %v691_v25 = vpop.permute.xlu0 %690 }
  0xbb   : > { %v708_v34 = vmul.f32 %v691_v25, %v595_v26  ;;  %v710_v35 = vmul.f32 %v691_v25, %v597_v27  ;;  %v709_v38 = vmul.f32 %v691_v25, %v596_v28  ;;  %v711_v39 = vmul.f32 %v691_v25, %v598_v29 }
  0xbd   : > { %v741_v45 = vadd.f32 %v726_v24, %v709_v38  ;;  %v743_v46 = vadd.f32 %v726_v24, %v711_v39  ;;  %v740_v47 = vadd.f32 %v726_v24, %v708_v34  ;;  %v742_v48 = vadd.f32 %v726_v24, %v710_v35 }
  0xbe   : > { %v730_v36 = vpop.permute.xlu1 %729  ;;  %v696_v37 = vpop.permute.xlu0 %695 }
  0xbf   : > { %v712_v40 = vmul.f32 %v696_v37, %v599_v30  ;;  %v714_v41 = vmul.f32 %v696_v37, %v601_v31  ;;  %v713_v42 = vmul.f32 %v696_v37, %v600_v32  ;;  %v715_v43 = vmul.f32 %v696_v37, %v602_v33 }
  0xc0   : > { %vm757_vm0 = vcmp.ge.f32.partialorder %v741_v45, 0.0  ;;  %vm759_vm1 = vcmp.ge.f32.partialorder %v743_v46, 0.0  ;;  %vm756_vm2 = vcmp.ge.f32.partialorder %v740_v47, 0.0  ;;  %vm758_vm3 = vcmp.ge.f32.partialorder %v742_v48, 0.0 }
  0xc1   : > { %v745_v50 = vadd.f32 %v730_v36, %v713_v42  ;;  %v747_v51 = vadd.f32 %v730_v36, %v715_v43  ;;  %v744_v52 = vadd.f32 %v730_v36, %v712_v40  ;;  %v746_v53 = vadd.f32 %v730_v36, %v714_v41 }
  0xc2   : > { %v701_v44 = vpop.permute.xlu0 %700 }
  0xc3   : > { %v706_v49 = vpop.permute.xlu1 %705  ;;  %vm761_vm4 = vcmp.ge.f32.partialorder %v745_v50, 0.0  ;;  %vm763_vm5 = vcmp.ge.f32.partialorder %v747_v51, 0.0  ;;  %vm760_vm6 = vcmp.ge.f32.partialorder %v744_v52, 0.0  ;;  %vm762_vm7 = vcmp.ge.f32.partialorder %v746_v53, 0.0 }
  0xc4   : > { %v720_v25 = vmul.f32 %v706_v49, %v607_v5  ;;  %v721_v27 = vmul.f32 %v706_v49, %v608_v10  ;;  %v722_v28 = vmul.f32 %v706_v49, %v609_v11  ;;  %v723_v29 = vmul.f32 %v706_v49, %v610_v12 }
  0xc5   : > { %v716_v30 = vmul.f32 %v701_v44, %v603_v4  ;;  %v717_v31 = vmul.f32 %v701_v44, %v604_v19  ;;  %v718_v32 = vmul.f32 %v701_v44, %v605_v20  ;;  %v719_v33 = vmul.f32 %v701_v44, %v606_v21  ;;  %v5404_v19 = vld [vmem:[%s7145_s9 + $0x8] sm:$0xff] }
  0xc6   : > { %v7155_v20 = vmov 3   ;;  %v5100_v21 = vmov 5  }
  0xc7   : > { %v774_v54 = vpop.permute.xlu0 %773 }
  0xc8   : > { %v778_v55 = vpop.permute.xlu1 %777  ;;  %v789_v56 = vmul.f32 %v774_v54, %v741_v45  ;;  %v791_v57 = vmul.f32 %v774_v54, %v743_v46  ;;  %v788_v58 = vmul.f32 %v774_v54, %v740_v47  ;;  %v790_v59 = vmul.f32 %v774_v54, %v742_v48 }
  0xc9   : > { %v793_v60 = vmul.f32 %v778_v55, %v745_v50  ;;  %v795_v61 = vmul.f32 %v778_v55, %v747_v51  ;;  %v792_v62 = vmul.f32 %v778_v55, %v744_v52  ;;  %v794_v63 = vmul.f32 %v778_v55, %v746_v53 }
  0xca   : > { %v805_v0 = vsel %vm757_vm0, %v741_v45, %v789_v56  ;;  %v807_v1 = vsel %vm759_vm1, %v743_v46, %v791_v57  ;;  %v804_v2 = vsel %vm756_vm2, %v740_v47, %v788_v58  ;;  %v806_v3 = vsel %vm758_vm3, %v742_v48, %v790_v59 }
  0xcb   : > { %v809_v6 = vsel %vm761_vm4, %v745_v50, %v793_v60  ;;  %v811_v7 = vsel %vm763_vm5, %v747_v51, %v795_v61  ;;  %v808_v8 = vsel %vm760_vm6, %v744_v52, %v792_v62  ;;  %v810_v9 = vsel %vm762_vm7, %v746_v53, %v794_v63 }
  0xcc   : > { %v4639_v13 = vpack.c.bf16 %v809_v6, %v805_v0  ;;  %v4647_v14 = vpack.c.bf16 %v811_v7, %v807_v1  ;;  %v4641_v15 = vpack.c.bf16 %v808_v8, %v804_v2  ;;  %v4649_v16 = vpack.c.bf16 %v810_v9, %v806_v3  ;;  %v738_v26 = vpop.permute.xlu0 %737  ;;  %v820_v0 = vld [vmem:[%s7263_s6] sm:$0xff]  ;;  %v821_v1 = vld [vmem:[%s7263_s6 + $0x8] sm:$0xff] }
  0xcd   : > { %v734_v24 = vpop.permute.xlu1 %733  ;;  %v752_v34 = vadd.f32 %v738_v26, %v720_v25  ;;  %v753_v35 = vadd.f32 %v738_v26, %v721_v27  ;;  %v754_v36 = vadd.f32 %v738_v26, %v722_v28  ;;  %v755_v37 = vadd.f32 %v738_v26, %v723_v29 }
  0xce   : > { %4640 = vmatprep.subr.bf16.mxu0 %v4639_v13  ;;  %4648 = vmatprep.subr.bf16.mxu1 %v4647_v14  ;;  %v748_v38 = vadd.f32 %v734_v24, %v716_v30  ;;  %v749_v39 = vadd.f32 %v734_v24, %v717_v31  ;;  %v750_v40 = vadd.f32 %v734_v24, %v718_v32  ;;  %vm822_vm0 = vcmask 261120   ;;  %v5380_v14 = vld [vmem:[%s7141_s5] sm:$0xff] }
  0xcf   : > { %4642 = vmatpush1.bf16.msra.mxu0 %v4641_v15  ;;  %4650 = vmatpush1.bf16.msra.mxu1 %v4649_v16  ;;  %v751_v41 = vadd.f32 %v734_v24, %v719_v33  ;;  %vm769_vm8 = vcmp.ge.f32.partialorder %v753_v35, 0.0  ;;  %vm771_vm9 = vcmp.ge.f32.partialorder %v755_v37, 0.0  ;;  %vm768_vm10 = vcmp.ge.f32.partialorder %v752_v34, 0.0  ;;  %v5387_v15 = vld [vmem:[%s7141_s5 + $0x8] sm:$0xff]  ;;  %v5395_v16 = vld [vmem:[%s7145_s9] sm:$0xff] }
  0xd0   : > { %vm770_vm11 = vcmp.ge.f32.partialorder %v754_v36, 0.0  ;;  %vm765_vm12 = vcmp.ge.f32.partialorder %v749_v39, 0.0  ;;  %vm764_vm14 = vcmp.ge.f32.partialorder %v748_v38, 0.0  ;;  %vm766_vm15 = vcmp.ge.f32.partialorder %v750_v40, 0.0 }
  0xd1   : > { %vm767_vm13 = vcmp.ge.f32.partialorder %v751_v41, 0.0  ;;  %v5101_v24 = vmov 4   ;;  %v999_v28 = vlaneseq  ;;  %vm1095_vm3 = vcmask 392192  }
  0xd2   : > { %v782_v42 = vpop.permute.xlu1 %781 }
  0xd3   : > { %v796_v43 = vmul.f32 %v782_v42, %v748_v38  ;;  %v797_v45 = vmul.f32 %v782_v42, %v749_v39  ;;  %v798_v46 = vmul.f32 %v782_v42, %v750_v40  ;;  %v799_v47 = vmul.f32 %v782_v42, %v751_v41 }
  0xd4   : > { %v5427_v31 = vshrl.u32 %v999_v28, 7  ;;  %v5429_v32 = vand.u32 127, %v999_v28 }
  0xd5   : > { %v813_v52 = vsel %vm765_vm12, %v749_v39, %v797_v45  ;;  %v815_v53 = vsel %vm767_vm13, %v751_v41, %v799_v47  ;;  %v812_v54 = vsel %vm764_vm14, %v748_v38, %v796_v43  ;;  %v814_v55 = vsel %vm766_vm15, %v750_v40, %v798_v46  ;;  %v5456_v45 = vld [vmem:[%s7272_s22 + $0x10] sm:$0xff]  ;;  %v5461_v46 = vld [vmem:[%s7272_s22 + $0x18] sm:$0xff] }
  0xd6   : > { %v786_v48 = vpop.permute.xlu1 %785  ;;  %vm1001_vm1 = vcmp.lt.s32.totalorder %v5429_v32, 16  ;;  %v1061_v43 = vsub.s32 1, %v5427_v31  ;;  %vm1050_vm2 = vcmp.lt.s32.totalorder %v5429_v32, 112 }
  0xd7   : > { %v800_v44 = vmul.f32 %v786_v48, %v752_v34  ;;  %v801_v49 = vmul.f32 %v786_v48, %v753_v35  ;;  %v802_v50 = vmul.f32 %v786_v48, %v754_v36  ;;  %v803_v51 = vmul.f32 %v786_v48, %v755_v37 }
  0xd8   : > { %v1074_v28 = vrot.slane %v5461_v46, %v1061_v43 }
  0xd9   : > { %v817_v56 = vsel %vm769_vm8, %v753_v35, %v801_v49  ;;  %v819_v57 = vsel %vm771_vm9, %v755_v37, %v803_v51  ;;  %v816_v58 = vsel %vm768_vm10, %v752_v34, %v800_v44  ;;  %v818_v59 = vsel %vm770_vm11, %v754_v36, %v802_v50  ;;  %v5435_v36 = vld [vmem:[%s7272_s22 + $0x8] sm:$0xff]  ;;  %v5441_v37 = vld [vmem:[%s7272_s22] sm:$0xff] }
  0xda   : > { %v4643_v60 = vpack.c.bf16 %v817_v56, %v813_v52  ;;  %v4651_v61 = vpack.c.bf16 %v819_v57, %v815_v53  ;;  %v4645_v62 = vpack.c.bf16 %v816_v58, %v812_v54  ;;  %v4653_v63 = vpack.c.bf16 %v818_v59, %v814_v55 }
  0xdb   : > { %v1012_v35 = vsub.s32 0, %v5427_v31  ;;  %v1066_v57 = vrot.slane %v5435_v36, %v1061_v43  ;;  %vm1306_vm8 = vcmp.lt.s32.totalorder %v5429_v32, 1 }
  0xdc   : > { %4644 = vmatprep.subr.bf16.mxu0 %v4643_v60  ;;  %4652 = vmatprep.subr.bf16.mxu1 %v4651_v61 }
  0xdd   : > { %4646 = vmatpush1.bf16.msra.mxu0 %v4645_v62  ;;  %4654 = vmatpush1.bf16.msra.mxu1 %v4653_v63  ;;  %v1017_v40 = vrot.slane %v5435_v36, %v1012_v35  ;;  %v1013_v47 = vrot.slane %v5441_v37, %v1012_v35  ;;  %v1021_v54 = vrot.slane %v5456_v45, %v1012_v35 }
  0xde   : > { %v1025_v56 = vrot.slane %v5461_v46, %v1012_v35 }
  0xe0   : > { %4265 = vmatmul.mubr.msk.f32.vlgmr.msra.gmra.mrb[0].mxu0 %vm822_vm0, %v820_v0  ;;  %4267 = vmatmul.mubr.msk.f32.vlgmr.msra.gmra.mrb[0].mxu1 %vm822_vm0, %v820_v0 }
  0xe1   : > { %899 = vmatprep.mubr.f32.mxu0 %v7162_v23  ;;  %976 = vmatprep.mubr.f32.mxu1 %v7162_v23 }
  0xe4   : > { %4266 = vmatmul.mubr.msk.f32.gmra.mrb[2].mxu0 %vm822_vm0, %v821_v1  ;;  %4268 = vmatmul.mubr.msk.f32.gmra.mrb[2].mxu1 %vm822_vm0, %v821_v1 }
  0xe5   : > { %1166 = vmatprep.mubr.f32.mxu0 %v7162_v23  ;;  %1243 = vmatprep.mubr.f32.mxu1 %v7162_v23 }
 0x1b3   : > { %v5338_v2 = vpop.f32.mrb[0].mxu0  ;;  %v5340_v3 = vpop.f32.mrb[0].mxu1 }
 0x1b4   : > { %7264 = vst [vmem:[#allocation4_spill] sm:$0xff] %v5338_v2  ;;  %7265 = vst [vmem:[#allocation5_spill] sm:$0xff] %v5340_v3  ;;  %983 = vrot.lane.b32.xlu0 %v5338_v2, %s5097_s29  ;;  %v5343_v4 = vpop.f32.mrb[1].mxu0  ;;  %v5345_v5 = vpop.f32.mrb[1].mxu1 }
 0x1b5   : > { %7266 = vst [vmem:[#allocation6_spill] sm:$0xff] %v5343_v4  ;;  %7267 = vst [vmem:[#allocation7_spill] sm:$0xff] %v5345_v5 }
 0x1b7   : > { %v5347_v6 = vpop.f32.mrb[2].mxu0  ;;  %v5349_v7 = vpop.f32.mrb[2].mxu1 }
 0x1b8   : > { %7268 = vst [vmem:[#allocation8_spill] sm:$0xff] %v5347_v6  ;;  %7269 = vst [vmem:[#allocation9_spill] sm:$0xff] %v5349_v7  ;;  %v5351_v8 = vpop.f32.mrb[3].mxu1  ;;  %991 = vrot.lane.b32.xlu0 %v5340_v3, %s5097_s29  ;;  %985 = vrot.lane.b32.xlu1 %v5347_v6, %s5097_s29  ;;  %v5355_v9 = vpop.f32.mrb[3].mxu0  ;;  %v4661_v10 = vpack.c.bf16 %v5347_v6, %v5338_v2  ;;  %v4673_v13 = vpack.c.bf16 %v5349_v7, %v5340_v3 }
 0x1b9   : > { %7270 = vst [vmem:[#allocation10_spill] sm:$0xff] %v5351_v8  ;;  %7271 = vst [vmem:[#allocation11_spill] sm:$0xff] %v5355_v9  ;;  %v4659_v11 = vpack.c.bf16 %v5355_v9, %v5343_v4  ;;  %v4671_v12 = vpack.c.bf16 %v5351_v8, %v5345_v5 }
 0x1bc   : > { %1034 = vrot.lane.b32.xlu0 %v5338_v2, %s5098_s0  ;;  %993 = vrot.lane.b32.xlu1 %v5349_v7, %s5097_s29 }
 0x1c0   : > { %1042 = vrot.lane.b32.xlu0 %v5340_v3, %s5098_s0  ;;  %1036 = vrot.lane.b32.xlu1 %v5347_v6, %s5098_s0 }
 0x1c4   : > { %987 = vrot.lane.b32.xlu0 %v5343_v4, %s5097_s29  ;;  %1044 = vrot.lane.b32.xlu1 %v5349_v7, %s5098_s0 }
 0x1c8   : > { %995 = vrot.lane.b32.xlu0 %v5345_v5, %s5097_s29  ;;  %989 = vrot.lane.b32.xlu1 %v5355_v9, %s5097_s29 }
 0x1cc   : > { %1038 = vrot.lane.b32.xlu0 %v5343_v4, %s5098_s0  ;;  %997 = vrot.lane.b32.xlu1 %v5351_v8, %s5097_s29  ;;  %s4333_s29 = sshll.u32 (%p5236_p5), %s7433_s1, 5 }
 0x1cd   : > { %s4151_s18 = scalar_lea.vmem (%p5236_p5), %s7153_s17, %s4333_s29 }
 0x1d0   : > { %1046 = vrot.lane.b32.xlu0 %v5345_v5, %s5098_s0  ;;  %1040 = vrot.lane.b32.xlu1 %v5355_v9, %s5098_s0 }
 0x1d4   : > { %1087 = vperm.xlu0 %4970, %v5380_v14   ;;  %1048 = vrot.lane.b32.xlu1 %v5351_v8, %s5098_s0 }
 0x1d8   : > { %4973 = vset.pattern.permute.xlu0 %v5093_v17  ;;  %1092 = vperm.xlu1 %4971, %v5387_v15  }
 0x1d9   : > { %1269 = vperm.xlu0 %4973, %v5387_v15  }
 0x1dc   : > { %4972 = vset.pattern.permute.xlu1 %v5093_v17 }
 0x1dd   : > { %4976 = vset.pattern.permute.xlu0 %v7156_v22  ;;  %1265 = vperm.xlu1 %4972, %v5380_v14  }
 0x1de   : > { %1631 = vperm.xlu0 %4976, %v5395_v16  }
 0x1e1   : > { %4974 = vset.pattern.permute.xlu1 %v5094_v18 }
 0x1e2   : > { %1635 = vperm.xlu0 %4976, %v5404_v19   ;;  %1590 = vperm.xlu1 %4974, %v5395_v16  }
 0x1e6   : > { %4975 = vset.pattern.permute.xlu1 %v5093_v17  ;;  %4981 = vset.pattern.permute.xlu0 %v7155_v20 }
 0x1e7   : > { %1607 = vperm.xlu1 %4975, %v5395_v16   ;;  %1735 = vperm.xlu0 %4981, %v5395_v16  }
 0x1eb   : > { %4977 = vset.pattern.permute.xlu1 %v5094_v18  ;;  %1739 = vperm.xlu0 %4981, %v5404_v19  }
 0x1ec   : > { %1595 = vperm.xlu1 %4977, %v5404_v19  }
 0x1ef   : > { %4984 = vset.pattern.permute.xlu0 %v5100_v21 }
 0x1f0   : > { %4978 = vset.pattern.permute.xlu1 %v5093_v17  ;;  %1679 = vperm.xlu0 %4984, %v5380_v14  }
 0x1f1   : > { %1611 = vperm.xlu1 %4978, %v5404_v19  }
 0x1f5   : > { %4979 = vset.pattern.permute.xlu1 %v5101_v24 }
 0x1f6   : > { %1655 = vperm.xlu1 %4979, %v5380_v14  }
 0x1fa   : > { %1659 = vperm.xlu1 %4979, %v5387_v15  }
 0x1fe   : > { %4980 = vset.pattern.permute.xlu1 %v5100_v21 }
 0x1ff   : > { %1683 = vperm.xlu1 %4980, %v5387_v15  }
 0x203   : > { %4982 = vset.pattern.permute.xlu1 %v5101_v24 }
 0x204   : > { %1751 = vperm.xlu1 %4982, %v5395_v16  }
 0x208   : > { %4983 = vset.pattern.permute.xlu1 %v5100_v21 }
 0x209   : > { %1807 = vperm.xlu1 %4983, %v5395_v16  }
 0x20d   : > { %4985 = vset.pattern.permute.xlu1 %v5101_v24 }
 0x20e   : > { %1755 = vperm.xlu1 %4985, %v5404_v19  }
 0x226   : > { %v984_v17 = vpop.permute.xlu0 %983 }
 0x22a   : > { %v992_v18 = vpop.permute.xlu0 %991  ;;  %v986_v25 = vpop.permute.xlu1 %985 }
 0x22e   : > { %v1035_v26 = vpop.permute.xlu0 %1034  ;;  %v994_v27 = vpop.permute.xlu1 %993 }
 0x232   : > { %v5425_v29 = vpop.permute.xlu0 %1042  ;;  %v1037_v30 = vpop.permute.xlu1 %1036 }
 0x236   : > { %v988_v33 = vpop.permute.xlu0 %987  ;;  %v1045_v34 = vpop.permute.xlu1 %1044 }
 0x237   : > { %v5450_v42 = vsel %vm1001_vm1, %v984_v17, %v988_v33  ;;  %v5486_v55 = vsel %vm1001_vm1, %v988_v33, %v992_v18 }
 0x238   : > { %v5472_v51 = vmul.f32 %v1017_v40, %v5450_v42 }
 0x23a   : > { %v996_v38 = vpop.permute.xlu0 %995  ;;  %v990_v39 = vpop.permute.xlu1 %989 }
 0x23b   : > { %v5446_v41 = vsel %vm1001_vm1, %v986_v25, %v990_v39  ;;  %v5469_v44 = vsel %vm1001_vm1, %v996_v38, %v984_v17  ;;  %v5476_v52 = vsel %vm1001_vm1, %v990_v39, %v994_v27  ;;  %v5492_v58 = vsel %vm1001_vm1, %v992_v18, %v996_v38 }
 0x23c   : > { %7273 = vst [vmem:[#allocation12_spill] sm:$0xff] %v5446_v41  ;;  %v5465_v48 = vmul.f32 %v1017_v40, %v5446_v41  ;;  %7274 = vst [vmem:[#allocation13_spill] sm:$0xff] %v5469_v44  ;;  %v5495_v59 = vmul.f32 %v1013_v47, %v5469_v44  ;;  %v5504_v62 = vmul.f32 %v1021_v54, %v5476_v52 }
 0x23d   : > { %7275 = vst [vmem:[#allocation14_spill] sm:$0xff] %v5476_v52  ;;  %7277 = vst [vmem:[#allocation16_spill] sm:$0xff] %v5492_v58  ;;  %v5522_v18 = vmul.f32 %v1021_v54, %v5486_v55 }
 0x23e   : > { %v1039_v49 = vpop.permute.xlu0 %1038  ;;  %v998_v50 = vpop.permute.xlu1 %997  ;;  %v4655_v61 = vpack.c.bf16 %v5465_v48, %v5472_v51 }
 0x23f   : > { %v5481_v53 = vsel %vm1001_vm1, %v994_v27, %v998_v50  ;;  %v5499_v60 = vsel %vm1001_vm1, %v998_v50, %v986_v25  ;;  %v5509_v63 = vsel %vm1050_vm2, %v1039_v49, %v5425_v29  ;;  %v5525_v25 = vmul.f32 %v1025_v56, %v5492_v58 }
 0x240   : > { %7276 = vst [vmem:[#allocation15_spill] sm:$0xff] %v5481_v53  ;;  %7278 = vst [vmem:[#allocation17_spill] sm:$0xff] %v5499_v60  ;;  %v5512_v0 = vmul.f32 %v1013_v47, %v5499_v60  ;;  %v5515_v1 = vmul.f32 %v1025_v56, %v5481_v53  ;;  %4656 = vmatprep.subr.bf16.mxu0 %v4655_v61  ;;  %v5531_v33 = vmul.f32 %v1066_v57, %v5509_v63 }
 0x241   : > { %7279 = vst [vmem:[#allocation18_spill] sm:$0xff] %v5509_v63  ;;  %v4669_v40 = vpack.c.bf16 %v5504_v62, %v5522_v18  ;;  %v1062_v47 = vrot.slane %v5441_v37, %v1061_v43  ;;  %v1070_v50 = vrot.slane %v5456_v45, %v1061_v43  ;;  %v5550_v61 = vsel %vm1050_vm2, %v1035_v26, %v1039_v49 }
 0x242   : > { %v1047_v21 = vpop.permute.xlu0 %1046  ;;  %v1041_v24 = vpop.permute.xlu1 %1040  ;;  %v4657_v27 = vpack.c.bf16 %v5512_v0, %v5495_v59  ;;  %v4667_v54 = vpack.c.bf16 %v5515_v1, %v5525_v25  ;;  %7283 = vst [vmem:[#allocation22_spill] sm:$0xff] %v5550_v61 }
 0x243   : > { %v5519_v17 = vsel %vm1050_vm2, %v1041_v24, %v1045_v34  ;;  %v5535_v35 = vsel %vm1050_vm2, %v1047_v21, %v1035_v26  ;;  %v5539_v38 = vsel %vm1050_vm2, %v1037_v30, %v1041_v24 }
 0x244   : > { %7280 = vst [vmem:[#allocation19_spill] sm:$0xff] %v5519_v17  ;;  %7281 = vst [vmem:[#allocation20_spill] sm:$0xff] %v5535_v35  ;;  %v1080_v39 = vmul.f32 %v1066_v57, %v5519_v17  ;;  %4658 = vmatpush1.bf16.msra.mxu0 %v4657_v27  ;;  %v5567_v27 = vsel %vm1050_vm2, %v5425_v29, %v1047_v21  ;;  %v5570_v26 = vmul.f32 %v1074_v28, %v5535_v35 }
 0x245   : > { %7282 = vst [vmem:[#allocation21_spill] sm:$0xff] %v5539_v38  ;;  %4660 = vmatprep.subr.bf16.mxu0 %v4659_v11  ;;  %7286 = vst [vmem:[#allocation25_spill] sm:$0xff] %v5567_v27  ;;  %v1079_v11 = vmul.f32 %v1062_v47, %v5539_v38  ;;  %4668 = vmatprep.subr.bf16.mxu1 %v4667_v54  ;;  %v1077_v21 = vmul.f32 %v1070_v50, %v5567_v27 }
 0x246   : > { %v1049_v56 = vpop.permute.xlu1 %1048  ;;  %v4663_v24 = vpack.c.bf16 %v1080_v39, %v5531_v33  ;;  %4670 = vmatpush1.bf16.msra.mxu1 %v4669_v40 }
 0x247   : > { %v5557_v57 = vsel %vm1050_vm2, %v1045_v34, %v1049_v56  ;;  %v5561_v43 = vsel %vm1050_vm2, %v1049_v56, %v1037_v30  ;;  %v1075_v30 = vmul.f32 %v1062_v47, %v5550_v61  ;;  %4672 = vmatprep.subr.bf16.mxu1 %v4671_v12  ;;  %v1083_v12 = vld [vmem:[%s7287_s7] sm:$0xff] }
 0x248   : > { %7284 = vst [vmem:[#allocation23_spill] sm:$0xff] %v5557_v57  ;;  %7285 = vst [vmem:[#allocation24_spill] sm:$0xff] %v5561_v43  ;;  %v1082_v34 = vmul.f32 %v1074_v28, %v5561_v43  ;;  %v1081_v49 = vmul.f32 %v1070_v50, %v5557_v57  ;;  %4662 = vmatpush1.bf16.msra.mxu0 %v4661_v10  ;;  %v1084_v10 = vld [vmem:[%s7287_s7 + $0x8] sm:$0xff] }
 0x249   : > { %4664 = vmatprep.subr.bf16.mxu0 %v4663_v24  ;;  %v4665_v54 = vpack.c.bf16 %v1079_v11, %v1075_v30 }
 0x24a   : > { %v4675_v29 = vpack.c.bf16 %v1082_v34, %v5570_v26  ;;  %v4677_v28 = vpack.c.bf16 %v1081_v49, %v1077_v21  ;;  %4674 = vmatpush1.bf16.msra.mxu1 %v4673_v13 }
 0x24c   : > { %4666 = vmatpush1.bf16.msra.mxu0 %v4665_v54  ;;  %4676 = vmatprep.subr.bf16.mxu1 %v4675_v29 }
 0x24e   : > { %4678 = vmatpush1.bf16.msra.mxu1 %v4677_v28 }
 0x24f   : > { %4269 = vmatmul.mubr.msk.f32.vlgmr.msra.gmra.mrb[4].mxu0 %vm1095_vm3, %v1083_v12 }
 0x250   : > { %1172 = vmatprep.mubr.f32.mxu0 %v7162_v23 }
 0x251   : > { %4271 = vmatmul.mubr.msk.f32.vlgmr.msra.gmra.mrb[4].mxu1 %vm1095_vm3, %v1083_v12 }
 0x252   : > { %1249 = vmatprep.mubr.f32.mxu1 %v7162_v23 }
 0x253   : > { %v5595_v40 = vpop.permute.xlu0 %1087  ;;  %4270 = vmatmul.mubr.msk.f32.gmra.mrb[6].mxu0 %vm1095_vm3, %v1084_v10 }
 0x254   : > { %1466 = vmatprep.mubr.f32.mxu0 %v7162_v23 }
 0x255   : > { %4272 = vmatmul.mubr.msk.f32.gmra.mrb[6].mxu1 %vm1095_vm3, %v1084_v10 }
 0x256   : > { %1543 = vmatprep.mubr.f32.mxu1 %v7162_v23 }
 0x257   : > { %v5601_v13 = vpop.permute.xlu1 %1092 }
 0x258   : > { %v5604_v47 = vpop.permute.xlu0 %1269 }
 0x25c   : > { %v5607_v50 = vpop.permute.xlu1 %1265 }
 0x25d   : > { %v1632_v56 = vpop.permute.xlu0 %1631 }
 0x261   : > { %v1636_v24 = vpop.permute.xlu0 %1635  ;;  %v1591_v29 = vpop.permute.xlu1 %1590 }
 0x262   : > { %v1642_v54 = vmul.f32 %v1636_v24, %v1079_v11  ;;  %v1643_v28 = vmul.f32 %v1636_v24, %v1080_v39  ;;  %v1644_v12 = vmul.f32 %v1636_v24, %v1081_v49  ;;  %v1645_v20 = vmul.f32 %v1636_v24, %v1082_v34 }
 0x263   : > { %v1598_v53 = vmul.f32 %v1591_v29, %v5495_v59  ;;  %v1599_v60 = vmul.f32 %v1591_v29, %v5472_v51  ;;  %v1600_v39 = vmul.f32 %v1591_v29, %v5522_v18  ;;  %v1601_v11 = vmul.f32 %v1591_v29, %v5525_v25 }
 0x264   : > { %v1638_v34 = vmul.f32 %v1632_v56, %v1075_v30 }
 0x266   : > { %v1608_v22 = vpop.permute.xlu1 %1607  ;;  %v5609_v43 = vpop.permute.xlu0 %1735 }
 0x267   : > { %v1614_v57 = vmul.f32 %v1608_v22, %v5338_v2  ;;  %v1615_v10 = vmul.f32 %v1608_v22, %v5343_v4  ;;  %v1616_v17 = vmul.f32 %v1608_v22, %v5340_v3  ;;  %v1617_v23 = vmul.f32 %v1608_v22, %v5345_v5 }
 0x269   : > { %v1622_v49 = vadd.f32 %v1614_v57, %v1598_v53  ;;  %v1623_v24 = vadd.f32 %v1615_v10, %v1599_v60  ;;  %v1624_v52 = vadd.f32 %v1616_v17, %v1600_v39  ;;  %v1625_v35 = vadd.f32 %v1617_v23, %v1601_v11 }
 0x26a   : > { %v5619_v41 = vpop.permute.xlu0 %1739  ;;  %v1639_v60 = vmul.f32 %v1632_v56, %v5531_v33  ;;  %v1640_v17 = vmul.f32 %v1632_v56, %v1077_v21  ;;  %v1641_v23 = vmul.f32 %v1632_v56, %v5570_v26 }
 0x26b   : > { %v1596_v38 = vpop.permute.xlu1 %1595  ;;  %v1646_v57 = vadd.f32 %v1638_v34, %v1622_v49 }
 0x26c   : > { %v1602_v27 = vmul.f32 %v1596_v38, %v5512_v0  ;;  %v1603_v3 = vmul.f32 %v1596_v38, %v5465_v48  ;;  %v1605_v22 = vmul.f32 %v1596_v38, %v5515_v1  ;;  %v1604_v0 = vmul.f32 %v1596_v38, %v5504_v62 }
 0x26d   : > { %v1647_v29 = vadd.f32 %v1639_v60, %v1623_v24  ;;  %v1648_v10 = vadd.f32 %v1640_v17, %v1624_v52  ;;  %v1649_v39 = vadd.f32 %v1641_v23, %v1625_v35 }
 0x270   : > { %v1612_v59 = vpop.permute.xlu1 %1611 }
 0x271   : > { %v1618_v51 = vmul.f32 %v1612_v59, %v5347_v6  ;;  %v1619_v18 = vmul.f32 %v1612_v59, %v5355_v9  ;;  %v1620_v25 = vmul.f32 %v1612_v59, %v5349_v7  ;;  %v1621_v53 = vmul.f32 %v1612_v59, %v5351_v8  ;;  %v1680_v6 = vpop.permute.xlu0 %1679 }
 0x273   : > { %v1627_v48 = vadd.f32 %v1619_v18, %v1603_v3  ;;  %v1629_v30 = vadd.f32 %v1621_v53, %v1605_v22  ;;  %v1626_v1 = vadd.f32 %v1618_v51, %v1602_v27  ;;  %v1628_v11 = vadd.f32 %v1620_v25, %v1604_v0 }
 0x274   : > { %v5667_v22 = vsub.s32 2, %v5427_v31 }
 0x275   : > { %v1656_v9 = vpop.permute.xlu1 %1655  ;;  %v5631_v7 = vadd.f32 %v1643_v28, %v1627_v48  ;;  %v5633_v59 = vadd.f32 %v1645_v20, %v1629_v30  ;;  %v5635_v56 = vadd.f32 %v1642_v54, %v1626_v1  ;;  %v5637_v62 = vadd.f32 %v1644_v12, %v1628_v11 }
 0x276   : > { %v1662_v33 = vadd.f32 %v1656_v9, %v1646_v57  ;;  %v1663_v21 = vadd.f32 %v1656_v9, %v1647_v29  ;;  %v1664_v8 = vadd.f32 %v1656_v9, %v1648_v10  ;;  %v1665_v26 = vadd.f32 %v1656_v9, %v1649_v39 }
 0x277   : > { %v5104_v54 = vmov 6   ;;  %v5673_v18 = vrot.slane %v5441_v37, %v5667_v22 }
 0x278   : > { %v1686_v3 = vmul.f32 %v1680_v6, %v1662_v33  ;;  %v1687_v38 = vmul.f32 %v1680_v6, %v1663_v21  ;;  %vm1671_vm4 = vcmp.ge.f32.partialorder %v1663_v21, 0.0  ;;  %vm1670_vm5 = vcmp.ge.f32.partialorder %v1662_v33, 0.0  ;;  %4986 = vset.pattern.permute.xlu1 %v5104_v54 }
 0x279   : > { %v1688_v52 = vmul.f32 %v1680_v6, %v1664_v8  ;;  %v1689_v35 = vmul.f32 %v1680_v6, %v1665_v26  ;;  %vm1673_vm6 = vcmp.ge.f32.partialorder %v1665_v26, 0.0  ;;  %vm1672_vm7 = vcmp.ge.f32.partialorder %v1664_v8, 0.0  ;;  %v5653_v6 = vpop.permute.xlu1 %1659 }
 0x27a   : > { %v5639_v27 = vsel %vm1671_vm4, %v1663_v21, %v1687_v38  ;;  %v1694_v28 = vsel %vm1670_vm5, %v1662_v33, %v1686_v3 }
 0x27b   : > { %1706 = vrot.lane.b32.xlu1 %v5639_v27, %s7186_s24  ;;  %1702 = vrot.lane.b32.xlu0 %v1694_v28, %s7186_s24  ;;  %v5644_v9 = vsel %vm1673_vm6, %v1665_v26, %v1689_v35  ;;  %v5646_v20 = vsel %vm1672_vm7, %v1664_v8, %v1688_v52  ;;  %vm1355_vm7 = vcmp.lt.s32.totalorder %v5429_v32, 127 }
 0x27e   : > { %v5656_v12 = vpop.permute.xlu1 %1683 }
 0x27f   : > { %1714 = vrot.lane.b32.xlu1 %v5644_v9, %s7186_s24  ;;  %1710 = vrot.lane.b32.xlu0 %v5646_v20, %s7186_s24 }
 0x283   : > { %1774 = vrot.lane.b32.xlu0 %v1694_v28, %s7184_s21  ;;  %v5658_v34 = vpop.permute.xlu1 %1751 }
 0x284   : > { %v1758_v0 = vmul.f32 %v5658_v34, %v1694_v28 }
 0x288   : > { %v5660_v8 = vpop.permute.xlu1 %1807 }
 0x28d   : > { %v5662_v49 = vpop.permute.xlu1 %1755 }
 0x2ed   : > { %v5664_v24 = vpop.permute.xlu0 %1702  ;;  %v5669_v51 = vpop.permute.xlu1 %1706 }
 0x2f1   : > { %v5676_v25 = vpop.permute.xlu0 %1710  ;;  %v5678_v53 = vpop.permute.xlu1 %1714 }
 0x2f2   : > { %v5684_v60 = vsel %vm1306_vm8, %v5669_v51, %v5676_v25  ;;  %v1724_v17 = vsel %vm1306_vm8, %v5678_v53, %v5664_v24 }
 0x2f3   : > { %v1726_v23 = vmul.f32 %v1724_v17, %v5673_v18 }
 0x2f5   : > { %v1742_v57 = vmul.f32 %v5609_v43, %v1726_v23 }
 0x2f7   : > { %v5693_v48 = vadd.f32 %v1758_v0, %v1742_v57 }
 0x322   : > { %v1168_v30 = vpop.f32.mrb[4].mxu0 }
 0x323   : > { %v1169_v1 = vadd.f32 %v1168_v30, %v5595_v40  ;;  %v1170_v29 = vpop.f32.mrb[5].mxu0 }
 0x324   : > { %v1171_v10 = vadd.f32 %v1170_v29, %v5595_v40  ;;  %v1245_v11 = vpop.f32.mrb[4].mxu1 }
 0x325   : > { %v1272_v39 = vmul.f32 %v5607_v50, %v1169_v1  ;;  %vm1256_vm9 = vcmp.ge.f32.partialorder %v1169_v1, 0.0  ;;  %v1246_v21 = vadd.f32 %v1245_v11, %v5595_v40  ;;  %v1247_v26 = vpop.f32.mrb[5].mxu1 }
 0x326   : > { %v1273_v33 = vmul.f32 %v5607_v50, %v1171_v10  ;;  %v1174_v3 = vpop.f32.mrb[6].mxu0  ;;  %vm1257_vm10 = vcmp.ge.f32.partialorder %v1171_v10, 0.0  ;;  %v1248_v38 = vadd.f32 %v1247_v26, %v5595_v40 }
 0x327   : > { %v1175_v52 = vadd.f32 %v1174_v3, %v5601_v13  ;;  %v1176_v35 = vpop.f32.mrb[7].mxu0  ;;  %v5702_v28 = vsel %vm1256_vm9, %v1169_v1, %v1272_v39  ;;  %v1274_v17 = vmul.f32 %v5607_v50, %v1246_v21  ;;  %vm1258_vm11 = vcmp.ge.f32.partialorder %v1246_v21, 0.0 }
 0x328   : > { %v1177_v23 = vadd.f32 %v1176_v35, %v5601_v13  ;;  %1290 = vrot.lane.b32.xlu0 %v5702_v28, %s7186_s24  ;;  %v1251_v57 = vpop.f32.mrb[6].mxu1  ;;  %v5709_v30 = vsel %vm1257_vm10, %v1171_v10, %v1273_v33  ;;  %v1275_v40 = vmul.f32 %v5607_v50, %v1248_v38  ;;  %vm1259_vm14 = vcmp.ge.f32.partialorder %v1248_v38, 0.0 }
 0x329   : > { %v1276_v0 = vmul.f32 %v5604_v47, %v1175_v52  ;;  %vm1260_vm12 = vcmp.ge.f32.partialorder %v1175_v52, 0.0  ;;  %v1252_v1 = vadd.f32 %v1251_v57, %v5601_v13  ;;  %v1253_v39 = vpop.f32.mrb[7].mxu1  ;;  %v5717_v3 = vsel %vm1258_vm11, %v1246_v21, %v1274_v17 }
 0x32a   : > { %v1277_v29 = vmul.f32 %v5604_v47, %v1177_v23  ;;  %vm1261_vm13 = vcmp.ge.f32.partialorder %v1177_v23, 0.0  ;;  %v1254_v11 = vadd.f32 %v1253_v39, %v5601_v13  ;;  %v5735_v17 = vsel %vm1259_vm14, %v1248_v38, %v1275_v40 }
 0x32b   : > { %v5715_v26 = vsel %vm1260_vm12, %v1175_v52, %v1276_v0  ;;  %v1278_v35 = vmul.f32 %v5604_v47, %v1252_v1  ;;  %vm1262_vm15 = vcmp.ge.f32.partialorder %v1252_v1, 0.0  ;;  %v1667_v38 = vadd.f32 %v5653_v6, %v5631_v7 }
 0x32c   : > { %1292 = vrot.lane.b32.xlu1 %v5715_v26, %s7186_s24  ;;  %1298 = vrot.lane.b32.xlu0 %v5717_v3, %s7186_s24  ;;  %v5726_v10 = vsel %vm1261_vm13, %v1177_v23, %v1277_v29  ;;  %v1279_v13 = vmul.f32 %v5604_v47, %v1254_v11  ;;  %vm1263_vm1 = vcmp.ge.f32.partialorder %v1254_v11, 0.0  ;;  %v1669_v57 = vadd.f32 %v5653_v6, %v5633_v59 }
 0x32d   : > { %v5731_v21 = vsel %vm1262_vm15, %v1252_v1, %v1278_v35  ;;  %v1691_v23 = vmul.f32 %v5656_v12, %v1667_v38  ;;  %vm1675_vm2 = vcmp.ge.f32.partialorder %v1667_v38, 0.0  ;;  %v1666_v7 = vadd.f32 %v5653_v6, %v5635_v56 }
 0x32e   : > { %v5737_v0 = vsel %vm1263_vm1, %v1254_v11, %v1279_v13  ;;  %v1693_v29 = vmul.f32 %v5656_v12, %v1669_v57  ;;  %vm1677_vm4 = vcmp.ge.f32.partialorder %v1669_v57, 0.0  ;;  %v1668_v39 = vadd.f32 %v5653_v6, %v5637_v62 }
 0x32f   : > { %v5777_v40 = vsel %vm1675_vm2, %v1667_v38, %v1691_v23  ;;  %v1690_v59 = vmul.f32 %v5656_v12, %v1666_v7  ;;  %vm1674_vm5 = vcmp.ge.f32.partialorder %v1666_v7, 0.0  ;;  %v5105_v35 = vmov 7  }
 0x330   : > { %1300 = vrot.lane.b32.xlu1 %v5731_v21, %s7186_s24  ;;  %1339 = vrot.lane.b32.xlu0 %v5702_v28, %s7184_s21  ;;  %v5787_v1 = vsel %vm1677_vm4, %v1669_v57, %v1693_v29  ;;  %v1692_v56 = vmul.f32 %v5656_v12, %v1668_v39  ;;  %vm1676_vm6 = vcmp.ge.f32.partialorder %v1668_v39, 0.0  ;;  %v5106_v62 = vmov 8  }
 0x331   : > { %v5795_v11 = vsel %vm1674_vm5, %v1666_v7, %v1690_v59  ;;  %v5107_v6 = vmov 9   ;;  %v7175_v12 = vmov 10   ;;  %v5847_v47 = vrot.slane %v5456_v45, %v5667_v22 }
 0x332   : > { %v5802_v13 = vsel %vm1676_vm6, %v1668_v39, %v1692_v56  ;;  %v5836_v56 = vrot.slane %v5435_v36, %v5667_v22 }
 0x334   : > { %1341 = vrot.lane.b32.xlu1 %v5715_v26, %s7184_s21  ;;  %1347 = vrot.lane.b32.xlu0 %v5717_v3, %s7184_s21 }
 0x338   : > { %1349 = vrot.lane.b32.xlu1 %v5731_v21, %s7184_s21  ;;  %1294 = vrot.lane.b32.xlu0 %v5709_v30, %s7186_s24 }
 0x33c   : > { %1296 = vrot.lane.b32.xlu1 %v5726_v10, %s7186_s24  ;;  %1302 = vrot.lane.b32.xlu0 %v5735_v17, %s7186_s24 }
 0x340   : > { %1304 = vrot.lane.b32.xlu1 %v5737_v0, %s7186_s24  ;;  %1343 = vrot.lane.b32.xlu0 %v5709_v30, %s7184_s21 }
 0x344   : > { %1345 = vrot.lane.b32.xlu1 %v5726_v10, %s7184_s21  ;;  %1351 = vrot.lane.b32.xlu0 %v5735_v17, %s7184_s21 }
 0x348   : > { %1353 = vrot.lane.b32.xlu1 %v5737_v0, %s7184_s21  ;;  %1782 = vrot.lane.b32.xlu0 %v5646_v20, %s7184_s21 }
 0x34c   : > { %1778 = vrot.lane.b32.xlu1 %v5639_v27, %s7184_s21  ;;  %1811 = vperm.xlu0 %4984, %v5404_v19  }
 0x350   : > { %1786 = vrot.lane.b32.xlu1 %v5644_v9, %s7184_s21  ;;  %1708 = vrot.lane.b32.xlu0 %v5777_v40, %s7186_s24 }
 0x351   : > { %4988 = vset.pattern.permute.xlu0 %v5104_v54 }
 0x354   : > { %1831 = vperm.xlu1 %4986, %v5380_v14   ;;  %1716 = vrot.lane.b32.xlu0 %v5787_v1, %s7186_s24 }
 0x358   : > { %1704 = vrot.lane.b32.xlu1 %v5795_v11, %s7186_s24  ;;  %1776 = vrot.lane.b32.xlu0 %v5795_v11, %s7184_s21 }
 0x359   : > { %4987 = vset.pattern.permute.xlu1 %v5105_v35 }
 0x35c   : > { %1712 = vrot.lane.b32.xlu1 %v5802_v13, %s7186_s24  ;;  %1784 = vrot.lane.b32.xlu0 %v5802_v13, %s7184_s21  ;;  %s7347_s24 = smov 1  }
 0x360   : > { %1855 = vperm.xlu1 %4987, %v5380_v14   ;;  %1835 = vperm.xlu0 %4988, %v5387_v15  }
 0x364   : > { %1780 = vrot.lane.b32.xlu1 %v5777_v40, %s7184_s21  ;;  %4990 = vset.pattern.permute.xlu0 %v5105_v35 }
 0x365   : > { %2439 = vperm.xlu0 %4990, %v5395_v16  }
 0x368   : > { %1788 = vrot.lane.b32.xlu1 %v5787_v1, %s7184_s21 }
 0x369   : > { %2443 = vperm.xlu0 %4990, %v5404_v19  }
 0x36c   : > { %1859 = vperm.xlu1 %4987, %v5387_v15  }
 0x36d   : > { %4994 = vset.pattern.permute.xlu0 %v5106_v62 }
 0x36e   : > { %2511 = vperm.xlu0 %4994, %v5380_v14  }
 0x370   : > { %4989 = vset.pattern.permute.xlu1 %v5104_v54 }
 0x371   : > { %2423 = vperm.xlu1 %4989, %v5395_v16  }
 0x372   : > { %4997 = vset.pattern.permute.xlu0 %v5107_v6 }
 0x373   : > { %2539 = vperm.xlu0 %4997, %v5387_v15  }
 0x375   : > { %4991 = vset.pattern.permute.xlu1 %v5106_v62 }
 0x376   : > { %2487 = vperm.xlu1 %4991, %v5395_v16  }
 0x37a   : > { %4992 = vset.pattern.permute.xlu1 %v5104_v54  ;;  %v5830_v54 = vpop.permute.xlu0 %1774 }
 0x37b   : > { %2427 = vperm.xlu1 %4992, %v5404_v19  }
 0x37f   : > { %4993 = vset.pattern.permute.xlu1 %v5106_v62 }
 0x380   : > { %2491 = vperm.xlu1 %4993, %v5404_v19  }
 0x384   : > { %4995 = vset.pattern.permute.xlu1 %v5107_v6 }
 0x385   : > { %2535 = vperm.xlu1 %4995, %v5380_v14  }
 0x389   : > { %4996 = vset.pattern.permute.xlu1 %v5106_v62  ;;  %v1366_v62 = vsub.s32 3, %v5427_v31 }
 0x38a   : > { %2515 = vperm.xlu1 %4996, %v5387_v15  }
 0x38e   : > { %4998 = vset.pattern.permute.xlu1 %v5107_v6 }
 0x38f   : > { %2607 = vperm.xlu1 %4998, %v5395_v16  }
 0x393   : > { %4999 = vset.pattern.permute.xlu1 %v7175_v12 }
 0x394   : > { %2623 = vperm.xlu1 %4999, %v5395_v16  }
 0x39a   : > { %v1291_v38 = vpop.permute.xlu0 %1290 }
 0x39e   : > { %v1293_v23 = vpop.permute.xlu1 %1292  ;;  %v1299_v57 = vpop.permute.xlu0 %1298 }
 0x3a2   : > { %v1301_v19 = vpop.permute.xlu1 %1300  ;;  %v1340_v29 = vpop.permute.xlu0 %1339 }
 0x3a6   : > { %v1342_v7 = vpop.permute.xlu1 %1341  ;;  %v1348_v14 = vpop.permute.xlu0 %1347 }
 0x3aa   : > { %v1350_v59 = vpop.permute.xlu1 %1349  ;;  %v1295_v39 = vpop.permute.xlu0 %1294 }
 0x3ab   : > { %v1311_v15 = vsel %vm1306_vm8, %v1291_v38, %v1295_v39  ;;  %v1309_v63 = vsel %vm1306_vm8, %v1295_v39, %v1299_v57  ;;  %v5886_v39 = vrot.slane %v5461_v46, %v1366_v62 }
 0x3ac   : > { %v1332_v12 = vmul.f32 %v5836_v56, %v1311_v15  ;;  %v5856_v15 = vrot.slane %v5461_v46, %v5667_v22 }
 0x3ae   : > { %v1297_v35 = vpop.permute.xlu1 %1296  ;;  %v1303_v16 = vpop.permute.xlu0 %1302 }
 0x3af   : > { %v1312_v6 = vsel %vm1306_vm8, %v1293_v23, %v1297_v35  ;;  %v1310_v52 = vsel %vm1306_vm8, %v1297_v35, %v1301_v19  ;;  %v1307_v33 = vsel %vm1306_vm8, %v1299_v57, %v1303_v16  ;;  %v1313_v5 = vsel %vm1306_vm8, %v1303_v16, %v1291_v38 }
 0x3b0   : > { %v1336_v50 = vmul.f32 %v5836_v56, %v1312_v6  ;;  %v5859_v35 = vrot.slane %v5435_v36, %v1366_v62  ;;  %v1337_v61 = vmul.f32 %v5847_v47, %v1310_v52  ;;  %v1331_v22 = vmul.f32 %v5673_v18, %v1313_v5 }
 0x3b1   : > { %v1334_v58 = vmul.f32 %v5856_v15, %v1307_v33  ;;  %v1333_v52 = vmul.f32 %v5847_v47, %v1309_v63  ;;  %v5876_v57 = vrot.slane %v5441_v37, %v1366_v62 }
 0x3b2   : > { %v1305_v4 = vpop.permute.xlu1 %1304  ;;  %v1344_v6 = vpop.permute.xlu0 %1343  ;;  %v4679_v2 = vpack.c.bf16 %v1336_v50, %v1332_v12 }
 0x3b3   : > { %v1308_v38 = vsel %vm1306_vm8, %v1301_v19, %v1305_v4  ;;  %v1314_v16 = vsel %vm1306_vm8, %v1305_v4, %v1293_v23  ;;  %v1358_v50 = vsel %vm1355_vm7, %v1344_v6, %v1348_v14  ;;  %v4693_v63 = vpack.c.bf16 %v1337_v61, %v1333_v52 }
 0x3b4   : > { %v1335_v36 = vmul.f32 %v5673_v18, %v1314_v16  ;;  %v1338_v44 = vmul.f32 %v5856_v15, %v1308_v38  ;;  %4680 = vmatprep.subr.bf16.mxu0 %v4679_v2  ;;  %v5883_v2 = vrot.slane %v5456_v45, %v1366_v62  ;;  %v1360_v37 = vsel %vm1355_vm7, %v1340_v29, %v1344_v6  ;;  %v631_v6 = vld [vmem:[%s7138_s2 + $0x80] sm:$0xff] }
 0x3b5   : > { %v1381_v38 = vmul.f32 %v5859_v35, %v1358_v50  ;;  %v7288_v45 = vpack.c.bf16 %v5726_v10, %v5709_v30  ;;  %v7289_v10 = vpack.c.bf16 %v5737_v0, %v5735_v17  ;;  %v664_v17 = vld [vmem:[%s7138_s2 + $0x188] sm:$0xff] }
 0x3b6   : > { %v4681_v12 = vpack.c.bf16 %v1335_v36, %v1331_v22  ;;  %v1346_v19 = vpop.permute.xlu1 %1345  ;;  %v1352_v4 = vpop.permute.xlu0 %1351  ;;  %v4691_v23 = vpack.c.bf16 %v1338_v44, %v1334_v58 }
 0x3b7   : > { %v1359_v5 = vsel %vm1355_vm7, %v1346_v19, %v1350_v59  ;;  %v1361_v33 = vsel %vm1355_vm7, %v1342_v7, %v1346_v19  ;;  %v1356_v58 = vsel %vm1355_vm7, %v1348_v14, %v1352_v4  ;;  %v1362_v16 = vsel %vm1355_vm7, %v1352_v4, %v1340_v29  ;;  %v632_v14 = vld [vmem:[%s7138_s2 + $0x88] sm:$0xff] }
 0x3b8   : > { %v1385_v44 = vmul.f32 %v5859_v35, %v1359_v5  ;;  %4682 = vmatpush1.bf16.msra.mxu0 %v4681_v12  ;;  %4692 = vmatprep.subr.bf16.mxu1 %v4691_v23  ;;  %v1384_v46 = vmul.f32 %v5876_v57, %v1361_v33  ;;  %v1380_v29 = vmul.f32 %v5876_v57, %v1360_v37  ;;  %v633_v33 = vld [vmem:[%s7138_s2 + $0x90] sm:$0xff] }
 0x3b9   : > { %4684 = vmatprep.subr.bf16.mxu0 %v7288_v45  ;;  %4694 = vmatpush1.bf16.msra.mxu1 %v4693_v63  ;;  %v1382_v36 = vmul.f32 %v5883_v2, %v1356_v58  ;;  %v1383_v50 = vmul.f32 %v5886_v39, %v1362_v16  ;;  %v7290_v19 = vpack.c.bf16 %v5715_v26, %v5702_v28  ;;  %v616_v28 = vld [vmem:[%s7138_s2 + $0x8] sm:$0xff]  ;;  %v634_v63 = vld [vmem:[%s7138_s2 + $0x98] sm:$0xff]  ;;  %v665_v58 = vld [vmem:[%s7138_s2 + $0x190] sm:$0xff] }
 0x3ba   : > { %v1354_v61 = vpop.permute.xlu1 %1353  ;;  %v4687_v62 = vpack.c.bf16 %v1385_v44, %v1381_v38  ;;  %4696 = vmatprep.subr.bf16.mxu1 %v7289_v10  ;;  %v5927_v0 = vpack.c.bf16 %v632_v14, %v631_v6  ;;  %v4689_v26 = vpack.c.bf16 %v1384_v46, %v1380_v29  ;;  %v7292_v23 = vpack.c.bf16 %v5731_v21, %v5717_v3  ;;  %v647_v38 = vld [vmem:[%s7138_s2 + $0x100] sm:$0xff]  ;;  %v648_v3 = vld [vmem:[%s7138_s2 + $0x108] sm:$0xff]  ;;  %v666_v16 = vld [vmem:[%s7138_s2 + $0x198] sm:$0xff] }
 0x3bb   : > { %v1357_v22 = vsel %vm1355_vm7, %v1350_v59, %v1354_v61  ;;  %v1363_v30 = vsel %vm1355_vm7, %v1354_v61, %v1342_v7  ;;  %v663_v7 = vld [vmem:[%s7138_s2 + $0x180] sm:$0xff]  ;;  %v5964_v45 = vpack.c.bf16 %v634_v63, %v633_v33  ;;  %v617_v46 = vld [vmem:[%s7138_s2 + $0x10] sm:$0xff]  ;;  %v618_v61 = vld [vmem:[%s7138_s2 + $0x18] sm:$0xff]  ;;  %v5982_v29 = vpack.c.bf16 %v666_v16, %v665_v58 }
 0x3bc   : > { %v1386_v52 = vmul.f32 %v5883_v2, %v1357_v22  ;;  %v1387_v12 = vmul.f32 %v5886_v39, %v1363_v30  ;;  %4686 = vmatpush1.bf16.msra.mxu0 %v7290_v19  ;;  %7291 = vst [vmem:[#allocation26_spill] sm:$0xff] %v5927_v0  ;;  %v615_v59 = vld [vmem:[%s7138_s2] sm:$0xff]  ;;  %v5944_v37 = vpack.c.bf16 %v664_v17, %v663_v7  ;;  %v636_v14 = vld [vmem:[%s7138_s2 + $0xa8] sm:$0xff]  ;;  %v649_v22 = vld [vmem:[%s7138_s2 + $0x110] sm:$0xff] }
 0x3bd   : > { %4688 = vmatprep.subr.bf16.mxu0 %v4687_v62  ;;  %4698 = vmatpush1.bf16.msra.mxu1 %v7292_v23  ;;  %v1288_v21 = vld [vmem:[%s7144_s8] sm:$0xff]  ;;  %v5955_v44 = vpack.c.bf16 %v616_v28, %v615_v59  ;;  %v5972_v62 = vpack.c.bf16 %v648_v3, %v647_v38  ;;  %v650_v30 = vld [vmem:[%s7138_s2 + $0x118] sm:$0xff]  ;;  %v5991_v10 = vpack.c.bf16 %v618_v61, %v617_v46  ;;  %v620_v7 = vld [vmem:[%s7138_s2 + $0x28] sm:$0xff]  ;;  %v1783_v23 = vpop.permute.xlu0 %1782 }
 0x3be   : > { %v4701_v4 = vpack.c.bf16 %v1386_v52, %v1382_v36  ;;  %v4699_v5 = vpack.c.bf16 %v1387_v12, %v1383_v50  ;;  %7293 = vst [vmem:[#allocation27_spill] sm:$0xff] %v5944_v37  ;;  %v635_v6 = vld [vmem:[%s7138_s2 + $0xa0] sm:$0xff]  ;;  %v668_v50 = vld [vmem:[%s7138_s2 + $0x1a8] sm:$0xff]  ;;  %v1779_v52 = vpop.permute.xlu1 %1778  ;;  %v6010_v17 = vpack.c.bf16 %v650_v30, %v649_v22  ;;  %v637_v59 = vld [vmem:[%s7138_s2 + $0xb0] sm:$0xff]  ;;  %v1722_v22 = vsel %vm1306_vm8, %v5664_v24, %v5669_v51 }
 0x3bf   : > { %v667_v36 = vld [vmem:[%s7138_s2 + $0x1a0] sm:$0xff]  ;;  %v6001_v12 = vpack.c.bf16 %v636_v14, %v635_v6  ;;  %v638_v28 = vld [vmem:[%s7138_s2 + $0xb8] sm:$0xff]  ;;  %v652_v63 = vld [vmem:[%s7138_s2 + $0x128] sm:$0xff]  ;;  %v1718_v24 = vsel %vm1306_vm8, %v5676_v25, %v5678_v53 }
 0x3c0   : > { %4690 = vmatpush1.bf16.msra.mxu0 %v4689_v26  ;;  %4700 = vmatprep.subr.bf16.mxu1 %v4699_v5  ;;  %v619_v19 = vld [vmem:[%s7138_s2 + $0x20] sm:$0xff]  ;;  %v7294_v26 = vmov 0.0   ;;  %v6023_v5 = vpack.c.bf16 %v668_v50, %v667_v36  ;;  %v669_v3 = vld [vmem:[%s7138_s2 + $0x1b0] sm:$0xff]  ;;  %v6042_v58 = vpack.c.bf16 %v638_v28, %v637_v59  ;;  %v622_v46 = vld [vmem:[%s7138_s2 + $0x38] sm:$0xff] }
 0x3c1   : > { %4704 = vmatprep.subr.bf16.mxu0 %v5927_v0  ;;  %4702 = vmatpush1.bf16.msra.mxu1 %v4701_v4  ;;  %v1289_v4 = vld [vmem:[%s7144_s8 + $0x8] sm:$0xff]  ;;  %v651_v33 = vld [vmem:[%s7138_s2 + $0x120] sm:$0xff]  ;;  %v6033_v38 = vpack.c.bf16 %v620_v7, %v619_v19  ;;  %v621_v16 = vld [vmem:[%s7138_s2 + $0x30] sm:$0xff] }
 0x3c2   : > { %4736 = vmatprep.subr.bf16.mxu1 %v5944_v37  ;;  %7296 = vst [vmem:[#allocation29_spill] sm:$0xff] %v6042_v58  ;;  %v6052_v61 = vpack.c.bf16 %v652_v63, %v651_v33  ;;  %v639_v6 = vld [vmem:[%s7138_s2 + $0xc0] sm:$0xff]  ;;  %v640_v14 = vld [vmem:[%s7138_s2 + $0xc8] sm:$0xff]  ;;  %v1787_v30 = vpop.permute.xlu1 %1786  ;;  %v653_v19 = vld [vmem:[%s7138_s2 + $0x130] sm:$0xff]  ;;  %v6081_v51 = vpack.c.bf16 %v622_v46, %v621_v16  ;;  %v1727_v33 = vmul.f32 %v1722_v22, %v5836_v56 }
 0x3c3   : > { %4273 = vmatmul.mubr.msk.f32.vlgmr.msra.gmra.mrb[8].mxu0 %vm1095_vm3, %v1288_v21  ;;  %7295 = vst [vmem:[#allocation28_spill] sm:$0xff] %v6033_v38  ;;  %v654_v7 = vld [vmem:[%s7138_s2 + $0x138] sm:$0xff]  ;;  %v671_v59 = vld [vmem:[%s7138_s2 + $0x1c0] sm:$0xff]  ;;  %v672_v28 = vld [vmem:[%s7138_s2 + $0x1c8] sm:$0xff]  ;;  %v1792_v63 = vsel %vm1355_vm7, %v1779_v52, %v1783_v23 }
 0x3c4   : > { %4706 = vmatpush3.bf16.msra.mxu0 %v5955_v44  ;;  %4275 = vmatmul.mubr.msk.f32.vlgmr.msra.gmra.mrb[8].mxu1 %vm1095_vm3, %v1288_v21  ;;  %v670_v21 = vld [vmem:[%s7138_s2 + $0x1b8] sm:$0xff]  ;;  %7297 = vst [vmem:[#allocation30_spill] sm:$0xff] %v6052_v61  ;;  %7299 = vst [vmem:[#allocation32_spill] sm:$0xff] %v6081_v51  ;;  %v623_v25 = vld [vmem:[%s7138_s2 + $0x40] sm:$0xff]  ;;  %v6117_v22 = vpack.c.bf16 %v672_v28, %v671_v59 }
 0x3c5   : > { %4708 = vmatprep.subr.bf16.mxu0 %v5964_v45  ;;  %4738 = vmatpush3.bf16.msra.mxu1 %v5972_v62  ;;  %v6068_v50 = vpack.c.bf16 %v670_v21, %v669_v3  ;;  %v624_v53 = vld [vmem:[%s7138_s2 + $0x48] sm:$0xff]  ;;  %v1796_v3 = vsel %vm1355_vm7, %v1787_v30, %v5830_v54  ;;  %v6105_v21 = vpack.c.bf16 %v654_v7, %v653_v19  ;;  %v641_v16 = vld [vmem:[%s7138_s2 + $0xd0] sm:$0xff]  ;;  %v642_v46 = vld [vmem:[%s7138_s2 + $0xd8] sm:$0xff] }
 0x3c6   : > { %1472 = vmatprep.mubr.f32.mxu0 %v7294_v26  ;;  %4740 = vmatprep.subr.bf16.mxu1 %v5982_v29  ;;  %7302 = vst [vmem:[#allocation35_spill] sm:$0xff] %v6117_v22  ;;  %v655_v19 = vld [vmem:[%s7138_s2 + $0x140] sm:$0xff]  ;;  %v656_v7 = vld [vmem:[%s7138_s2 + $0x148] sm:$0xff]  ;;  %v673_v59 = vld [vmem:[%s7138_s2 + $0x1d0] sm:$0xff] }
 0x3c7   : > { %1549 = vmatprep.mubr.f32.mxu1 %v7294_v26  ;;  %4274 = vmatmul.mubr.msk.f32.gmra.mrb[10].mxu0 %vm1095_vm3, %v1289_v4  ;;  %7298 = vst [vmem:[#allocation31_spill] sm:$0xff] %v6068_v50  ;;  %7301 = vst [vmem:[#allocation34_spill] sm:$0xff] %v6105_v21  ;;  %v674_v28 = vld [vmem:[%s7138_s2 + $0x1d8] sm:$0xff] }
 0x3c8   : > { %4710 = vmatpush3.bf16.msra.mxu0 %v5991_v10  ;;  %4276 = vmatmul.mubr.msk.f32.gmra.mrb[10].mxu1 %vm1095_vm3, %v1289_v4  ;;  %v6090_v4 = vpack.c.bf16 %v640_v14, %v639_v6  ;;  %v1729_v6 = vmul.f32 %v1718_v24, %v5856_v15  ;;  %v1790_v24 = vsel %vm1355_vm7, %v1783_v23, %v1787_v30  ;;  %v625_v30 = vld [vmem:[%s7138_s2 + $0x50] sm:$0xff] }
 0x3c9   : > { %4712 = vmatprep.subr.bf16.mxu0 %v6001_v12  ;;  %4742 = vmatpush3.bf16.msra.mxu1 %v6010_v17  ;;  %v6144_v23 = vpack.c.bf16 %v642_v46, %v641_v16 }
 0x3ca   : > { %4744 = vmatprep.subr.bf16.mxu1 %v6023_v5  ;;  %7300 = vst [vmem:[#allocation33_spill] sm:$0xff] %v6090_v4  ;;  %v1745_v16 = vmul.f32 %v5609_v43, %v1729_v6  ;;  %v1759_v6 = vmul.f32 %v5658_v34, %v5639_v27 }
 0x3cb   : > { %v6065_v36 = vpop.permute.xlu0 %1811  ;;  %7304 = vst [vmem:[#allocation37_spill] sm:$0xff] %v6144_v23 }
 0x3cc   : > { %4714 = vmatpush3.bf16.msra.mxu0 %v6033_v38 }
 0x3cd   : > { %4716 = vmatprep.subr.bf16.mxu0 %v6042_v58  ;;  %4746 = vmatpush3.bf16.msra.mxu1 %v6052_v61  ;;  %v1794_v58 = vsel %vm1355_vm7, %v5830_v54, %v1779_v52  ;;  %v1728_v61 = vmul.f32 %v5684_v60, %v5847_v47  ;;  %v1799_v54 = vmul.f32 %v1792_v63, %v5859_v35  ;;  %v643_v63 = vld [vmem:[%s7138_s2 + $0xe0] sm:$0xff] }
 0x3ce   : > { %4748 = vmatprep.subr.bf16.mxu1 %v6068_v50  ;;  %v6131_v50 = vpack.c.bf16 %v624_v53, %v623_v25  ;;  %v1801_v52 = vmul.f32 %v1796_v3, %v5886_v39  ;;  %v626_v25 = vld [vmem:[%s7138_s2 + $0x58] sm:$0xff]  ;;  %v1743_v53 = vmul.f32 %v5609_v43, %v1727_v33  ;;  %v6154_v60 = vpack.c.bf16 %v656_v7, %v655_v19  ;;  %v644_v3 = vld [vmem:[%s7138_s2 + $0xe8] sm:$0xff]  ;;  %v657_v19 = vld [vmem:[%s7138_s2 + $0x150] sm:$0xff] }
 0x3cf   : > { %v6114_v14 = vpop.permute.xlu0 %1708  ;;  %v1798_v46 = vmul.f32 %v1794_v58, %v5876_v57  ;;  %v6168_v33 = vpack.c.bf16 %v674_v28, %v673_v59  ;;  %v658_v7 = vld [vmem:[%s7138_s2 + $0x158] sm:$0xff]  ;;  %v1761_v58 = vmul.f32 %v5658_v34, %v5644_v9  ;;  %v675_v59 = vld [vmem:[%s7138_s2 + $0x1e0] sm:$0xff]  ;;  %v676_v28 = vld [vmem:[%s7138_s2 + $0x1e8] sm:$0xff]  ;;  %v6193_v9 = vpack.c.bf16 %v644_v3, %v643_v63 }
 0x3d0   : > { %4718 = vmatpush3.bf16.msra.mxu0 %v6081_v51  ;;  %7303 = vst [vmem:[#allocation36_spill] sm:$0xff] %v6131_v50  ;;  %7305 = vst [vmem:[#allocation38_spill] sm:$0xff] %v6154_v60  ;;  %v1817_v27 = vmul.f32 %v5660_v8, %v1801_v52  ;;  %v659_v52 = vld [vmem:[%s7138_s2 + $0x160] sm:$0xff]  ;;  %v645_v63 = vld [vmem:[%s7138_s2 + $0xf0] sm:$0xff] }
 0x3d1   : > { %4720 = vmatprep.subr.bf16.mxu0 %v6090_v4  ;;  %4750 = vmatpush3.bf16.msra.mxu1 %v6105_v21  ;;  %v1800_v4 = vmul.f32 %v1790_v24, %v5883_v2  ;;  %7306 = vst [vmem:[#allocation39_spill] sm:$0xff] %v6168_v33  ;;  %v6181_v24 = vpack.c.bf16 %v626_v25, %v625_v30  ;;  %7308 = vst [vmem:[#allocation41_spill] sm:$0xff] %v6193_v9  ;;  %v627_v30 = vld [vmem:[%s7138_s2 + $0x60] sm:$0xff]  ;;  %v628_v25 = vld [vmem:[%s7138_s2 + $0x68] sm:$0xff] }
 0x3d2   : > { %4752 = vmatprep.subr.bf16.mxu1 %v6117_v22  ;;  %v1744_v22 = vmul.f32 %v5609_v43, %v1728_v61  ;;  %v1815_v21 = vmul.f32 %v5660_v8, %v1799_v54  ;;  %v1760_v43 = vmul.f32 %v5658_v34, %v5646_v20  ;;  %v1767_v61 = vadd.f32 %v1759_v6, %v1743_v53  ;;  %v646_v3 = vld [vmem:[%s7138_s2 + $0xf8] sm:$0xff]  ;;  %v677_v6 = vld [vmem:[%s7138_s2 + $0x1f0] sm:$0xff] }
 0x3d3   : > { %v6165_v51 = vpop.permute.xlu1 %1831  ;;  %7307 = vst [vmem:[#allocation40_spill] sm:$0xff] %v6181_v24  ;;  %v1717_v38 = vpop.permute.xlu0 %1716  ;;  %v6204_v54 = vpack.c.bf16 %v658_v7, %v657_v19  ;;  %v1814_v20 = vmul.f32 %v5660_v8, %v1798_v46  ;;  %v1816_v34 = vmul.f32 %v5660_v8, %v1800_v4  ;;  %v6218_v19 = vpack.c.bf16 %v676_v28, %v675_v59  ;;  %v660_v7 = vld [vmem:[%s7138_s2 + $0x168] sm:$0xff] }
 0x3d4   : > { %4722 = vmatpush3.bf16.msra.mxu0 %v6131_v50  ;;  %v6230_v46 = vsub.s32 4, %v5427_v31  ;;  %v6233_v8 = vpack.c.bf16 %v628_v25, %v627_v30  ;;  %v1768_v4 = vadd.f32 %v1760_v43, %v1744_v22  ;;  %v6236_v28 = vpack.c.bf16 %v646_v3, %v645_v63 }
 0x3d5   : > { %4724 = vmatprep.subr.bf16.mxu0 %v6144_v23  ;;  %4754 = vmatpush3.bf16.msra.mxu1 %v6154_v60  ;;  %7309 = vst [vmem:[#allocation42_spill] sm:$0xff] %v6204_v54  ;;  %v1769_v23 = vadd.f32 %v1761_v58, %v1745_v16  ;;  %7310 = vst [vmem:[#allocation43_spill] sm:$0xff] %v6218_v19  ;;  %v678_v16 = vld [vmem:[%s7138_s2 + $0x1f8] sm:$0xff]  ;;  %v1823_v58 = vadd.f32 %v1815_v21, %v1767_v61  ;;  %v661_v61 = vld [vmem:[%s7138_s2 + $0x170] sm:$0xff] }
 0x3d6   : > { %4756 = vmatprep.subr.bf16.mxu1 %v6168_v33  ;;  %7311 = vst [vmem:[#allocation44_spill] sm:$0xff] %v6233_v8  ;;  %7312 = vst [vmem:[#allocation45_spill] sm:$0xff] %v6236_v28  ;;  %v629_v33 = vld [vmem:[%s7138_s2 + $0x70] sm:$0xff]  ;;  %v630_v60 = vld [vmem:[%s7138_s2 + $0x78] sm:$0xff]  ;;  %v6247_v30 = vpack.c.bf16 %v678_v16, %v677_v6  ;;  %v1822_v21 = vadd.f32 %v1814_v20, %v5693_v48  ;;  %v1824_v22 = vadd.f32 %v1816_v34, %v1768_v4 }
 0x3d7   : > { %v1705_v53 = vpop.permute.xlu1 %1704  ;;  %v1825_v59 = vadd.f32 %v1817_v27, %v1769_v23  ;;  %v1839_v23 = vadd.f32 %v6165_v51, %v1823_v58  ;;  %v6252_v25 = vpop.permute.xlu0 %1776  ;;  %v6267_v3 = vpack.c.bf16 %v630_v60, %v629_v33  ;;  %v6272_v20 = vld [vmem:[%s7272_s22 + $0x8] sm:$0xff] }
 0x3d8   : > { %4726 = vmatpush3.bf16.msra.mxu0 %v6181_v24  ;;  %v6245_v24 = vpack.c.bf16 %v660_v7, %v659_v52  ;;  %7314 = vst [vmem:[#allocation47_spill] sm:$0xff] %v6247_v30  ;;  %v662_v52 = vld [vmem:[%s7138_s2 + $0x178] sm:$0xff]  ;;  %v1723_v48 = vsel %vm1306_vm8, %v1705_v53, %v6114_v14  ;;  %v1725_v63 = vsel %vm1306_vm8, %v1717_v38, %v1705_v53  ;;  %v6282_v53 = vsub.s32 5, %v5427_v31 }
 0x3d9   : > { %4728 = vmatprep.subr.bf16.mxu0 %v6193_v9  ;;  %4758 = vmatpush3.bf16.msra.mxu1 %v6204_v54  ;;  %v1841_v27 = vadd.f32 %v6165_v51, %v1825_v59  ;;  %7315 = vst [vmem:[#allocation48_spill] sm:$0xff] %v6267_v3  ;;  %v6276_v34 = vrot.slane %v6272_v20, %v6230_v46  ;;  %vm1847_vm3 = vcmp.ge.f32.partialorder %v1839_v23, 0.0 }
 0x3da   : > { %7313 = vst [vmem:[#allocation46_spill] sm:$0xff] %v6245_v24  ;;  %4760 = vmatprep.subr.bf16.mxu1 %v6218_v19  ;;  %v1838_v7 = vadd.f32 %v6165_v51, %v1822_v21  ;;  %v1840_v6 = vadd.f32 %v6165_v51, %v1824_v22  ;;  %v6290_v16 = vpack.c.bf16 %v662_v52, %v661_v61 }
 0x3db   : > { %v1713_v43 = vpop.permute.xlu1 %1712  ;;  %v1730_v4 = vmul.f32 %v1725_v63, %v5673_v18  ;;  %v1731_v51 = vmul.f32 %v1723_v48, %v5836_v56  ;;  %vm1849_vm9 = vcmp.ge.f32.partialorder %v1841_v27, 0.0  ;;  %v1785_v61 = vpop.permute.xlu0 %1784  ;;  %v6310_v63 = vld [vmem:[%s7272_s22 + $0x10] sm:$0xff] }
 0x3dc   : > { %4730 = vmatpush3.bf16.msra.mxu0 %v6233_v8  ;;  %v1719_v60 = vsel %vm1306_vm8, %v1713_v43, %v1717_v38  ;;  %v1721_v33 = vsel %vm1306_vm8, %v6114_v14, %v1713_v43  ;;  %7316 = vst [vmem:[#allocation49_spill] sm:$0xff] %v6290_v16  ;;  %vm1848_vm10 = vcmp.ge.f32.partialorder %v1840_v6, 0.0  ;;  %vm1846_vm11 = vcmp.ge.f32.partialorder %v1838_v7, 0.0 }
 0x3dd   : > { %4732 = vmatprep.subr.bf16.mxu0 %v6236_v28  ;;  %4762 = vmatpush3.bf16.msra.mxu1 %v6245_v24  ;;  %v1732_v14 = vmul.f32 %v1721_v33, %v5847_v47  ;;  %v1733_v43 = vmul.f32 %v1719_v60, %v5856_v15  ;;  %v6314_v47 = vrot.slane %v6310_v63, %v6230_v46 }
 0x3de   : > { %4764 = vmatprep.subr.bf16.mxu1 %v6247_v30  ;;  %v1746_v15 = vmul.f32 %v5619_v41, %v1730_v4 }
 0x3df   : > { %v1856_v58 = vpop.permute.xlu1 %1855 }
 0x3e0   : > { %v1862_v59 = vmul.f32 %v1856_v58, %v1838_v7  ;;  %v1863_v21 = vmul.f32 %v1856_v58, %v1839_v23  ;;  %v1864_v38 = vmul.f32 %v1856_v58, %v1840_v6  ;;  %v1865_v22 = vmul.f32 %v1856_v58, %v1841_v27  ;;  %4734 = vmatpush3.bf16.msra.mxu0 %v6267_v3 }
 0x3e1   : > { %4766 = vmatpush3.bf16.msra.mxu1 %v6290_v16  ;;  %v1763_v58 = vmul.f32 %v5662_v49, %v5777_v40  ;;  %v1749_v40 = vmul.f32 %v5619_v41, %v1733_v43 }
 0x3e2   : > { %v6299_v18 = vsel %vm1847_vm3, %v1839_v23, %v1863_v21  ;;  %v6301_v56 = vsel %vm1849_vm9, %v1841_v27, %v1865_v22  ;;  %v6303_v52 = vsel %vm1848_vm10, %v1840_v6, %v1864_v38  ;;  %v6305_v48 = vsel %vm1846_vm11, %v1838_v7, %v1862_v59  ;;  %v6323_v27 = vld [vmem:[%s7272_s22] sm:$0xff]  ;;  %v6332_v6 = vld [vmem:[%s7272_s22 + $0x18] sm:$0xff] }
 0x3e3   : > { %7317 = vst [vmem:[#allocation50_spill] sm:$0xff] %v6299_v18  ;;  %7318 = vst [vmem:[#allocation51_spill] sm:$0xff] %v6301_v56  ;;  %v1747_v23 = vmul.f32 %v5619_v41, %v1731_v51  ;;  %v1781_v60 = vpop.permute.xlu1 %1780  ;;  %1945 = vmatprep.mubr.f32.mxu0 %v6299_v18  ;;  %2020 = vmatprep.mubr.f32.mxu1 %v6301_v56  ;;  %v6327_v7 = vrot.slane %v6323_v27, %v6230_v46  ;;  %v1836_v18 = vpop.permute.xlu0 %1835  ;;  %vm5111_vm11 = vmmov 0  }
 0x3e4   : > { %7319 = vst [vmem:[#allocation52_spill] sm:$0xff] %v6303_v52  ;;  %7320 = vst [vmem:[#allocation53_spill] sm:$0xff] %v6305_v48  ;;  %v6336_v33 = vrot.slane %v6332_v6, %v6230_v46  ;;  %v1793_v4 = vsel %vm1355_vm7, %v1781_v60, %v1785_v61  ;;  %v1795_v51 = vsel %vm1355_vm7, %v6252_v25, %v1781_v60  ;;  %1946 = vmatmul.mubr.f32.vlgmr.msra.gmra.mrb[12].mxu0 %v6305_v48 }
 0x3e5   : > { %v1762_v59 = vmul.f32 %v5662_v49, %v5795_v11  ;;  %v1802_v21 = vmul.f32 %v1795_v51, %v5876_v57  ;;  %v1803_v46 = vmul.f32 %v1793_v4, %v5859_v35  ;;  %2021 = vmatmul.mubr.f32.vlgmr.msra.gmra.mrb[12].mxu1 %v6303_v52  ;;  %v6353_v38 = vrot.slane %v6323_v27, %v6282_v53 }
 0x3e6   : > { %v6357_v22 = vrot.slane %v6272_v20, %v6282_v53  ;;  %v1748_v60 = vmul.f32 %v5619_v41, %v1732_v14  ;;  %v1771_v11 = vadd.f32 %v1763_v58, %v1747_v23  ;;  %v1765_v51 = vmul.f32 %v5662_v49, %v5787_v1 }
 0x3e7   : > { %v1770_v56 = vadd.f32 %v1762_v59, %v1746_v15  ;;  %v1818_v57 = vmul.f32 %v6065_v36, %v1802_v21  ;;  %v1819_v35 = vmul.f32 %v6065_v36, %v1803_v46  ;;  %v1789_v4 = vpop.permute.xlu1 %1788  ;;  %v1764_v52 = vmul.f32 %v5662_v49, %v5802_v13 }
 0x3e8   : > { %v1791_v48 = vsel %vm1355_vm7, %v1785_v61, %v1789_v4  ;;  %v1797_v41 = vsel %vm1355_vm7, %v1789_v4, %v6252_v25  ;;  %v6376_v58 = vrot.slane %v6310_v63, %v6282_v53  ;;  %v6380_v49 = vrot.slane %v6332_v6, %v6282_v53  ;;  %v7322_v53 = vld [vmem:[#allocation16_spill] sm:$0xff]  ;;  %v7323_v4 = vld [vmem:[#allocation22_spill] sm:$0xff] }
 0x3e9   : > { %v1826_v14 = vadd.f32 %v1818_v57, %v1770_v56  ;;  %v1827_v43 = vadd.f32 %v1819_v35, %v1771_v11  ;;  %v1804_v15 = vmul.f32 %v1791_v48, %v5883_v2  ;;  %v1805_v23 = vmul.f32 %v1797_v41, %v5886_v39  ;;  %v7321_v48 = vld [vmem:[#allocation13_spill] sm:$0xff] }
 0x3ea   : > { %v1772_v1 = vadd.f32 %v1764_v52, %v1748_v60  ;;  %v1773_v13 = vadd.f32 %v1765_v51, %v1749_v40  ;;  %v2415_v2 = vmul.f32 %v6276_v34, %v5450_v42  ;;  %v2416_v39 = vmul.f32 %v6314_v47, %v5486_v55  ;;  %v2440_v60 = vpop.permute.xlu0 %2439  ;;  %v7324_v51 = vld [vmem:[#allocation18_spill] sm:$0xff] }
 0x3eb   : > { %v1842_v61 = vadd.f32 %v1836_v18, %v1826_v14  ;;  %v1843_v59 = vadd.f32 %v1836_v18, %v1827_v43  ;;  %v1820_v25 = vmul.f32 %v6065_v36, %v1804_v15  ;;  %v1821_v56 = vmul.f32 %v6065_v36, %v1805_v23  ;;  %v1860_v21 = vpop.permute.xlu1 %1859  ;;  %v7327_v15 = vld [vmem:[#allocation4_spill] sm:$0xff] }
 0x3ec   : > { %v2414_v46 = vmul.f32 %v6327_v7, %v7321_v48  ;;  %v2417_v52 = vmul.f32 %v6336_v33, %v7322_v53  ;;  %v2478_v36 = vmul.f32 %v6353_v38, %v7323_v4  ;;  %v2479_v42 = vmul.f32 %v6357_v22, %v7324_v51  ;;  %v7330_v48 = vld [vmem:[#allocation7_spill] sm:$0xff] }
 0x3ed   : > { %v1828_v40 = vadd.f32 %v1820_v25, %v1772_v1  ;;  %v1829_v11 = vadd.f32 %v1821_v56, %v1773_v13  ;;  %v1866_v57 = vmul.f32 %v1860_v21, %v1842_v61  ;;  %v1867_v35 = vmul.f32 %v1860_v21, %v1843_v59  ;;  %v7328_v1 = vld [vmem:[#allocation6_spill] sm:$0xff]  ;;  %v7329_v25 = vld [vmem:[#allocation5_spill] sm:$0xff] }
 0x3ee   : > { %vm1851_vm12 = vcmp.ge.f32.partialorder %v1843_v59, 0.0  ;;  %vm1850_vm13 = vcmp.ge.f32.partialorder %v1842_v61, 0.0  ;;  %v2446_v23 = vmul.f32 %v2440_v60, %v7327_v15  ;;  %v2447_v13 = vmul.f32 %v2440_v60, %v7328_v1  ;;  %v7334_v1 = vld [vmem:[#allocation20_spill] sm:$0xff] }
 0x3ef   : > { %v1844_v55 = vadd.f32 %v1836_v18, %v1828_v40  ;;  %v1845_v41 = vadd.f32 %v1836_v18, %v1829_v11  ;;  %v6396_v14 = vsel %vm1851_vm12, %v1843_v59, %v1867_v35  ;;  %v6398_v43 = vsel %vm1850_vm13, %v1842_v61, %v1866_v57 }
 0x3f0   : > { %7325 = vst [vmem:[#allocation13_spill] sm:$0xff] %v6396_v14  ;;  %7326 = vst [vmem:[#allocation16_spill] sm:$0xff] %v6398_v43  ;;  %v2448_v56 = vmul.f32 %v2440_v60, %v7329_v25  ;;  %v2449_v53 = vmul.f32 %v2440_v60, %v7330_v48  ;;  %v2424_v4 = vpop.permute.xlu1 %2423  ;;  %1950 = vmatprep.mubr.f32.mxu0 %v6396_v14  ;;  %v7333_v60 = vld [vmem:[#allocation25_spill] sm:$0xff]  ;;  %vm2031_vm12 = vcmask 130048   ;;  %vm2106_vm13 = vcmask 15360  }
 0x3f1   : > { %v1868_v51 = vmul.f32 %v1860_v21, %v1844_v55  ;;  %v1869_v16 = vmul.f32 %v1860_v21, %v1845_v41  ;;  %v2430_v3 = vmul.f32 %v2424_v4, %v2414_v46  ;;  %v2431_v40 = vmul.f32 %v2424_v4, %v2415_v2  ;;  %1951 = vmatmul.mubr.f32.gmra.mrb[14].mxu0 %v6398_v43 }
 0x3f2   : > { %v2432_v18 = vmul.f32 %v2424_v4, %v2416_v39  ;;  %v2433_v61 = vmul.f32 %v2424_v4, %v2417_v52  ;;  %vm1853_vm14 = vcmp.ge.f32.partialorder %v1845_v41, 0.0  ;;  %vm1852_vm15 = vcmp.ge.f32.partialorder %v1844_v55, 0.0  ;;  %v7335_v4 = vld [vmem:[#allocation12_spill] sm:$0xff]  ;;  %4600 = vmatprep.mubr.msk.f32.mxu0 %vm5111_vm11, %v7294_v26 }
 0x3f3   : > { %v2454_v59 = vadd.f32 %v2446_v23, %v2430_v3  ;;  %v2455_v11 = vadd.f32 %v2447_v13, %v2431_v40  ;;  %v6406_v57 = vsel %vm1853_vm14, %v1845_v41, %v1869_v16  ;;  %v6408_v35 = vsel %vm1852_vm15, %v1844_v55, %v1868_v51  ;;  %v2444_v41 = vpop.permute.xlu0 %2443  ;;  %v7336_v40 = vld [vmem:[#allocation14_spill] sm:$0xff] }
 0x3f4   : > { %7331 = vst [vmem:[#allocation22_spill] sm:$0xff] %v6406_v57  ;;  %7332 = vst [vmem:[#allocation18_spill] sm:$0xff] %v6408_v35  ;;  %v2480_v15 = vmul.f32 %v6376_v58, %v7333_v60  ;;  %v2481_v21 = vmul.f32 %v6380_v49, %v7334_v1  ;;  %v2456_v46 = vadd.f32 %v2448_v56, %v2432_v18  ;;  %2025 = vmatprep.mubr.f32.mxu1 %v6406_v57  ;;  %vm2113_vm14 = vcmask 1041408  }
 0x3f5   : > { %v2457_v2 = vadd.f32 %v2449_v53, %v2433_v61  ;;  %v2488_v39 = vpop.permute.xlu1 %2487  ;;  %2026 = vmatmul.mubr.f32.gmra.mrb[14].mxu1 %v6408_v35  ;;  %v2419_v51 = vmul.f32 %v6276_v34, %v7335_v4  ;;  %v2420_v56 = vmul.f32 %v6314_v47, %v7336_v40  ;;  %v7337_v53 = vld [vmem:[#allocation17_spill] sm:$0xff]  ;;  %v7338_v61 = vld [vmem:[#allocation15_spill] sm:$0xff] }
 0x3f6   : > { %v2494_v52 = vmul.f32 %v2488_v39, %v2478_v36  ;;  %v2495_v3 = vmul.f32 %v2488_v39, %v2479_v42  ;;  %v2496_v23 = vmul.f32 %v2488_v39, %v2480_v15  ;;  %v2497_v16 = vmul.f32 %v2488_v39, %v2481_v21  ;;  %v7339_v42 = vld [vmem:[#allocation8_spill] sm:$0xff]  ;;  %v7340_v15 = vld [vmem:[#allocation11_spill] sm:$0xff]  ;;  %v7342_v21 = vld [vmem:[#allocation10_spill] sm:$0xff] }
 0x3f7   : > { %v2418_v18 = vmul.f32 %v6327_v7, %v7337_v53  ;;  %v2421_v36 = vmul.f32 %v6336_v33, %v7338_v61  ;;  %v2450_v60 = vmul.f32 %v2444_v41, %v7339_v42  ;;  %v2451_v1 = vmul.f32 %v2444_v41, %v7340_v15  ;;  %v7343_v4 = vld [vmem:[#allocation21_spill] sm:$0xff]  ;;  %v7344_v40 = vld [vmem:[#allocation19_spill] sm:$0xff]  ;;  %v7346_v15 = vld [vmem:[#allocation24_spill] sm:$0xff] }
 0x3f8   : > { %v2502_v55 = vadd.f32 %v2494_v52, %v2454_v59  ;;  %v2503_v13 = vadd.f32 %v2495_v3, %v2455_v11  ;;  %v2504_v25 = vadd.f32 %v2496_v23, %v2456_v46  ;;  %v2505_v48 = vadd.f32 %v2497_v16, %v2457_v2  ;;  %v7341_v59 = vld [vmem:[#allocation9_spill] sm:$0xff]  ;;  %v7345_v61 = vld [vmem:[#allocation23_spill] sm:$0xff] }
 0x3f9   : > { %v2452_v11 = vmul.f32 %v2444_v41, %v7341_v59  ;;  %v2453_v46 = vmul.f32 %v2444_v41, %v7342_v21  ;;  %v2482_v33 = vmul.f32 %v6353_v38, %v7343_v4  ;;  %v2483_v53 = vmul.f32 %v6357_v22, %v7344_v40 }
 0x3fa   : > { %v2428_v2 = vpop.permute.xlu1 %2427  ;;  %v2484_v42 = vmul.f32 %v6376_v58, %v7345_v61  ;;  %v2485_v41 = vmul.f32 %v6380_v49, %v7346_v15 }
 0x3fb   : > { %v2434_v39 = vmul.f32 %v2428_v2, %v2418_v18  ;;  %v2435_v34 = vmul.f32 %v2428_v2, %v2419_v51  ;;  %v2436_v52 = vmul.f32 %v2428_v2, %v2420_v56  ;;  %v2437_v3 = vmul.f32 %v2428_v2, %v2421_v36  ;;  %v2512_v18 = vpop.permute.xlu0 %2511 }
 0x3fc   : > { %v2518_v59 = vadd.f32 %v2512_v18, %v2502_v55  ;;  %v2521_v55 = vadd.f32 %v2512_v18, %v2505_v48  ;;  %v5050_v48 = vld [vmem:[%s7145_s9] sm:$0xff] }
 0x3fd   : > { %v2458_v47 = vadd.f32 %v2450_v60, %v2434_v39  ;;  %v2459_v23 = vadd.f32 %v2451_v1, %v2435_v34  ;;  %v2460_v16 = vadd.f32 %v2452_v11, %v2436_v52  ;;  %v2461_v7 = vadd.f32 %v2453_v46, %v2437_v3 }
 0x3fe   : > { %v2520_v11 = vadd.f32 %v2512_v18, %v2504_v25  ;;  %v2519_v52 = vadd.f32 %v2512_v18, %v2503_v13  ;;  %vm2526_vm2 = vcmp.ge.f32.partialorder %v2518_v59, 0.0  ;;  %v5049_v13 = vld [vmem:[%s7145_s9 + $0x8] sm:$0xff]  ;;  %vm2529_vm5 = vcmp.ge.f32.partialorder %v2521_v55, 0.0 }
 0x3ff   : > { %v2492_v51 = vpop.permute.xlu1 %2491 }
 0x400   : > { %v2498_v56 = vmul.f32 %v2492_v51, %v2482_v33  ;;  %v2499_v36 = vmul.f32 %v2492_v51, %v2483_v53  ;;  %v2500_v60 = vmul.f32 %v2492_v51, %v2484_v42  ;;  %v2501_v1 = vmul.f32 %v2492_v51, %v2485_v41  ;;  %v2540_v33 = vpop.permute.xlu0 %2539  ;;  %v6473_v41 = vld [vmem:[%s7141_s5] sm:$0xff] }
 0x401   : > { %vm2528_vm1 = vcmp.ge.f32.partialorder %v2520_v11, 0.0  ;;  %vm2527_vm4 = vcmp.ge.f32.partialorder %v2519_v52, 0.0  ;;  %7349 = vst [vmem:[#allocation4_spill] sm:$0xff] %v6473_v41 }
 0x402   : > { %v2506_v21 = vadd.f32 %v2498_v56, %v2458_v47  ;;  %v2507_v46 = vadd.f32 %v2499_v36, %v2459_v23  ;;  %v2508_v38 = vadd.f32 %v2500_v60, %v2460_v16  ;;  %v2509_v2 = vadd.f32 %v2501_v1, %v2461_v7 }
 0x403   : > { %v5109_v23 = vmov 11   ;;  %v7350_v36 = vmov 10  }
 0x404   : > { %v2536_v39 = vpop.permute.xlu1 %2535 }
 0x405   : > { %v2542_v22 = vmul.f32 %v2536_v39, %v2518_v59  ;;  %v2544_v34 = vmul.f32 %v2536_v39, %v2520_v11  ;;  %v2543_v3 = vmul.f32 %v2536_v39, %v2519_v52  ;;  %v2545_v25 = vmul.f32 %v2536_v39, %v2521_v55 }
 0x407   : > { %v6436_v58 = vsel %vm2528_vm1, %v2520_v11, %v2544_v34  ;;  %v6438_v49 = vsel %vm2526_vm2, %v2518_v59, %v2542_v22  ;;  %v6447_v47 = vsel %vm2527_vm4, %v2519_v52, %v2543_v3  ;;  %v6451_v16 = vsel %vm2529_vm5, %v2521_v55, %v2545_v25  ;;  %v6495_v11 = vld [vmem:[%s7141_s5 + $0x8] sm:$0xff] }
 0x408   : > { %2566 = vrot.lane.b32.xlu0 %v6436_v58, %s7347_s24  ;;  %2558 = vrot.lane.b32.xlu1 %v6438_v49, %s7347_s24  ;;  %7351 = vst [vmem:[#allocation6_spill] sm:$0xff] %v6495_v11 }
 0x409   : > { %v2516_v7 = vpop.permute.xlu1 %2515 }
 0x40a   : > { %v2524_v4 = vadd.f32 %v2516_v7, %v2508_v38  ;;  %v2522_v53 = vadd.f32 %v2516_v7, %v2506_v21  ;;  %v2523_v42 = vadd.f32 %v2516_v7, %v2507_v46  ;;  %v2525_v18 = vadd.f32 %v2516_v7, %v2509_v2 }
 0x40b   : > { %v7352_v21 = vmov 2   ;;  %v7353_v46 = vmov 3   ;;  %v7220_v38 = vmov 0.0|0.0  }
 0x40c   : > { %2611 = vperm.xlu0 %4997, %v5049_v13   ;;  %2562 = vrot.lane.b32.xlu1 %v6447_v47, %s7347_s24  ;;  %v2548_v40 = vmul.f32 %v2540_v33, %v2524_v4  ;;  %vm2532_vm6 = vcmp.ge.f32.partialorder %v2524_v4, 0.0  ;;  %v2546_v15 = vmul.f32 %v2540_v33, %v2522_v53  ;;  %vm2530_vm3 = vcmp.ge.f32.partialorder %v2522_v53, 0.0 }
 0x40d   : > { %v2547_v51 = vmul.f32 %v2540_v33, %v2523_v42  ;;  %vm2531_vm9 = vcmp.ge.f32.partialorder %v2523_v42, 0.0  ;;  %v2549_v60 = vmul.f32 %v2540_v33, %v2525_v18  ;;  %vm2533_vm10 = vcmp.ge.f32.partialorder %v2525_v18, 0.0  ;;  %4767 = vmatprep.subr.bf16.mxu0 %v7220_v38 }
 0x40e   : > { %v6464_v61 = vsel %vm2532_vm6, %v2524_v4, %v2548_v40  ;;  %v6476_v56 = vsel %vm2530_vm3, %v2522_v53, %v2546_v15 }
 0x40f   : > { %v6482_v1 = vsel %vm2531_vm9, %v2523_v42, %v2547_v51  ;;  %v6488_v59 = vsel %vm2533_vm10, %v2525_v18, %v2549_v60 }
 0x410   : > { %5000 = vset.pattern.permute.xlu0 %v5109_v23  ;;  %2570 = vrot.lane.b32.xlu1 %v6451_v16, %s7347_s24 }
 0x411   : > { %2695 = vperm.xlu0 %5000, %v5050_v48  }
 0x414   : > { %2627 = vperm.xlu1 %4999, %v5049_v13  }
 0x415   : > { %2650 = vrot.lane.b32.xlu0 %v6447_v47, %s7348_s19 }
 0x418   : > { %2646 = vrot.lane.b32.xlu1 %v6438_v49, %s7348_s19 }
 0x419   : > { %2658 = vrot.lane.b32.xlu0 %v6451_v16, %s7348_s19  ;;  %5001 = vset.pattern.permute.xlu1 %v5109_v23 }
 0x41c   : > { %2654 = vrot.lane.b32.xlu1 %v6436_v58, %s7348_s19 }
 0x41d   : > { %2568 = vrot.lane.b32.xlu0 %v6464_v61, %s7347_s24 }
 0x420   : > { %2699 = vperm.xlu1 %5001, %v5049_v13  }
 0x421   : > { %2743 = vperm.xlu0 %5000, %v6473_v41  }
 0x424   : > { %2560 = vrot.lane.b32.xlu1 %v6476_v56, %s7347_s24 }
 0x425   : > { %5002 = vset.pattern.permute.xlu0 %v7350_v36 }
 0x426   : > { %2719 = vperm.xlu0 %5002, %v6473_v41  }
 0x428   : > { %2564 = vrot.lane.b32.xlu1 %v6482_v1, %s7347_s24 }
 0x42a   : > { %2656 = vrot.lane.b32.xlu0 %v6464_v61, %s7348_s19 }
 0x42c   : > { %2572 = vrot.lane.b32.xlu1 %v6488_v59, %s7347_s24 }
 0x42e   : > { %2723 = vperm.xlu0 %5002, %v6495_v11  }
 0x430   : > { %2648 = vrot.lane.b32.xlu1 %v6476_v56, %s7348_s19 }
 0x432   : > { %5004 = vset.pattern.permute.xlu0 %v7352_v21 }
 0x433   : > { %1393 = vperm.xlu0 %5004, %v6495_v11  }
 0x434   : > { %2652 = vrot.lane.b32.xlu1 %v6482_v1, %s7348_s19 }
 0x438   : > { %2660 = vrot.lane.b32.xlu1 %v6488_v59, %s7348_s19 }
 0x43c   : > { %2747 = vperm.xlu1 %5001, %v6495_v11  }
 0x440   : > { %5003 = vset.pattern.permute.xlu1 %v7352_v21 }
 0x441   : > { %1389 = vperm.xlu1 %5003, %v6473_v41  }
 0x445   : > { %5005 = vset.pattern.permute.xlu1 %v7353_v46  ;;  %v1878_v46 = vld [vmem:[%s7147_s11] sm:$0x3] }
 0x446   : > { %1565 = vperm.xlu1 %5005, %v6473_v41  }
 0x44a   : > { %1569 = vperm.xlu1 %5005, %v6495_v11  }
 0x496   : > { %v6515_v2 = vpop.f32.mrb[8].mxu0 }
 0x497   : > { %7354 = vst [vmem:[#allocation5_spill] sm:$0xff] %v6515_v2  ;;  %v6517_v39 = vpop.f32.mrb[9].mxu0  ;;  %v6519_v22 = vpop.f32.mrb[8].mxu1  ;;  %v6605_v2 = vsub.s32 7, %v5427_v31 }
 0x498   : > { %7355 = vst [vmem:[#allocation7_spill] sm:$0xff] %v6517_v39  ;;  %7356 = vst [vmem:[#allocation25_spill] sm:$0xff] %v6519_v22  ;;  %v6521_v34 = vpop.f32.mrb[9].mxu1  ;;  %v2584_v39 = vsub.s32 6, %v5427_v31 }
 0x499   : > { %7357 = vst [vmem:[#allocation20_spill] sm:$0xff] %v6521_v34 }
 0x49a   : > { %v6523_v52 = vpop.f32.mrb[10].mxu0 }
 0x49b   : > { %7358 = vst [vmem:[#allocation12_spill] sm:$0xff] %v6523_v52  ;;  %v6525_v3 = vpop.f32.mrb[10].mxu1  ;;  %v6527_v55 = vpop.f32.mrb[11].mxu0 }
 0x49c   : > { %7359 = vst [vmem:[#allocation14_spill] sm:$0xff] %v6525_v3  ;;  %7360 = vst [vmem:[#allocation17_spill] sm:$0xff] %v6527_v55  ;;  %v6529_v25 = vpop.f32.mrb[11].mxu1 }
 0x49d   : > { %7361 = vst [vmem:[#allocation15_spill] sm:$0xff] %v6529_v25  ;;  %v6608_v25 = vrot.slane %v6272_v20, %v2584_v39 }
 0x4b7   : > { %v4366_v13 = vpop.f32.mrb[12].mxu0 }
 0x4b8   : > { %v4404_v23 = vpop.f32.mrb[12].mxu1  ;;  %v4367_v7 = vpop.f32.mrb[13].mxu0 }
 0x4b9   : > { %v4405_v48 = vpop.f32.mrb[13].mxu1  ;;  %v4368_v4 = vadd.f32 %v4367_v7, %v4366_v13  ;;  %v1879_v13 = vld [vmem:[%s7148_s12] sm:$0xff] }
 0x4ba   : > { %v4406_v33 = vadd.f32 %v4405_v48, %v4404_v23  ;;  %4605 = vmatprep.mubr.msk.f32.mxu1 %vm2106_vm13, %v1879_v13 }
 0x4bc   : > { %v2023_v40 = vadd.f32 %v4406_v33, %v4368_v4  ;;  %v1880_v4 = vld [vmem:[%s7148_s12 + $0x8] sm:$0xff]  ;;  %v679_v33 = vld [vmem:[%s7139_s3] sm:$0xff] }
 0x4c4   : > { %v4369_v53 = vpop.f32.mrb[14].mxu0 }
 0x4c5   : > { %v4370_v42 = vpop.f32.mrb[15].mxu0 }
 0x4c6   : > { %v4371_v15 = vadd.f32 %v4370_v42, %v4369_v53 }
 0x4c8   : > { %v4407_v18 = vpop.f32.mrb[14].mxu1 }
 0x4c9   : > { %v4408_v51 = vpop.f32.mrb[15].mxu1 }
 0x4ca   : > { %v4409_v36 = vadd.f32 %v4408_v51, %v4407_v18 }
 0x4cc   : > { %v2028_v60 = vadd.f32 %v4409_v36, %v4371_v15  ;;  %v2205_v15 = vcombine.high %v679_v33, %v679_v33 }
 0x4ce   : > { %v4768_v21 = vpack.c.bf16 %v2028_v60, %v2023_v40  ;;  %v5112_v40 = vmov 1983009808  }
 0x4cf   : > { %v2207_v53 = vunpack.c.l.s4 %v5112_v40 }
 0x4d0   : > { %4769 = vmatpush3.bf16.msra.mxu0 %v4768_v21 }
 0x4d1   : > { %v2208_v42 = vunpack.c.0.s8 %v2207_v53 }
 0x4d3   : > { %4601 = vmatmul.mubr.msk.f32.vlgmr.msra.gmra.mrb[16].mxu0 %vm2031_vm12, %v1878_v46  ;;  %v2211_v18 = vsub.s32 %v2208_v42, %v5427_v31  ;;  %v6573_v46 = vpop.permute.xlu1 %2607 }
 0x4d4   : > { %2300 = vmatprep.mubr.f32.mxu0 %v7294_v26 }
 0x4d5   : > { %v6551_v51 = vrot.slane %v679_v33, %v2211_v18  ;;  %v6553_v36 = vrot.slane %v2205_v15, %v2211_v18  ;;  %v6585_v33 = vpop.permute.xlu0 %2566 }
 0x4d7   : > { %7362 = vst [vmem:[#allocation8_spill] sm:$0xff] %v6551_v51  ;;  %7363 = vst [vmem:[#allocation11_spill] sm:$0xff] %v6553_v36  ;;  %v6557_v60 = vcombine.high %v6551_v51, %v6551_v51  ;;  %v6561_v21 = vcombine.high %v6553_v36, %v6553_v36  ;;  %v6575_v13 = vpop.permute.xlu1 %2623 }
 0x4d9   : > { %7364 = vst [vmem:[#allocation9_spill] sm:$0xff] %v6557_v60  ;;  %7365 = vst [vmem:[#allocation10_spill] sm:$0xff] %v6561_v21  ;;  %4281 = vmatprep.subr.msk.mxu0 %vm2113_vm14, %v6557_v60  ;;  %v6587_v40 = vpop.permute.xlu0 %2611 }
 0x4da   : > { %4282 = vmatpush1.msk.msra.mxu0 %vm2113_vm14, %v6551_v51 }
 0x4db   : > { %4771 = vmatprep.subr.bf16.mxu0 %v5927_v0 }
 0x4dd   : > { %v6591_v42 = vpop.permute.xlu0 %2695 }
 0x4e1   : > { %v6595_v18 = vpop.permute.xlu0 %2650 }
 0x4e5   : > { %v6599_v34 = vpop.permute.xlu0 %2658 }
 0x5a6   : > { %v2101_v23 = vpop.f32.mrb[16].mxu0 }
 0x5a7   : > { %v2105_v7 = vmax.f32 %v2101_v23, 0.0  ;;  %v4602_v48 = vpop.f32.mrb[17].mxu0  ;;  %v6577_v23 = vpop.permute.xlu1 %2558 }
 0x5a9   : > { %4603 = vmatprep.subr.msk.mxu1 %vm2113_vm14, %v2105_v7 }
 0x5aa   : > { %4604 = vmatpush3.msk.msra.mxu1 %vm2113_vm14, %v2105_v7 }
 0x5ab   : > { %4606 = vmatmul.mubr.msk.f32.vlgmr.msra.gmra.mrb[16].mxu1 %vm2106_vm13, %v1880_v4  ;;  %4285 = vmatprep.subr.msk.mxu1 %vm2113_vm14, %v6561_v21  ;;  %v6579_v7 = vpop.permute.xlu1 %2562 }
 0x5ac   : > { %2377 = vmatprep.mubr.f32.mxu1 %v7294_v26  ;;  %4286 = vmatpush1.msk.msra.mxu1 %vm2113_vm14, %v6553_v36 }
 0x5ad   : > { %4803 = vmatprep.subr.bf16.mxu1 %v5944_v37 }
 0x5af   : > { %v6581_v48 = vpop.permute.xlu1 %2570 }
 0x5b3   : > { %v6583_v4 = vpop.permute.xlu1 %2627 }
 0x5b7   : > { %v6589_v53 = vpop.permute.xlu1 %2646 }
 0x5b8   : > { %v2668_v3 = vsel %vm1355_vm7, %v6599_v34, %v6589_v53 }
 0x5bb   : > { %v6593_v15 = vpop.permute.xlu1 %2654 }
 0x5bc   : > { %v2664_v55 = vsel %vm1355_vm7, %v6595_v18, %v6593_v15 }
 0x5bf   : > { %v6597_v38 = vpop.permute.xlu1 %2699 }
 0x5c3   : > { %v6601_v22 = vpop.permute.xlu1 %2560 }
 0x5c7   : > { %v6623_v31 = vpop.permute.xlu1 %2564 }
 0x5cb   : > { %v6647_v60 = vpop.permute.xlu1 %2572 }
 0x67e   : > { %v4607_v37 = vpop.f32.mrb[16].mxu1 }
 0x67f   : > { %v2193_v0 = vsub.f32 0.0, %v4607_v37  ;;  %v2183_v57 = vpop.f32.mrb[17].mxu1  ;;  %v6611_v37 = vrot.slane %v6332_v6, %v2584_v39 }
 0x680   : > { %v2192_v14 = vsub.f32 0.0, %v2183_v57  ;;  %v6627_v57 = vrot.slane %v6332_v6, %v6605_v2 }
 0x681   : > { %v2196_v35 = vmul.f32 1.442695, %v2193_v0  ;;  %v2578_v0 = vsel %vm1306_vm8, %v6577_v23, %v6579_v7 }
 0x682   : > { %v2194_v43 = vmul.f32 1.442695, %v2192_v14  ;;  %v2574_v14 = vsel %vm1306_vm8, %v6585_v33, %v6581_v48  ;;  %v2599_v41 = vmul.f32 %v6608_v25, %v2578_v0  ;;  %v2689_v36 = vmul.f32 %v6627_v57, %v2668_v3 }
 0x683   : > { %5013 = vpow2.f32 %v2196_v35  ;;  %v6631_v35 = vrot.slane %v6272_v20, %v6605_v2  ;;  %v2601_v6 = vmul.f32 %v6611_v37, %v2574_v14  ;;  %v2631_v0 = vmul.f32 %v6575_v13, %v6447_v47 }
 0x684   : > { %5015 = vpow2.f32 %v2194_v43  ;;  %v6621_v43 = vpop.permute.xlu0 %2568  ;;  %v2615_v30 = vmul.f32 %v6573_v46, %v2599_v41  ;;  %v2633_v14 = vmul.f32 %v6575_v13, %v6451_v16  ;;  %v2705_v3 = vmul.f32 %v6591_v42, %v2689_v36  ;;  %v2649_v41 = vpop.permute.xlu1 %2648 }
 0x685   : > { %v2687_v20 = vmul.f32 %v6631_v35, %v2664_v55  ;;  %v2617_v28 = vmul.f32 %v6573_v46, %v2601_v6  ;;  %v2585_v16 = vrot.slane %v6323_v27, %v2584_v39  ;;  %v2580_v36 = vsel %vm1306_vm8, %v6581_v48, %v6577_v23 }
 0x686   : > { %v2639_v55 = vadd.f32 %v2631_v0, %v2615_v30  ;;  %v2576_v30 = vsel %vm1306_vm8, %v6579_v7, %v6585_v33  ;;  %v2579_v23 = vsel %vm1306_vm8, %v6601_v22, %v6623_v31  ;;  %v2575_v48 = vsel %vm1306_vm8, %v6621_v43, %v6647_v60 }
 0x687   : > { %v2641_v8 = vadd.f32 %v2633_v14, %v2617_v28  ;;  %v2666_v14 = vsel %vm1355_vm7, %v6589_v53, %v6595_v18  ;;  %v7366_v18 = vld [vmem:[#allocation28_spill] sm:$0xff] }
 0x688   : > { %v6645_v51 = vpop.permute.xlu0 %2743  ;;  %v2653_v54 = vpop.permute.xlu1 %2652 }
 0x689   : > { %v2713_v9 = vadd.f32 %v2705_v3, %v2641_v8  ;;  %v2593_v8 = vrot.slane %v6310_v63, %v2584_v39  ;;  %v2673_v39 = vrot.slane %v6323_v27, %v6605_v2  ;;  %v2598_v27 = vmul.f32 %v2585_v16, %v2580_v36 }
 0x68a   : > { %v2681_v3 = vrot.slane %v6310_v63, %v6605_v2  ;;  %v7367_v63 = vld [vmem:[#allocation30_spill] sm:$0xff]  ;;  %v2603_v2 = vmul.f32 %v6608_v25, %v2579_v23 }
 0x68b   : > { %v2600_v33 = vmul.f32 %v2593_v8, %v2576_v30  ;;  %v2686_v25 = vmul.f32 %v2673_v39, %v2666_v14  ;;  %v7371_v23 = vld [vmem:[#allocation34_spill] sm:$0xff] }
 0x68c   : > { %v6657_v19 = vpop.permute.xlu0 %2719  ;;  %v2661_v7 = vpop.permute.xlu1 %2660 }
 0x68d   : > { %v5014_v52 = vpop.eup %5013  ;;  %v2669_v53 = vsel %vm1355_vm7, %v2661_v7, %v2649_v41 }
 0x68e   : > { %v5016_v11 = vpop.eup %5015  ;;  %v2199_v24 = vadd.f32 1.0, %v5014_v52 }
 0x68f   : > { %v2198_v21 = vadd.f32 1.0, %v5016_v11  ;;  %v2703_v11 = vmul.f32 %v6591_v42, %v2687_v20 }
 0x691   : > { %5017 = vrcp.f32 %v2198_v21  ;;  %v2711_v6 = vadd.f32 %v2703_v11, %v2639_v55  ;;  %v2729_v21 = vadd.f32 %v6657_v19, %v2713_v9  ;;  %v2662_v11 = vsel %vm1355_vm7, %v6593_v15, %v6599_v34  ;;  %v2657_v55 = vpop.permute.xlu0 %2656 }
 0x692   : > { %5019 = vrcp.f32 %v2199_v24  ;;  %v2581_v34 = vsel %vm1306_vm8, %v6647_v60, %v6601_v22  ;;  %v2605_v15 = vmul.f32 %v6611_v37, %v2575_v48  ;;  %v2663_v60 = vsel %vm1355_vm7, %v2657_v55, %v2661_v7 }
 0x693   : > { %v2727_v52 = vadd.f32 %v6657_v19, %v2711_v6  ;;  %v2753_v28 = vmul.f32 %v6645_v51, %v2729_v21  ;;  %vm2737_vm1 = vcmp.ge.f32.partialorder %v2729_v21, 0.0  ;;  %v2577_v6 = vsel %vm1306_vm8, %v6623_v31, %v6621_v43  ;;  %v7368_v43 = vld [vmem:[#allocation29_spill] sm:$0xff]  ;;  %v7369_v31 = vld [vmem:[#allocation31_spill] sm:$0xff] }
 0x694   : > { %v2693_v37 = vmul.f32 %v6627_v57, %v2669_v53  ;;  %v2604_v30 = vmul.f32 %v2593_v8, %v2577_v6  ;;  %v2602_v36 = vmul.f32 %v2585_v16, %v2581_v34  ;;  %v2635_v57 = vmul.f32 %v6583_v4, %v6482_v1  ;;  %v7374_v1 = vld [vmem:[#allocation38_spill] sm:$0xff]  ;;  %v7376_v6 = vld [vmem:[#allocation39_spill] sm:$0xff] }
 0x695   : > { %v2751_v24 = vmul.f32 %v6645_v51, %v2727_v52  ;;  %vm2735_vm15 = vcmp.ge.f32.partialorder %v2727_v52, 0.0  ;;  %v6687_v0 = vsel %vm2737_vm1, %v2729_v21, %v2753_v28  ;;  %v2630_v21 = vmul.f32 %v6575_v13, %v6438_v49  ;;  %v7370_v49 = vld [vmem:[#allocation32_spill] sm:$0xff] }
 0x696   : > { %v2667_v28 = vsel %vm1355_vm7, %v2649_v41, %v2653_v54  ;;  %v7372_v41 = vld [vmem:[#allocation33_spill] sm:$0xff]  ;;  %v2692_v16 = vmul.f32 %v2681_v3, %v2663_v60  ;;  %v2637_v7 = vmul.f32 %v6583_v4, %v6488_v59  ;;  %v2709_v48 = vmul.f32 %v6597_v38, %v2693_v37 }
 0x697   : > { %v6685_v20 = vsel %vm2735_vm15, %v2727_v52, %v2751_v24  ;;  %v2665_v52 = vsel %vm1355_vm7, %v2653_v54, %v2657_v55  ;;  %v2616_v24 = vmul.f32 %v6573_v46, %v2600_v33  ;;  %v2621_v54 = vmul.f32 %v6587_v40, %v2605_v15  ;;  %v7375_v59 = vld [vmem:[#allocation37_spill] sm:$0xff] }
 0x698   : > { %v2691_v22 = vmul.f32 %v6631_v35, %v2665_v52  ;;  %v7373_v35 = vld [vmem:[#allocation35_spill] sm:$0xff]  ;;  %v2690_v8 = vmul.f32 %v2673_v39, %v2667_v28  ;;  %v2702_v33 = vmul.f32 %v6591_v42, %v2686_v25  ;;  %v2620_v14 = vmul.f32 %v6587_v40, %v2604_v30  ;;  %v2724_v25 = vpop.permute.xlu0 %2723  ;;  %v7377_v28 = vld [vmem:[#allocation40_spill] sm:$0xff]  ;;  %v7379_v60 = vld [vmem:[#allocation41_spill] sm:$0xff] }
 0x699   : > { %v2645_v55 = vadd.f32 %v2637_v7, %v2621_v54  ;;  %v2634_v52 = vmul.f32 %v6583_v4, %v6476_v56  ;;  %v7380_v56 = vld [vmem:[#allocation43_spill] sm:$0xff]  ;;  %v7383_v54 = vld [vmem:[#allocation45_spill] sm:$0xff] }
 0x69a   : > { %v2706_v53 = vmul.f32 %v6597_v38, %v2690_v8 }
 0x69b   : > { %v5018_v47 = vpop.eup %5017  ;;  %v2717_v15 = vadd.f32 %v2709_v48, %v2645_v55  ;;  %v7386_v48 = vld [vmem:[#allocation49_spill] sm:$0xff] }
 0x69c   : > { %4283 = vmatmul.mubr.msk.f32.vlgmr.msra.gmra.mrb[18].mxu0 %vm2106_vm13, %v5018_v47  ;;  %4287 = vmatmul.mubr.msk.f32.vlgmr.msra.gmra.mrb[18].mxu1 %vm2106_vm13, %v5018_v47  ;;  %v5020_v9 = vpop.eup %5019  ;;  %v2632_v47 = vmul.f32 %v6575_v13, %v6436_v58  ;;  %v2614_v58 = vmul.f32 %v6573_v46, %v2598_v27  ;;  %v2619_v13 = vmul.f32 %v6587_v40, %v2603_v2 }
 0x69d   : > { %4773 = vmatpush3.bf16.msra.mxu0 %v5955_v44  ;;  %4805 = vmatpush3.bf16.msra.mxu1 %v5972_v62  ;;  %v2707_v46 = vmul.f32 %v6597_v38, %v2691_v22  ;;  %v7378_v22 = vld [vmem:[#allocation42_spill] sm:$0xff]  ;;  %v2733_v30 = vadd.f32 %v2724_v25, %v2717_v15 }
 0x69e   : > { %2306 = vmatprep.mubr.f32.mxu0 %v7294_v26  ;;  %2383 = vmatprep.mubr.f32.mxu1 %v7294_v26  ;;  %v2640_v32 = vadd.f32 %v2632_v47, %v2616_v24  ;;  %v2638_v39 = vadd.f32 %v2630_v21, %v2614_v58  ;;  %v7381_v58 = vld [vmem:[#allocation44_spill] sm:$0xff] }
 0x69f   : > { %4775 = vmatprep.subr.bf16.mxu0 %v5964_v45  ;;  %4807 = vmatprep.subr.bf16.mxu1 %v5982_v29  ;;  %vm2741_vm4 = vcmp.ge.f32.partialorder %v2733_v30, 0.0 }
 0x6a0   : > { %4284 = vmatmul.mubr.msk.f32.gmra.mrb[20].mxu0 %vm2106_vm13, %v5020_v9  ;;  %4288 = vmatmul.mubr.msk.f32.gmra.mrb[20].mxu1 %vm2106_vm13, %v5020_v9  ;;  %v2688_v9 = vmul.f32 %v2681_v3, %v2662_v11  ;;  %v2618_v11 = vmul.f32 %v6587_v40, %v2602_v36  ;;  %v2643_v3 = vadd.f32 %v2635_v57, %v2619_v13  ;;  %v2748_v36 = vpop.permute.xlu1 %2747  ;;  %v7382_v13 = vld [vmem:[#allocation46_spill] sm:$0xff] }
 0x6a1   : > { %4777 = vmatpush3.bf16.msra.mxu0 %v5991_v10  ;;  %4809 = vmatpush3.bf16.msra.mxu1 %v6010_v17  ;;  %v2708_v40 = vmul.f32 %v6597_v38, %v2692_v16  ;;  %v2710_v2 = vadd.f32 %v2702_v33, %v2638_v39  ;;  %v2757_v33 = vmul.f32 %v2748_v36, %v2733_v30 }
 0x6a2   : > { %2833 = vmatprep.mubr.f32.mxu0 %v6685_v20  ;;  %2908 = vmatprep.mubr.f32.mxu1 %v6687_v0  ;;  %v2704_v27 = vmul.f32 %v6591_v42, %v2688_v9  ;;  %v2636_v42 = vmul.f32 %v6583_v4, %v6464_v61  ;;  %v2715_v34 = vadd.f32 %v2707_v46, %v2643_v3  ;;  %v7385_v46 = vld [vmem:[#allocation48_spill] sm:$0xff] }
 0x6a3   : > { %4779 = vmatprep.subr.bf16.mxu0 %v6001_v12  ;;  %4811 = vmatprep.subr.bf16.mxu1 %v6023_v5  ;;  %v2642_v24 = vadd.f32 %v2634_v52, %v2618_v11  ;;  %v2726_v61 = vadd.f32 %v6657_v19, %v2710_v2  ;;  %v6792_v55 = vsel %vm2741_vm4, %v2733_v30, %v2757_v33 }
 0x6a4   : > { %v2712_v21 = vadd.f32 %v2704_v27, %v2640_v32  ;;  %v2644_v47 = vadd.f32 %v2636_v42, %v2620_v14  ;;  %v2731_v9 = vadd.f32 %v2724_v25, %v2715_v34  ;;  %v7384_v32 = vld [vmem:[#allocation47_spill] sm:$0xff]  ;;  %v7387_v27 = vmov 0.0|0.0  }
 0x6a5   : > { %4781 = vmatpush3.bf16.msra.mxu0 %v7366_v18  ;;  %4813 = vmatpush3.bf16.msra.mxu1 %v7367_v63  ;;  %v2714_v38 = vadd.f32 %v2706_v53, %v2642_v24  ;;  %v2750_v16 = vmul.f32 %v6645_v51, %v2726_v61  ;;  %vm2734_vm8 = vcmp.ge.f32.partialorder %v2726_v61, 0.0 }
 0x6a6   : > { %4783 = vmatprep.subr.bf16.mxu0 %v7368_v43  ;;  %4815 = vmatprep.subr.bf16.mxu1 %v7369_v31  ;;  %v2728_v4 = vadd.f32 %v6657_v19, %v2712_v21  ;;  %v2716_v37 = vadd.f32 %v2708_v40, %v2644_v47  ;;  %v2755_v19 = vmul.f32 %v2748_v36, %v2731_v9  ;;  %vm2739_vm2 = vcmp.ge.f32.partialorder %v2731_v9, 0.0 }
 0x6a7   : > { %v2730_v57 = vadd.f32 %v2724_v25, %v2714_v38  ;;  %v6784_v39 = vsel %vm2734_vm8, %v2726_v61, %v2750_v16 }
 0x6a8   : > { %v2732_v8 = vadd.f32 %v2724_v25, %v2716_v37  ;;  %v2752_v7 = vmul.f32 %v6645_v51, %v2728_v4  ;;  %vm2736_vm7 = vcmp.ge.f32.partialorder %v2728_v4, 0.0  ;;  %v6790_v51 = vsel %vm2739_vm2, %v2731_v9, %v2755_v19 }
 0x6a9   : > { %4785 = vmatpush3.bf16.msra.mxu0 %v7370_v49  ;;  %4817 = vmatpush3.bf16.msra.mxu1 %v7371_v23  ;;  %v2754_v14 = vmul.f32 %v2748_v36, %v2730_v57  ;;  %vm2738_vm5 = vcmp.ge.f32.partialorder %v2730_v57, 0.0 }
 0x6aa   : > { %4787 = vmatprep.subr.bf16.mxu0 %v7372_v41  ;;  %4819 = vmatprep.subr.bf16.mxu1 %v7373_v35  ;;  %v2756_v11 = vmul.f32 %v2748_v36, %v2732_v8  ;;  %v6786_v3 = vsel %vm2736_vm7, %v2728_v4, %v2752_v7  ;;  %vm2740_vm6 = vcmp.ge.f32.partialorder %v2732_v8, 0.0 }
 0x6ab   : > { %v6796_v52 = vsel %vm2738_vm5, %v2730_v57, %v2754_v14 }
 0x6ac   : > { %v6798_v42 = vsel %vm2740_vm6, %v2732_v8, %v2756_v11  ;;  %v2766_v11 = vld [vmem:[%s7149_s13] sm:$0x3] }
 0x6ad   : > { %4789 = vmatpush3.bf16.msra.mxu0 %v6131_v50  ;;  %4821 = vmatpush3.bf16.msra.mxu1 %v7374_v1  ;;  %v7403_v1 = vld [vmem:[#allocation52_spill] sm:$0xff] }
 0x6ae   : > { %4791 = vmatprep.subr.bf16.mxu0 %v7375_v59  ;;  %4823 = vmatprep.subr.bf16.mxu1 %v7376_v6  ;;  %v7402_v6 = vld [vmem:[#allocation53_spill] sm:$0xff] }
 0x6b1   : > { %4793 = vmatpush3.bf16.msra.mxu0 %v7377_v28  ;;  %4825 = vmatpush3.bf16.msra.mxu1 %v7378_v22 }
 0x6b2   : > { %4795 = vmatprep.subr.bf16.mxu0 %v7379_v60  ;;  %4827 = vmatprep.subr.bf16.mxu1 %v7380_v56 }
 0x6b5   : > { %4797 = vmatpush3.bf16.msra.mxu0 %v7381_v58  ;;  %4829 = vmatpush3.bf16.msra.mxu1 %v7382_v13 }
 0x6b6   : > { %4799 = vmatprep.subr.bf16.mxu0 %v7383_v54  ;;  %4831 = vmatprep.subr.bf16.mxu1 %v7384_v32 }
 0x6b9   : > { %4801 = vmatpush3.bf16.msra.mxu0 %v7385_v46  ;;  %4833 = vmatpush3.bf16.msra.mxu1 %v7386_v48  ;;  %v7401_v46 = vld [vmem:[#allocation20_spill] sm:$0xff] }
 0x6ba   : > { %4834 = vmatprep.subr.bf16.mxu0 %v7387_v27  ;;  %v7388_v27 = vld [vmem:[#allocation9_spill] sm:$0xff] }
 0x6bc   : > { %2834 = vmatmul.mubr.f32.vlgmr.msra.gmra.mrb[22].mxu0 %v6784_v39  ;;  %2909 = vmatmul.mubr.f32.vlgmr.msra.gmra.mrb[22].mxu1 %v6786_v3 }
 0x6bd   : > { %2838 = vmatprep.mubr.f32.mxu0 %v6790_v51  ;;  %2913 = vmatprep.mubr.f32.mxu1 %v6792_v55 }
 0x6c0   : > { %2839 = vmatmul.mubr.f32.gmra.mrb[24].mxu0 %v6796_v52  ;;  %2914 = vmatmul.mubr.f32.gmra.mrb[24].mxu1 %v6798_v42 }
 0x6c1   : > { %4612 = vmatprep.mubr.msk.f32.mxu0 %vm5111_vm11, %v7294_v26 }
 0x76f   : > { %v6804_v53 = vpop.f32.mrb[18].mxu0  ;;  %v6806_v40 = vpop.f32.mrb[18].mxu1 }
 0x770   : > { %v6808_v2 = vpop.f32.mrb[19].mxu0  ;;  %v6810_v34 = vpop.f32.mrb[19].mxu1  ;;  %v2390_v59 = vmul.f32 %v6804_v53, %v7402_v6  ;;  %v2392_v50 = vmul.f32 %v6806_v40, %v7403_v1  ;;  %v7406_v53 = vld [vmem:[#allocation16_spill] sm:$0xff]  ;;  %v7407_v40 = vld [vmem:[#allocation18_spill] sm:$0xff] }
 0x773   : > { %v6812_v15 = vpop.f32.mrb[20].mxu0  ;;  %v6814_v21 = vpop.f32.mrb[20].mxu1 }
 0x774   : > { %v6816_v47 = vpop.f32.mrb[21].mxu0  ;;  %v6818_v24 = vpop.f32.mrb[21].mxu1  ;;  %v2394_v1 = vmul.f32 %v6812_v15, %v7406_v53 }
 0x78f   : > { %v4448_v25 = vpop.f32.mrb[22].mxu0  ;;  %v4486_v61 = vpop.f32.mrb[22].mxu1 }
 0x790   : > { %v4449_v4 = vpop.f32.mrb[23].mxu0  ;;  %v4487_v38 = vpop.f32.mrb[23].mxu1 }
 0x791   : > { %v4450_v37 = vadd.f32 %v4449_v4, %v4448_v25  ;;  %v4488_v9 = vadd.f32 %v4487_v38, %v4486_v61  ;;  %v7389_v25 = vld [vmem:[#allocation8_spill] sm:$0xff] }
 0x792   : > { %v2767_v61 = vld [vmem:[%s7150_s14] sm:$0xff] }
 0x793   : > { %v2911_v30 = vadd.f32 %v4488_v9, %v4450_v37  ;;  %v4451_v36 = vpop.f32.mrb[24].mxu0  ;;  %v4489_v57 = vpop.f32.mrb[24].mxu1  ;;  %4617 = vmatprep.mubr.msk.f32.mxu1 %vm2106_vm13, %v2767_v61  ;;  %v2768_v9 = vld [vmem:[%s7150_s14 + $0x8] sm:$0xff] }
 0x794   : > { %v4452_v8 = vpop.f32.mrb[25].mxu0  ;;  %v4490_v16 = vpop.f32.mrb[25].mxu1 }
 0x795   : > { %v4453_v7 = vadd.f32 %v4452_v8, %v4451_v36  ;;  %v4491_v19 = vadd.f32 %v4490_v16, %v4489_v57  ;;  %v7391_v36 = vld [vmem:[#allocation11_spill] sm:$0xff]  ;;  %v5113_v57 = vmov 12   ;;  %v7392_v8 = vld [vmem:[#allocation6_spill] sm:$0xff]  ;;  %v7393_v16 = vld [vmem:[#allocation4_spill] sm:$0xff] }
 0x796   : > { %5007 = vset.pattern.permute.xlu1 %v5113_v57  ;;  %5006 = vset.pattern.permute.xlu0 %v5113_v57 }
 0x797   : > { %v2916_v33 = vadd.f32 %v4491_v19, %v4453_v7  ;;  %3278 = vperm.xlu1 %5007, %v7392_v8   ;;  %3274 = vperm.xlu0 %5006, %v7393_v16   ;;  %v5114_v7 = vmov 13   ;;  %v5115_v19 = vmov 14  }
 0x799   : > { %v4835_v14 = vpack.c.bf16 %v2916_v33, %v2911_v30  ;;  %v7390_v30 = vld [vmem:[#allocation10_spill] sm:$0xff] }
 0x79b   : > { %4836 = vmatpush3.bf16.msra.mxu0 %v4835_v14  ;;  %5008 = vset.pattern.permute.xlu1 %v5114_v7 }
 0x79c   : > { %4293 = vmatprep.subr.msk.mxu0 %vm2113_vm14, %v7388_v27  ;;  %5009 = vset.pattern.permute.xlu0 %v5114_v7  ;;  %v7400_v27 = vld [vmem:[#allocation25_spill] sm:$0xff] }
 0x79d   : > { %3290 = vperm.xlu1 %5008, %v7393_v16   ;;  %3294 = vperm.xlu0 %5009, %v7392_v8  }
 0x79e   : > { %4613 = vmatmul.mubr.msk.f32.vlgmr.msra.gmra.mrb[26].mxu0 %vm2031_vm12, %v2766_v11 }
 0x79f   : > { %4294 = vmatpush1.msk.msra.mxu0 %vm2113_vm14, %v7389_v25  ;;  %3159 = vmatprep.mubr.f32.mxu0 %v7294_v26  ;;  %v7399_v25 = vld [vmem:[#allocation7_spill] sm:$0xff] }
 0x7a1   : > { %5010 = vset.pattern.permute.xlu1 %v5115_v19  ;;  %5011 = vset.pattern.permute.xlu0 %v5115_v19 }
 0x7a2   : > { %3314 = vperm.xlu1 %5010, %v7393_v16   ;;  %v1390_v16 = vpop.permute.xlu1 %1389 }
 0x7a3   : > { %v1546_v48 = vadd.f32 %v7400_v27, %v1390_v16  ;;  %v1548_v32 = vadd.f32 %v7401_v46, %v1390_v16 }
 0x7a5   : > { %vm1558_vm8 = vcmp.ge.f32.partialorder %v1546_v48, 0.0  ;;  %vm1559_vm2 = vcmp.ge.f32.partialorder %v1548_v32, 0.0 }
 0x7a6   : > { %3318 = vperm.xlu1 %5010, %v7392_v8   ;;  %v1566_v19 = vpop.permute.xlu1 %1565 }
 0x7a7   : > { %v1574_v58 = vmul.f32 %v1566_v19, %v1546_v48  ;;  %v1575_v56 = vmul.f32 %v1566_v19, %v1548_v32 }
 0x7a9   : > { %v1582_v46 = vsel %vm1558_vm8, %v1546_v48, %v1574_v58 }
 0x871   : > { %v2988_v4 = vpop.f32.mrb[26].mxu0 }
 0x872   : > { %v2992_v38 = vmax.f32 %v2988_v4, 0.0  ;;  %v4614_v37 = vpop.f32.mrb[27].mxu0 }
 0x874   : > { %4615 = vmatprep.subr.msk.mxu1 %vm2113_vm14, %v2992_v38 }
 0x875   : > { %4616 = vmatpush3.msk.msra.mxu1 %vm2113_vm14, %v2992_v38 }
 0x876   : > { %4618 = vmatmul.mubr.msk.f32.vlgmr.msra.gmra.mrb[26].mxu1 %vm2106_vm13, %v2768_v9  ;;  %4297 = vmatprep.subr.msk.mxu1 %vm2113_vm14, %v7390_v30 }
 0x877   : > { %4298 = vmatpush1.msk.msra.mxu1 %vm2113_vm14, %v7391_v36  ;;  %3236 = vmatprep.mubr.f32.mxu1 %v7294_v26 }
 0x949   : > { %v4619_v33 = vpop.f32.mrb[26].mxu1 }
 0x94a   : > { %v3078_v14 = vsub.f32 0.0, %v4619_v33  ;;  %v3068_v11 = vpop.f32.mrb[27].mxu1  ;;  %v1394_v33 = vpop.permute.xlu0 %1393 }
 0x94b   : > { %v3077_v61 = vsub.f32 0.0, %v3068_v11 }
 0x94c   : > { %v3081_v4 = vmul.f32 1.442695, %v3078_v14  ;;  %v7394_v14 = vld [vmem:[#allocation12_spill] sm:$0xff] }
 0x94d   : > { %v3079_v38 = vmul.f32 1.442695, %v3077_v61  ;;  %v1475_v11 = vadd.f32 %v7394_v14, %v1394_v33  ;;  %v7395_v61 = vld [vmem:[#allocation17_spill] sm:$0xff] }
 0x94e   : > { %5021 = vpow2.f32 %v3081_v4  ;;  %v7396_v4 = vld [vmem:[#allocation14_spill] sm:$0xff] }
 0x94f   : > { %5023 = vpow2.f32 %v3079_v38  ;;  %v1552_v38 = vadd.f32 %v7396_v4, %v1394_v33  ;;  %vm1560_vm3 = vcmp.ge.f32.partialorder %v1475_v11, 0.0 }
 0x951   : > { %vm1562_vm9 = vcmp.ge.f32.partialorder %v1552_v38, 0.0 }
 0x958   : > { %v5022_v37 = vpop.eup %5021 }
 0x959   : > { %v5024_v9 = vpop.eup %5023  ;;  %v3084_v7 = vadd.f32 1.0, %v5022_v37  ;;  %v7397_v37 = vld [vmem:[#allocation15_spill] sm:$0xff] }
 0x95a   : > { %v3083_v57 = vadd.f32 1.0, %v5024_v9  ;;  %v1554_v9 = vadd.f32 %v7397_v37, %v1394_v33 }
 0x95c   : > { %5025 = vrcp.f32 %v3083_v57  ;;  %v1570_v57 = vpop.permute.xlu1 %1569  ;;  %vm1563_vm15 = vcmp.ge.f32.partialorder %v1554_v9, 0.0 }
 0x95d   : > { %5027 = vrcp.f32 %v3084_v7  ;;  %v7398_v7 = vld [vmem:[#allocation5_spill] sm:$0xff]  ;;  %v1576_v14 = vmul.f32 %v1570_v57, %v1475_v11  ;;  %v1579_v22 = vmul.f32 %v1570_v57, %v1554_v9 }
 0x95e   : > { %v1469_v30 = vadd.f32 %v7398_v7, %v1390_v16 }
 0x95f   : > { %v1584_v37 = vsel %vm1560_vm3, %v1475_v11, %v1576_v14  ;;  %v3275_v11 = vpop.permute.xlu0 %3274 }
 0x960   : > { %v1572_v54 = vmul.f32 %v1566_v19, %v1469_v30  ;;  %v6866_v4 = vpop.permute.xlu1 %3278  ;;  %vm1556_vm1 = vcmp.ge.f32.partialorder %v1469_v30, 0.0 }
 0x962   : > { %v1580_v27 = vsel %vm1556_vm1, %v1469_v30, %v1572_v54 }
 0x964   : > { %v3291_v6 = vpop.permute.xlu1 %3290 }
 0x966   : > { %v5026_v36 = vpop.eup %5025 }
 0x967   : > { %4295 = vmatmul.mubr.msk.f32.vlgmr.msra.gmra.mrb[28].mxu0 %vm2106_vm13, %v5026_v36  ;;  %4299 = vmatmul.mubr.msk.f32.vlgmr.msra.gmra.mrb[28].mxu1 %vm2106_vm13, %v5026_v36  ;;  %v5028_v8 = vpop.eup %5027  ;;  %v1477_v36 = vadd.f32 %v7395_v61, %v1394_v33  ;;  %v1578_v61 = vmul.f32 %v1570_v57, %v1552_v38 }
 0x968   : > { %3165 = vmatprep.mubr.f32.mxu0 %v7294_v26  ;;  %3242 = vmatprep.mubr.f32.mxu1 %v7294_v26 }
 0x969   : > { %v1577_v60 = vmul.f32 %v1570_v57, %v1477_v36  ;;  %vm1561_vm10 = vcmp.ge.f32.partialorder %v1477_v36, 0.0  ;;  %v1586_v7 = vsel %vm1562_vm9, %v1552_v38, %v1578_v61  ;;  %v1587_v57 = vsel %vm1563_vm15, %v1554_v9, %v1579_v22  ;;  %v7409_v38 = vld [vmem:[#allocation22_spill] sm:$0xff] }
 0x96b   : > { %4296 = vmatmul.mubr.msk.f32.gmra.mrb[30].mxu0 %vm2106_vm13, %v5028_v8  ;;  %4300 = vmatmul.mubr.msk.f32.gmra.mrb[30].mxu1 %vm2106_vm13, %v5028_v8  ;;  %v1471_v8 = vadd.f32 %v7399_v25, %v1390_v16  ;;  %v1583_v16 = vsel %vm1559_vm2, %v1548_v32, %v1575_v56  ;;  %v1585_v28 = vsel %vm1561_vm10, %v1477_v36, %v1577_v60  ;;  %v7405_v32 = vld [vmem:[#allocation51_spill] sm:$0xff]  ;;  %v7408_v36 = vld [vmem:[#allocation13_spill] sm:$0xff] }
 0x96c   : > { %3417 = vmatprep.mubr.f32.mxu0 %v7294_v26  ;;  %3506 = vmatprep.mubr.f32.mxu1 %v7294_v26  ;;  %v2393_v48 = vmul.f32 %v6810_v34, %v7405_v32  ;;  %v2397_v34 = vmul.f32 %v6818_v24, %v7409_v38  ;;  %v3315_v32 = vpop.permute.xlu1 %3314 }
 0x96d   : > { %v1573_v13 = vmul.f32 %v1566_v19, %v1471_v8  ;;  %vm1557_vm7 = vcmp.ge.f32.partialorder %v1471_v8, 0.0 }
 0x96f   : > { %v1581_v25 = vsel %vm1557_vm7, %v1471_v8, %v1573_v13  ;;  %v7404_v13 = vld [vmem:[#allocation50_spill] sm:$0xff] }
 0x970   : > { %v2391_v56 = vmul.f32 %v6808_v2, %v7404_v13  ;;  %v2395_v2 = vmul.f32 %v6816_v47, %v7408_v36 }
 0xa3a   : > { %v3161_v33 = vpop.f32.mrb[28].mxu0  ;;  %v3238_v19 = vpop.f32.mrb[28].mxu1 }
 0xa3b   : > { %v3249_v35 = vmul.f32 %v3161_v33, %v6784_v39  ;;  %v3251_v41 = vmul.f32 %v3238_v19, %v6786_v3  ;;  %v3163_v54 = vpop.f32.mrb[29].mxu0  ;;  %v3240_v58 = vpop.f32.mrb[29].mxu1  ;;  %v2396_v39 = vmul.f32 %v6814_v21, %v7407_v40 }
 0xa3c   : > { %v3250_v22 = vmul.f32 %v3163_v54, %v6685_v20  ;;  %v3252_v60 = vmul.f32 %v3240_v58, %v6687_v0 }
 0xa3d   : > { %v3257_v3 = vadd.f32 %v3249_v35, %v2390_v59  ;;  %v3259_v30 = vadd.f32 %v3251_v41, %v2392_v50 }
 0xa3e   : > { %v3258_v9 = vadd.f32 %v3250_v22, %v2391_v56  ;;  %v3260_v20 = vadd.f32 %v3252_v60, %v2393_v48  ;;  %v3167_v8 = vpop.f32.mrb[30].mxu0  ;;  %v3244_v0 = vpop.f32.mrb[30].mxu1 }
 0xa3f   : > { %v3265_v14 = vadd.f32 %v3257_v3, %v1580_v27  ;;  %v3267_v61 = vadd.f32 %v3259_v30, %v1582_v46  ;;  %v3253_v15 = vmul.f32 %v3167_v8, %v6796_v52  ;;  %v3255_v33 = vmul.f32 %v3244_v0, %v6798_v42  ;;  %v3169_v21 = vpop.f32.mrb[31].mxu0  ;;  %v3246_v35 = vpop.f32.mrb[31].mxu1 }
 0xa40   : > { %v3266_v50 = vadd.f32 %v3258_v9, %v1581_v25  ;;  %v3268_v41 = vadd.f32 %v3260_v20, %v1583_v16  ;;  %v3254_v59 = vmul.f32 %v3169_v21, %v6790_v51  ;;  %v3256_v47 = vmul.f32 %v3246_v35, %v6792_v55  ;;  %v3295_v51 = vpop.permute.xlu0 %3294 }
 0xa41   : > { %v3261_v19 = vadd.f32 %v3253_v15, %v2394_v1  ;;  %v3263_v24 = vadd.f32 %v3255_v33, %v2396_v39  ;;  %v3281_v54 = vmul.f32 %v3275_v11, %v3265_v14  ;;  %v3283_v58 = vmul.f32 %v3275_v11, %v3267_v61 }
 0xa42   : > { %v3262_v13 = vadd.f32 %v3254_v59, %v2395_v2  ;;  %v3264_v56 = vadd.f32 %v3256_v47, %v2397_v34  ;;  %v3282_v27 = vmul.f32 %v3275_v11, %v3266_v50  ;;  %v3284_v46 = vmul.f32 %v3275_v11, %v3268_v41  ;;  %v3337_v59 = vld [vmem:[%s7146_s10] sm:$0xff]  ;;  %v7410_v47 = vld [vmem:[#allocation26_spill] sm:$0xff] }
 0xa43   : > { %v3269_v52 = vadd.f32 %v3261_v19, %v1584_v37  ;;  %v3271_v48 = vadd.f32 %v3263_v24, %v1586_v7  ;;  %v3297_v42 = vadd.f32 %v3291_v6, %v3281_v54  ;;  %v3299_v22 = vadd.f32 %v3291_v6, %v3283_v58  ;;  %v7411_v19 = vld [vmem:[#allocation27_spill] sm:$0xff]  ;;  %v3338_v24 = vld [vmem:[%s7146_s10 + $0x8] sm:$0xff]  ;;  %v3339_v54 = vld [vmem:[%s7146_s10 + $0x10] sm:$0xff] }
 0xa44   : > { %v3270_v60 = vadd.f32 %v3262_v13, %v1585_v28  ;;  %v3272_v25 = vadd.f32 %v3264_v56, %v1587_v57  ;;  %v3298_v16 = vadd.f32 %v3291_v6, %v3282_v27  ;;  %v3300_v53 = vadd.f32 %v3291_v6, %v3284_v46  ;;  %v3319_v28 = vpop.permute.xlu1 %3318  ;;  %v7425_v58 = vld [vmem:[#allocation47_spill] sm:$0xff]  ;;  %v7426_v13 = vld [vmem:[#allocation48_spill] sm:$0xff]  ;;  %v7427_v56 = vld [vmem:[#allocation49_spill] sm:$0xff] }
 0xa45   : > { %v3321_v40 = vmul.f32 %v3315_v32, %v3297_v42  ;;  %v3323_v55 = vmul.f32 %v3315_v32, %v3299_v22  ;;  %v3285_v1 = vmul.f32 %v6866_v4, %v3269_v52  ;;  %v3287_v39 = vmul.f32 %v6866_v4, %v3271_v48 }
 0xa46   : > { %v3322_v3 = vmul.f32 %v3315_v32, %v3298_v16  ;;  %v3324_v30 = vmul.f32 %v3315_v32, %v3300_v53  ;;  %v3286_v11 = vmul.f32 %v6866_v4, %v3270_v60  ;;  %v3288_v37 = vmul.f32 %v6866_v4, %v3272_v25 }
 0xa47   : > { %v3301_v7 = vadd.f32 %v3295_v51, %v3285_v1  ;;  %v3303_v36 = vadd.f32 %v3295_v51, %v3287_v39  ;;  %vm3306_vm4 = vcmp.ge.f32.partialorder %v3298_v16, 0.0  ;;  %vm3308_vm5 = vcmp.ge.f32.partialorder %v3300_v53, 0.0 }
 0xa48   : > { %v3302_v57 = vadd.f32 %v3295_v51, %v3286_v11  ;;  %v3304_v6 = vadd.f32 %v3295_v51, %v3288_v37  ;;  %v3330_v2 = vsel %vm3306_vm4, %v3298_v16, %v3322_v3  ;;  %v3332_v38 = vsel %vm3308_vm5, %v3300_v53, %v3324_v30 }
 0xa49   : > { %vm3309_vm6 = vcmp.ge.f32.partialorder %v3301_v7, 0.0  ;;  %vm3311_vm3 = vcmp.ge.f32.partialorder %v3303_v36, 0.0  ;;  %v3325_v34 = vmul.f32 %v3319_v28, %v3301_v7  ;;  %v3327_v9 = vmul.f32 %v3319_v28, %v3303_v36 }
 0xa4a   : > { %v3326_v20 = vmul.f32 %v3319_v28, %v3302_v57  ;;  %v3328_v8 = vmul.f32 %v3319_v28, %v3304_v6  ;;  %vm3310_vm9 = vcmp.ge.f32.partialorder %v3302_v57, 0.0  ;;  %vm3312_vm10 = vcmp.ge.f32.partialorder %v3304_v6, 0.0 }
 0xa4b   : > { %v3333_v0 = vsel %vm3309_vm6, %v3301_v7, %v3325_v34  ;;  %v3335_v14 = vsel %vm3311_vm3, %v3303_v36, %v3327_v9  ;;  %vm3305_vm15 = vcmp.ge.f32.partialorder %v3297_v42, 0.0  ;;  %vm3307_vm1 = vcmp.ge.f32.partialorder %v3299_v22, 0.0 }
 0xa4c   : > { %v3334_v4 = vsel %vm3310_vm9, %v3302_v57, %v3326_v20  ;;  %v3336_v61 = vsel %vm3312_vm10, %v3304_v6, %v3328_v8  ;;  %v3329_v15 = vsel %vm3305_vm15, %v3297_v42, %v3321_v40  ;;  %v3331_v33 = vsel %vm3307_vm1, %v3299_v22, %v3323_v55 }
 0xa4d   : > { %v4837_v21 = vpack.c.bf16 %v3334_v4, %v3330_v2  ;;  %v4841_v35 = vpack.c.bf16 %v3336_v61, %v3332_v38  ;;  %v4839_v50 = vpack.c.bf16 %v3333_v0, %v3329_v15  ;;  %v4843_v41 = vpack.c.bf16 %v3335_v14, %v3331_v33 }
 0xa4e   : > { %v7428_v27 = vmov 0.0|0.0  }
 0xa4f   : > { %4838 = vmatprep.subr.bf16.mxu0 %v4837_v21  ;;  %4842 = vmatprep.subr.bf16.mxu1 %v4841_v35 }
 0xa50   : > { %4840 = vmatpush1.bf16.msra.mxu0 %v4839_v50  ;;  %4844 = vmatpush1.bf16.msra.mxu1 %v4843_v41 }
 0xa51   : > { %4846 = vmatprep.subr.bf16.mxu0 %v7410_v47  ;;  %4878 = vmatprep.subr.bf16.mxu1 %v7411_v19 }
 0xa53   : > { %4301 = vmatmul.mubr.msk.f32.vlgmr.msra.gmra.mrb[32].mxu0 %vm2031_vm12, %v3337_v59  ;;  %4305 = vmatmul.mubr.msk.f32.vlgmr.msra.gmra.mrb[32].mxu1 %vm2031_vm12, %v3337_v59 }
 0xa54   : > { %3423 = vmatprep.mubr.f32.mxu0 %v7294_v26  ;;  %3512 = vmatprep.mubr.f32.mxu1 %v7294_v26 }
 0xa55   : > { %4848 = vmatpush3.bf16.msra.mxu0 %v5955_v44  ;;  %4880 = vmatpush3.bf16.msra.mxu1 %v5972_v62  ;;  %v3340_v44 = vld [vmem:[%s7146_s10 + $0x18] sm:$0xff] }
 0xa56   : > { %4850 = vmatprep.subr.bf16.mxu0 %v5964_v45  ;;  %4882 = vmatprep.subr.bf16.mxu1 %v5982_v29  ;;  %v7412_v45 = vld [vmem:[#allocation33_spill] sm:$0xff]  ;;  %v7413_v62 = vld [vmem:[#allocation35_spill] sm:$0xff]  ;;  %v7414_v29 = vld [vmem:[#allocation36_spill] sm:$0xff] }
 0xa57   : > { %4302 = vmatmul.mubr.msk.f32.gmra.mrb[34].mxu0 %vm2031_vm12, %v3338_v24  ;;  %4306 = vmatmul.mubr.msk.f32.gmra.mrb[34].mxu1 %vm2031_vm12, %v3338_v24 }
 0xa58   : > { %3429 = vmatprep.mubr.f32.mxu0 %v7294_v26  ;;  %3518 = vmatprep.mubr.f32.mxu1 %v7294_v26 }
 0xa59   : > { %4852 = vmatpush3.bf16.msra.mxu0 %v5991_v10  ;;  %4884 = vmatpush3.bf16.msra.mxu1 %v6010_v17  ;;  %v7415_v10 = vld [vmem:[#allocation38_spill] sm:$0xff]  ;;  %v7417_v17 = vld [vmem:[#allocation39_spill] sm:$0xff] }
 0xa5a   : > { %4854 = vmatprep.subr.bf16.mxu0 %v6001_v12  ;;  %4886 = vmatprep.subr.bf16.mxu1 %v6023_v5  ;;  %v7416_v12 = vld [vmem:[#allocation37_spill] sm:$0xff]  ;;  %v7418_v5 = vld [vmem:[#allocation40_spill] sm:$0xff] }
 0xa5b   : > { %4303 = vmatmul.mubr.msk.f32.gmra.mrb[36].mxu0 %vm2031_vm12, %v3339_v54  ;;  %4307 = vmatmul.mubr.msk.f32.gmra.mrb[36].mxu1 %vm2031_vm12, %v3339_v54 }
 0xa5c   : > { %3435 = vmatprep.mubr.f32.mxu0 %v7294_v26  ;;  %3524 = vmatprep.mubr.f32.mxu1 %v7294_v26 }
 0xa5d   : > { %4856 = vmatpush3.bf16.msra.mxu0 %v7366_v18  ;;  %4888 = vmatpush3.bf16.msra.mxu1 %v7367_v63  ;;  %v7419_v18 = vld [vmem:[#allocation42_spill] sm:$0xff]  ;;  %v7420_v63 = vld [vmem:[#allocation41_spill] sm:$0xff] }
 0xa5e   : > { %4858 = vmatprep.subr.bf16.mxu0 %v7368_v43  ;;  %4890 = vmatprep.subr.bf16.mxu1 %v7369_v31  ;;  %v7421_v43 = vld [vmem:[#allocation43_spill] sm:$0xff]  ;;  %v7422_v31 = vld [vmem:[#allocation44_spill] sm:$0xff] }
 0xa5f   : > { %4304 = vmatmul.mubr.msk.f32.gmra.mrb[38].mxu0 %vm2031_vm12, %v3340_v44  ;;  %4308 = vmatmul.mubr.msk.f32.gmra.mrb[38].mxu1 %vm2031_vm12, %v3340_v44 }
 0xa61   : > { %4860 = vmatpush3.bf16.msra.mxu0 %v7370_v49  ;;  %4892 = vmatpush3.bf16.msra.mxu1 %v7371_v23  ;;  %v7423_v49 = vld [vmem:[#allocation46_spill] sm:$0xff]  ;;  %v7424_v23 = vld [vmem:[#allocation45_spill] sm:$0xff] }
 0xa62   : > { %4862 = vmatprep.subr.bf16.mxu0 %v7412_v45  ;;  %4894 = vmatprep.subr.bf16.mxu1 %v7413_v62  ;;  %v3531_v45 = vld [vmem:[%s7151_s15] sm:$0x3]  ;;  %v7429_v62 = vld [vmem:[#allocation9_spill] sm:$0xff] }
 0xa65   : > { %4864 = vmatpush3.bf16.msra.mxu0 %v7414_v29  ;;  %4896 = vmatpush3.bf16.msra.mxu1 %v7415_v10  ;;  %v7430_v29 = vld [vmem:[#allocation8_spill] sm:$0xff] }
 0xa66   : > { %4866 = vmatprep.subr.bf16.mxu0 %v7416_v12  ;;  %4898 = vmatprep.subr.bf16.mxu1 %v7417_v17  ;;  %v3532_v10 = vld [vmem:[%s7152_s16] sm:$0xff] }
 0xa69   : > { %4868 = vmatpush3.bf16.msra.mxu0 %v7418_v5  ;;  %4900 = vmatpush3.bf16.msra.mxu1 %v7419_v18  ;;  %v3533_v18 = vld [vmem:[%s7152_s16 + $0x8] sm:$0xff] }
 0xa6a   : > { %4870 = vmatprep.subr.bf16.mxu0 %v7420_v63  ;;  %4902 = vmatprep.subr.bf16.mxu1 %v7421_v43  ;;  %v3534_v63 = vld [vmem:[%s7152_s16 + $0x10] sm:$0xff] }
 0xa6b   : > { %v7431_v43 = vld [vmem:[#allocation10_spill] sm:$0xff] }
 0xa6d   : > { %4872 = vmatpush3.bf16.msra.mxu0 %v7422_v31  ;;  %4904 = vmatpush3.bf16.msra.mxu1 %v7423_v49  ;;  %v3535_v31 = vld [vmem:[%s7152_s16 + $0x18] sm:$0xff] }
 0xa6e   : > { %4874 = vmatprep.subr.bf16.mxu0 %v7424_v23  ;;  %4906 = vmatprep.subr.bf16.mxu1 %v7425_v58  ;;  %v7432_v49 = vld [vmem:[#allocation11_spill] sm:$0xff] }
 0xa71   : > { %4876 = vmatpush3.bf16.msra.mxu0 %v7426_v13  ;;  %4908 = vmatpush3.bf16.msra.mxu1 %v7427_v56 }
 0xa72   : > { %4909 = vmatprep.subr.bf16.mxu0 %v7428_v27 }
 0xb26   : > { %v6955_v46 = vpop.f32.mrb[32].mxu0  ;;  %v6957_v32 = vpop.f32.mrb[32].mxu1 }
 0xb27   : > { %v6959_v52 = vpop.f32.mrb[33].mxu0  ;;  %v6961_v48 = vpop.f32.mrb[33].mxu1 }
 0xb28   : > { %3600 = vmatprep.mubr.f32.mxu0 %v6959_v52  ;;  %3685 = vmatprep.mubr.f32.mxu1 %v6961_v48 }
 0xb29   : > { %3601 = vmatmul.mubr.f32.vlgmr.msra.gmra.mrb[40].mxu0 %v6955_v46  ;;  %3686 = vmatmul.mubr.f32.vlgmr.msra.gmra.mrb[40].mxu1 %v6957_v32 }
 0xb2a   : > { %v6967_v42 = vpop.f32.mrb[34].mxu0  ;;  %v6969_v22 = vpop.f32.mrb[34].mxu1 }
 0xb2b   : > { %v6971_v60 = vpop.f32.mrb[35].mxu0  ;;  %v6973_v25 = vpop.f32.mrb[35].mxu1 }
 0xb2c   : > { %3605 = vmatprep.mubr.f32.mxu0 %v6971_v60  ;;  %3690 = vmatprep.mubr.f32.mxu1 %v6973_v25 }
 0xb2d   : > { %3606 = vmatmul.mubr.f32.gmra.mrb[42].mxu0 %v6967_v42  ;;  %3691 = vmatmul.mubr.f32.gmra.mrb[42].mxu1 %v6969_v22 }
 0xb2e   : > { %v6979_v16 = vpop.f32.mrb[36].mxu0  ;;  %v6981_v53 = vpop.f32.mrb[36].mxu1 }
 0xb2f   : > { %v6983_v51 = vpop.f32.mrb[37].mxu0  ;;  %v6985_v40 = vpop.f32.mrb[37].mxu1 }
 0xb30   : > { %3610 = vmatprep.mubr.f32.mxu0 %v6983_v51  ;;  %3695 = vmatprep.mubr.f32.mxu1 %v6985_v40 }
 0xb31   : > { %3611 = vmatmul.mubr.f32.gmra.mrb[44].mxu0 %v6979_v16  ;;  %3696 = vmatmul.mubr.f32.gmra.mrb[44].mxu1 %v6981_v53 }
 0xb32   : > { %v6991_v55 = vpop.f32.mrb[38].mxu0  ;;  %v6993_v1 = vpop.f32.mrb[38].mxu1 }
 0xb33   : > { %v6995_v39 = vpop.f32.mrb[39].mxu0  ;;  %v6997_v3 = vpop.f32.mrb[39].mxu1 }
 0xb34   : > { %3615 = vmatprep.mubr.f32.mxu0 %v6995_v39  ;;  %3700 = vmatprep.mubr.f32.mxu1 %v6997_v3 }
 0xb35   : > { %3616 = vmatmul.mubr.f32.gmra.mrb[46].mxu0 %v6991_v55  ;;  %3701 = vmatmul.mubr.f32.gmra.mrb[46].mxu1 %v6993_v1 }
 0xb36   : > { %4628 = vmatprep.mubr.msk.f32.mxu0 %vm5111_vm11, %v7294_v26  ;;  %4633 = vmatprep.mubr.msk.f32.mxu1 %vm2106_vm13, %v3532_v10 }
 0xbfc   : > { %v4530_v30 = vpop.f32.mrb[40].mxu0  ;;  %v4574_v11 = vpop.f32.mrb[40].mxu1 }
 0xbfd   : > { %v4531_v37 = vpop.f32.mrb[41].mxu0  ;;  %v4575_v7 = vpop.f32.mrb[41].mxu1 }
 0xbfe   : > { %v4532_v36 = vadd.f32 %v4531_v37, %v4530_v30  ;;  %v4576_v28 = vadd.f32 %v4575_v7, %v4574_v11 }
 0xc00   : > { %v3688_v57 = vadd.f32 %v4576_v28, %v4532_v36  ;;  %v4533_v6 = vpop.f32.mrb[42].mxu0  ;;  %v4577_v2 = vpop.f32.mrb[42].mxu1 }
 0xc01   : > { %v4534_v38 = vpop.f32.mrb[43].mxu0  ;;  %v4578_v34 = vpop.f32.mrb[43].mxu1 }
 0xc02   : > { %v4535_v9 = vadd.f32 %v4534_v38, %v4533_v6  ;;  %v4579_v20 = vadd.f32 %v4578_v34, %v4577_v2 }
 0xc04   : > { %v3693_v8 = vadd.f32 %v4579_v20, %v4535_v9  ;;  %v4536_v0 = vpop.f32.mrb[44].mxu0  ;;  %v4580_v14 = vpop.f32.mrb[44].mxu1 }
 0xc05   : > { %v4537_v4 = vpop.f32.mrb[45].mxu0  ;;  %v4581_v61 = vpop.f32.mrb[45].mxu1 }
 0xc06   : > { %v4910_v15 = vpack.c.bf16 %v3693_v8, %v3688_v57  ;;  %v4538_v33 = vadd.f32 %v4537_v4, %v4536_v0  ;;  %v4582_v21 = vadd.f32 %v4581_v61, %v4580_v14 }
 0xc08   : > { %v3698_v35 = vadd.f32 %v4582_v21, %v4538_v33  ;;  %v4539_v50 = vpop.f32.mrb[46].mxu0  ;;  %v4583_v41 = vpop.f32.mrb[46].mxu1  ;;  %4911 = vmatpush3.bf16.msra.mxu0 %v4910_v15 }
 0xc09   : > { %v4540_v59 = vpop.f32.mrb[47].mxu0  ;;  %v4584_v47 = vpop.f32.mrb[47].mxu1  ;;  %4912 = vmatprep.subr.bf16.mxu0 %v7428_v27 }
 0xc0a   : > { %v4541_v19 = vadd.f32 %v4540_v59, %v4539_v50  ;;  %v4585_v24 = vadd.f32 %v4584_v47, %v4583_v41 }
 0xc0c   : > { %v3703_v54 = vadd.f32 %v4585_v24, %v4541_v19  ;;  %v5053_v19 = vld [vmem:[%s5294_s20] sm:$0xff] }
 0xc0e   : > { %v4913_v44 = vpack.c.bf16 %v3703_v54, %v3698_v35  ;;  %v5054_v54 = vld [vmem:[%s5294_s20 + $0x10] sm:$0xff] }
 0xc10   : > { %4914 = vmatpush3.bf16.msra.mxu0 %v4913_v44 }
 0xc11   : > { %4315 = vmatprep.subr.msk.mxu0 %vm2113_vm14, %v7429_v62 }
 0xc13   : > { %4629 = vmatmul.mubr.msk.f32.vlgmr.msra.gmra.mrb[48].mxu0 %vm822_vm0, %v3531_v45  ;;  %v5055_v45 = vld [vmem:[%s5294_s20 + $0x8] sm:$0xff] }
 0xc14   : > { %4316 = vmatpush1.msk.msra.mxu0 %vm2113_vm14, %v7430_v29  ;;  %3980 = vmatprep.mubr.f32.mxu0 %v7294_v26  ;;  %v5056_v29 = vld [vmem:[%s5294_s20 + $0x18] sm:$0xff] }
 0xce6   : > { %v3775_v12 = vpop.f32.mrb[48].mxu0 }
 0xce7   : > { %v3779_v17 = vmax.f32 %v3775_v12, 0.0  ;;  %v4630_v5 = vpop.f32.mrb[49].mxu0 }
 0xce9   : > { %4631 = vmatprep.subr.msk.mxu1 %vm2113_vm14, %v3779_v17 }
 0xcea   : > { %4632 = vmatpush3.msk.msra.mxu1 %vm2113_vm14, %v3779_v17 }
 0xceb   : > { %4634 = vmatmul.mubr.msk.f32.vlgmr.msra.gmra.mrb[48].mxu1 %vm2106_vm13, %v3533_v18  ;;  %4321 = vmatprep.subr.msk.mxu1 %vm2113_vm14, %v7431_v43 }
 0xcec   : > { %4636 = vmatprep.mubr.msk.f32.mxu1 %vm2106_vm13, %v3534_v63  ;;  %4322 = vmatpush1.msk.msra.mxu1 %vm2113_vm14, %v7432_v49  ;;  %v5057_v63 = vld [vmem:[%s5294_s20 + $0x20] sm:$0xff] }
 0xcef   : > { %4637 = vmatmul.mubr.msk.f32.gmra.mrb[50].mxu1 %vm2106_vm13, %v3535_v31  ;;  %v5058_v31 = vld [vmem:[%s5294_s20 + $0x30] sm:$0xff] }
 0xcf0   : > { %4069 = vmatprep.mubr.f32.mxu1 %v7294_v26 }
 0xdbe   : > { %v4635_v23 = vpop.f32.mrb[48].mxu1 }
 0xdbf   : > { %v3881_v58 = vsub.f32 0.0, %v4635_v23  ;;  %v3861_v13 = vpop.f32.mrb[49].mxu1  ;;  %v5059_v23 = vld [vmem:[%s5294_s20 + $0x28] sm:$0xff] }
 0xdc0   : > { %v3880_v56 = vsub.f32 0.0, %v3861_v13 }
 0xdc1   : > { %v3886_v27 = vmul.f32 1.442695, %v3881_v58 }
 0xdc2   : > { %v3884_v30 = vmul.f32 1.442695, %v3880_v56  ;;  %v4638_v11 = vpop.f32.mrb[50].mxu1 }
 0xdc3   : > { %5029 = vpow2.f32 %v3886_v27  ;;  %v3871_v37 = vpop.f32.mrb[51].mxu1  ;;  %v3883_v7 = vsub.f32 0.0, %v4638_v11 }
 0xdc4   : > { %5031 = vpow2.f32 %v3884_v30  ;;  %v3882_v36 = vsub.f32 0.0, %v3871_v37 }
 0xdc5   : > { %v3890_v57 = vmul.f32 1.442695, %v3883_v7  ;;  %v5061_v7 = vld [vmem:[%s5294_s20 + $0x40] sm:$0xff] }
 0xdc6   : > { %v3888_v28 = vmul.f32 1.442695, %v3882_v36 }
 0xdc8   : > { %5033 = vpow2.f32 %v3888_v28  ;;  %v5062_v28 = vld [vmem:[%s5294_s20 + $0x50] sm:$0xff] }
 0xdc9   : > { %5035 = vpow2.f32 %v3890_v57 }
 0xdcd   : > { %v5030_v6 = vpop.eup %5029 }
 0xdce   : > { %v5032_v2 = vpop.eup %5031  ;;  %v3893_v34 = vadd.f32 1.0, %v5030_v6  ;;  %v5063_v6 = vld [vmem:[%s5294_s20 + $0x48] sm:$0xff] }
 0xdcf   : > { %v3892_v38 = vadd.f32 1.0, %v5032_v2 }
 0xdd1   : > { %5037 = vrcp.f32 %v3892_v38 }
 0xdd2   : > { %v5034_v9 = vpop.eup %5033  ;;  %5039 = vrcp.f32 %v3893_v34 }
 0xdd3   : > { %v3894_v20 = vadd.f32 1.0, %v5034_v9  ;;  %v5036_v8 = vpop.eup %5035 }
 0xdd4   : > { %v3895_v0 = vadd.f32 1.0, %v5036_v8 }
 0xdd5   : > { %5041 = vrcp.f32 %v3894_v20 }
 0xdd6   : > { %5043 = vrcp.f32 %v3895_v0 }
 0xddb   : > { %v5038_v14 = vpop.eup %5037 }
 0xddc   : > { %4317 = vmatmul.mubr.msk.f32.vlgmr.msra.gmra.mrb[50].mxu0 %vm2106_vm13, %v5038_v14  ;;  %4323 = vmatmul.mubr.msk.f32.vlgmr.msra.gmra.mrb[52].mxu1 %vm2106_vm13, %v5038_v14  ;;  %v5040_v4 = vpop.eup %5039  ;;  %v5065_v14 = vld [vmem:[%s5294_s20 + $0x60] sm:$0xff] }
 0xddd   : > { %3986 = vmatprep.mubr.f32.mxu0 %v7294_v26  ;;  %4075 = vmatprep.mubr.f32.mxu1 %v7294_v26 }
 0xddf   : > { %v5042_v61 = vpop.eup %5041 }
 0xde0   : > { %4318 = vmatmul.mubr.msk.f32.gmra.mrb[52].mxu0 %vm2106_vm13, %v5040_v4  ;;  %4324 = vmatmul.mubr.msk.f32.gmra.mrb[54].mxu1 %vm2106_vm13, %v5040_v4  ;;  %v5044_v15 = vpop.eup %5043 }
 0xde1   : > { %3992 = vmatprep.mubr.f32.mxu0 %v7294_v26  ;;  %4081 = vmatprep.mubr.f32.mxu1 %v7294_v26 }
 0xde4   : > { %4319 = vmatmul.mubr.msk.f32.gmra.mrb[54].mxu0 %vm2106_vm13, %v5042_v61  ;;  %4325 = vmatmul.mubr.msk.f32.gmra.mrb[56].mxu1 %vm2106_vm13, %v5042_v61  ;;  %v5066_v61 = vld [vmem:[%s5294_s20 + $0x70] sm:$0xff] }
 0xde5   : > { %3998 = vmatprep.mubr.f32.mxu0 %v7294_v26  ;;  %4087 = vmatprep.mubr.f32.mxu1 %v7294_v26 }
 0xde8   : > { %4320 = vmatmul.mubr.msk.f32.gmra.mrb[56].mxu0 %vm2106_vm13, %v5044_v15  ;;  %4326 = vmatmul.mubr.msk.f32.gmra.mrb[58].mxu1 %vm2106_vm13, %v5044_v15 }
 0xeaf   : > { %v3982_v33 = vpop.f32.mrb[50].mxu0  ;;  %v4071_v21 = vpop.f32.mrb[52].mxu1 }
 0xeb0   : > { %v4094_v35 = vmul.f32 %v3982_v33, %v6955_v46  ;;  %v4096_v50 = vmul.f32 %v4071_v21, %v6957_v32  ;;  %v3984_v41 = vpop.f32.mrb[51].mxu0  ;;  %v4073_v59 = vpop.f32.mrb[53].mxu1  ;;  %v5067_v33 = vld [vmem:[%s5294_s20 + $0x68] sm:$0xff]  ;;  %v5068_v21 = vld [vmem:[%s5294_s20 + $0x78] sm:$0xff] }
 0xeb1   : > { %v4095_v47 = vmul.f32 %v3984_v41, %v6959_v52  ;;  %v4097_v26 = vmul.f32 %v4073_v59, %v6961_v48 }
 0xeb2   : > { %v4110_v24 = vadd.f32 %v5053_v19, %v4094_v35  ;;  %v4112_v44 = vadd.f32 %v5054_v54, %v4096_v50 }
 0xeb3   : > { %v4111_v62 = vadd.f32 %v5055_v45, %v4095_v47  ;;  %v4113_v10 = vadd.f32 %v5056_v29, %v4097_v26  ;;  %v3988_v46 = vpop.f32.mrb[52].mxu0  ;;  %v4077_v12 = vpop.f32.mrb[54].mxu1 }
 0xeb4   : > { %4126 = vst [vmem:[%s7061_s23] sm:$0xff] %v4110_v24  ;;  %4128 = vst [vmem:[%s7061_s23 + $0x10] sm:$0xff] %v4112_v44  ;;  %v4098_v32 = vmul.f32 %v3988_v46, %v6967_v42  ;;  %v4100_v52 = vmul.f32 %v4077_v12, %v6969_v22  ;;  %v3990_v48 = vpop.f32.mrb[53].mxu0  ;;  %v4079_v17 = vpop.f32.mrb[55].mxu1  ;;  %v5060_v22 = vld [vmem:[%s5294_s20 + $0x38] sm:$0xff] }
 0xeb5   : > { %4127 = vst [vmem:[%s7061_s23 + $0x8] sm:$0xff] %v4111_v62  ;;  %4129 = vst [vmem:[%s7061_s23 + $0x18] sm:$0xff] %v4113_v10  ;;  %v4099_v5 = vmul.f32 %v3990_v48, %v6971_v60  ;;  %v4101_v18 = vmul.f32 %v4079_v17, %v6973_v25 }
 0xeb6   : > { %v4114_v43 = vadd.f32 %v5057_v63, %v4098_v32  ;;  %v4116_v49 = vadd.f32 %v5058_v31, %v4100_v52 }
 0xeb7   : > { %v4115_v42 = vadd.f32 %v5059_v23, %v4099_v5  ;;  %v4117_v58 = vadd.f32 %v5060_v22, %v4101_v18  ;;  %v3994_v13 = vpop.f32.mrb[54].mxu0  ;;  %v4083_v56 = vpop.f32.mrb[56].mxu1 }
 0xeb8   : > { %4130 = vst [vmem:[%s7061_s23 + $0x20] sm:$0xff] %v4114_v43  ;;  %4132 = vst [vmem:[%s7061_s23 + $0x30] sm:$0xff] %v4116_v49  ;;  %v4102_v60 = vmul.f32 %v3994_v13, %v6979_v16  ;;  %v4104_v25 = vmul.f32 %v4083_v56, %v6981_v53  ;;  %v3996_v27 = vpop.f32.mrb[55].mxu0  ;;  %v4085_v30 = vpop.f32.mrb[57].mxu1  ;;  %v5064_v53 = vld [vmem:[%s5294_s20 + $0x58] sm:$0xff] }
 0xeb9   : > { %4131 = vst [vmem:[%s7061_s23 + $0x28] sm:$0xff] %v4115_v42  ;;  %4133 = vst [vmem:[%s7061_s23 + $0x38] sm:$0xff] %v4117_v58  ;;  %v4103_v11 = vmul.f32 %v3996_v27, %v6983_v51  ;;  %v4105_v37 = vmul.f32 %v4085_v30, %v6985_v40 }
 0xeba   : > { %v4118_v36 = vadd.f32 %v5061_v7, %v4102_v60  ;;  %v4120_v57 = vadd.f32 %v5062_v28, %v4104_v25 }
 0xebb   : > { %v4119_v16 = vadd.f32 %v5063_v6, %v4103_v11  ;;  %v4121_v2 = vadd.f32 %v5064_v53, %v4105_v37  ;;  %v4000_v38 = vpop.f32.mrb[56].mxu0  ;;  %v4089_v34 = vpop.f32.mrb[58].mxu1  ;;  %4148 = sbr.rel (!%p5236_p5) target bundleno = 3786 (0xeca), region = 115 }
 0xebc   : > { %4134 = vst [vmem:[%s7061_s23 + $0x40] sm:$0xff] %v4118_v36  ;;  %4136 = vst [vmem:[%s7061_s23 + $0x50] sm:$0xff] %v4120_v57  ;;  %v4106_v51 = vmul.f32 %v4000_v38, %v6991_v55  ;;  %v4108_v40 = vmul.f32 %v4089_v34, %v6993_v1  ;;  %v4002_v9 = vpop.f32.mrb[57].mxu0  ;;  %v4091_v20 = vpop.f32.mrb[59].mxu1  ;;  %v4164_v1 = vld [vmem:[%s7061_s23] sm:$0xff] (%p5236_p5)  ;;  %v4170_v50 = vld [vmem:[%s7061_s23 + $0x18] sm:$0xff] (%p5236_p5) }
 0xebd   : > { %4135 = vst [vmem:[%s7061_s23 + $0x48] sm:$0xff] %v4119_v16  ;;  %4137 = vst [vmem:[%s7061_s23 + $0x58] sm:$0xff] %v4121_v2  ;;  %v4107_v8 = vmul.f32 %v4002_v9, %v6995_v39  ;;  %v4109_v0 = vmul.f32 %v4091_v20, %v6997_v3  ;;  %v4166_v39 = vld [vmem:[%s7061_s23 + $0x8] sm:$0xff] (%p5236_p5)  ;;  %v4168_v3 = vld [vmem:[%s7061_s23 + $0x10] sm:$0xff] (%p5236_p5) }
 0xebe   : > { %v4122_v4 = vadd.f32 %v5065_v14, %v4106_v51  ;;  %v4124_v15 = vadd.f32 %v5066_v61, %v4108_v40  ;;  %4165 = vst [vmem:[%s4151_s18] sm:$0xff] (%p5236_p5), %v4164_v1  ;;  %4167 = vst [vmem:[%s4151_s18 + $0x8] sm:$0xff] (%p5236_p5), %v4166_v39 }
 0xebf   : > { %v4123_v55 = vadd.f32 %v5067_v33, %v4107_v8  ;;  %v4125_v35 = vadd.f32 %v5068_v21, %v4109_v0  ;;  %v4172_v41 = vld [vmem:[%s7061_s23 + $0x20] sm:$0xff] (%p5236_p5)  ;;  %4169 = vst [vmem:[%s4151_s18 + $0x10] sm:$0xff] (%p5236_p5), %v4168_v3  ;;  %4171 = vst [vmem:[%s4151_s18 + $0x18] sm:$0xff] (%p5236_p5), %v4170_v50  ;;  %v4176_v47 = vld [vmem:[%s7061_s23 + $0x30] sm:$0xff] (%p5236_p5) }
 0xec0   : > { %4138 = vst [vmem:[%s7061_s23 + $0x60] sm:$0xff] %v4122_v4  ;;  %4140 = vst [vmem:[%s7061_s23 + $0x70] sm:$0xff] %v4124_v15  ;;  %v4174_v59 = vld [vmem:[%s7061_s23 + $0x28] sm:$0xff] (%p5236_p5)  ;;  %v4178_v26 = vld [vmem:[%s7061_s23 + $0x38] sm:$0xff] (%p5236_p5) }
 0xec1   : > { %4139 = vst [vmem:[%s7061_s23 + $0x68] sm:$0xff] %v4123_v55  ;;  %4141 = vst [vmem:[%s7061_s23 + $0x78] sm:$0xff] %v4125_v35 }
 0xec2   : > { %4173 = vst [vmem:[%s4151_s18 + $0x40] sm:$0xff] %v4172_v41  ;;  %4175 = vst [vmem:[%s4151_s18 + $0x48] sm:$0xff] %v4174_v59 }
 0xec3   : > { %v4180_v19 = vld [vmem:[%s7061_s23 + $0x40] sm:$0xff]  ;;  %4177 = vst [vmem:[%s4151_s18 + $0x50] sm:$0xff] %v4176_v47  ;;  %4179 = vst [vmem:[%s4151_s18 + $0x58] sm:$0xff] %v4178_v26  ;;  %v4184_v54 = vld [vmem:[%s7061_s23 + $0x50] sm:$0xff] }
 0xec4   : > { %4181 = vst [vmem:[%s4151_s18 + $0x80] sm:$0xff] %v4180_v19  ;;  %v4182_v24 = vld [vmem:[%s7061_s23 + $0x48] sm:$0xff]  ;;  %v4186_v44 = vld [vmem:[%s7061_s23 + $0x58] sm:$0xff]  ;;  %4185 = vst [vmem:[%s4151_s18 + $0x90] sm:$0xff] %v4184_v54 }
 0xec5   : > { %4183 = vst [vmem:[%s4151_s18 + $0x88] sm:$0xff] %v4182_v24  ;;  %4187 = vst [vmem:[%s4151_s18 + $0x98] sm:$0xff] %v4186_v44 }
 0xec7   : > { %v4188_v45 = vld [vmem:[%s7061_s23 + $0x60] sm:$0xff]  ;;  %v4192_v29 = vld [vmem:[%s7061_s23 + $0x70] sm:$0xff] }
 0xec8   : > { %v4190_v62 = vld [vmem:[%s7061_s23 + $0x68] sm:$0xff]  ;;  %4189 = vst [vmem:[%s4151_s18 + $0xc0] sm:$0xff] %v4188_v45  ;;  %4193 = vst [vmem:[%s4151_s18 + $0xd0] sm:$0xff] %v4192_v29  ;;  %v4194_v10 = vld [vmem:[%s7061_s23 + $0x78] sm:$0xff] }
 0xec9   : > { %4191 = vst [vmem:[%s4151_s18 + $0xc8] sm:$0xff] %v4190_v62  ;;  %4195 = vst [vmem:[%s4151_s18 + $0xd8] sm:$0xff] %v4194_v10 }
 0xeca PF: > { %p24_p10 = scmp.ge.s32.totalorder %s5223_s28, 4   ;;  %s7434_s24 = smov %s5087_s25 }
 0xecb   : > { %s7435_s25 = smov %s5234_s30  ;;  %s7436_s26 = smov %s5223_s28 }
 0xecc   :  { %26 = sbr.rel (!%p24_p10) target bundleno = 8 (0x8), region = 169 }

</bundles_post_ra>
